<compile_context>
chip_gen: v5e
topology: v5e:2x2
jax: 0.10.0
libtpu: 0.0.40
codegen_flags: <defaults>
</compile_context>

<pallas_src>
import numpy as np
import jax
import jax.numpy as jnp
from jax.experimental import pallas as pl
from jax.experimental.pallas import tpu as pltpu

# ---------------- module configuration (matches __init__) --------------------
RES_RAW = 10              # in_channels['res'] before position concat
POS_DIM = 256             # hardcoded +256 when concat_positions=True
IN_RES = RES_RAW + POS_DIM          # 266 = in_channels_orig['res']
HIDDEN = 20               # hidden_channels['res_backbone_res'][i]
LAYERS = 3
XDEC = (30, 30)           # Xdecoder_hidden
CDEC = (10, 10)           # contactdecoder_hidden
LASTLIN = IN_RES          # residual=True -> lastlin = in_channels_orig['res']
GN_EPS = 1e-5             # PyG GraphNorm eps
DYT_ALPHA0 = 0.5          # DynamicTanh alpha init

_SQRT_2_OVER_PI = 0.7978845608028654


def _gelu(x):
    # TODO(synk): PyTorch nn.GELU() default is the exact erf form; tanh
    # approximation used here (differences at the ~1e-3 level).
    return 0.5 * x * (1.0 + jnp.tanh(_SQRT_2_OVER_PI * (x + 0.044715 * x * x * x)))


# --------------------------- parameter packing --------------------------------
def _pack_rows(blocks, ncols):
    """Vertically stack 2D blocks sharing `ncols`, 8-aligning every block start
    so in-kernel row slices never straddle a sublane tile boundary."""
    offs, rows = [], 0
    for blk in blocks:
        rows = (rows + 7) & ~7
        offs.append(rows)
        rows += blk.shape[0]
    rows = (rows + 7) & ~7
    buf = np.zeros((rows, ncols), np.float32)
    for blk, o in zip(blocks, offs):
        buf[o:o + blk.shape[0], :] = np.asarray(blk, np.float32)
    return jnp.asarray(buf), tuple(offs)


def pack_params(p):
    """Pack all small weights/biases into 4 f32 slabs grouped by column width."""
    H = HIDDEN

    # vec20 rows: 0-2 sage bias | 3-5 gn weight | 6-8 gn bias | 9-11 gn alpha
    #             12-14 DyT1 gamma segs | 15-17 DyT1 beta segs | 18 scalars
    vec20 = np.zeros((19, H), np.float32)
    for i in range(LAYERS):
        vec20[i] = np.asarray(p['sage_bias'][i])
        vec20[3 + i] = np.asarray(p['gn_weight'][i])
        vec20[6 + i] = np.asarray(p['gn_bias'][i])
        vec20[9 + i] = np.asarray(p['gn_mean_scale'][i])
        vec20[12 + i] = np.asarray(p['dyt1_weight'][i * H:(i + 1) * H])
        vec20[15 + i] = np.asarray(p['dyt1_bias'][i * H:(i + 1) * H])
    vec20[18, 0] = float(p['dyt1_alpha'])
    vec20[18, 1] = float(p['dyt2_alpha'])
    vec20[18, 2] = float(p['wc3_bias'])

    p20, o20 = _pack_rows(
        [p['sage_wn'][0], p['sage_wr'][0],
         p['sage_wn'][1], p['sage_wr'][1],
         p['sage_wn'][2], p['sage_wr'][2], vec20], H)

    wl1 = np.asarray(p['lin1_w'])                         # (60, X0)
    vec30 = np.stack([np.asarray(p['lin1_b']), np.asarray(p['lin2_b'])])
    p30, o30 = _pack_rows(
        [wl1[0:H], wl1[H:2 * H], wl1[2 * H:3 * H], p['lin2_w'], vec30], XDEC[0])

    vec266 = np.stack([np.asarray(p['lin3_b']),
                       np.asarray(p['dyt2_weight']),
                       np.asarray(p['dyt2_bias'])])
    p266, o266 = _pack_rows([p['lin3_w'], vec266], LASTLIN)

    wc1 = np.asarray(p['wc1_w'])                          # (2*LASTLIN, C0)
    vec10 = np.stack([np.asarray(p['wc1_b']), np.asarray(p['wc2_b']),
                      np.asarray(p['wc3_w']).reshape(-1)])
    p10, o10 = _pack_rows([wc1[:LASTLIN], wc1[LASTLIN:], p['wc2_w'], vec10],
                          CDEC[0])

    return (p20, p30, p266, p10), (o20, o30, o266, o10)


# ------------------------------- kernel ---------------------------------------
def _build_kernel(offs):
    o20, o30, o266, o10 = offs
    H, X0, X1, C0 = HIDDEN, XDEC[0], XDEC[1], CDEC[0]
    f32, bf16 = jnp.float32, jnp.bfloat16

    def kernel(x_ref, a_ref, ssrc_ref, sdst_ref, p20, p30, p266, p10, out_ref):
        x = x_ref[0]                       # (N, IN_RES)  f32
        A = a_ref[0]                       # (N, N)       bf16, row-normalized
        Ssrc = ssrc_ref[0]                 # (EP, N)      bf16 one-hot rows
        Sdst = sdst_ref[0]

        vec20 = p20[o20[6]:o20[6] + 19, :]
        vec30 = p30[o30[4]:o30[4] + 2, :]
        vec266 = p266[o266[1]:o266[1] + 3, :]
        vec10 = p10[o10[3]:o10[3] + 3, :]

        def row(v, i):                     # (1, C) slice of a loaded value
            return v[i:i + 1, :]

        scal = row(vec20, 18)
        a1 = scal[:, 0:1]                  # DyT1 alpha
        a2 = scal[:, 1:2]                  # DyT2 alpha
        bc3 = scal[:, 2:3]                 # contact head final bias

        def dot(a, b):                     # bf16 MXU matmul, f32 accumulation
            return jnp.dot(a.astype(bf16), b.astype(bf16),
                           preferred_element_type=f32)

        # SAGEConv: lin_l(mean_neighbors) + lin_r(x_self); bias only on lin_l.
        # Aggregate AFTER the linear:  A @ (h @ Wn)  ==  (A @ h) @ Wn.
        def sage(h, layer, fin):
            wn = p20[o20[2 * layer]:o20[2 * layer] + fin, :]
            wr = p20[o20[2 * layer + 1]:o20[2 * layer + 1] + fin, :]
            return dot(A, dot(h, wn)) + dot(h, wr) + row(vec20, layer)

        # PyG GraphNorm (per graph): gamma*(x-alpha*mean)/sqrt(var+eps)+beta
        def graphnorm(h, layer):
            gamma, beta = row(vec20, 3 + layer), row(vec20, 6 + layer)
            alpha = row(vec20, 9 + layer)
            mean = jnp.mean(h, axis=0, keepdims=True)
            cen = h - alpha * mean
            var = jnp.mean(cen * cen, axis=0, keepdims=True)
            return gamma * cen * jax.lax.rsqrt(var + GN_EPS) + beta

        # ---- GNN stack: conv -> GELU -> GraphNorm -> (+prev if i>0) ----------
        h0 = graphnorm(_gelu(sage(x, 0, IN_RES)), 0)
        h1 = graphnorm(_gelu(sage(h0, 1, H)), 1) + h0
        h2 = graphnorm(_gelu(sage(h1, 2, H)), 2) + h1

        # ---- self.lin: DyT(60) -> Linear -> GELU -> Linear -> GELU -> Linear
        #      -> DyT(266).  JK('cat') + first Linear done via split weights. --
        z1 = row(vec30, 0)                                       # bl1
        for i, h in enumerate((h0, h1, h2)):
            t = row(vec20, 12 + i) * jnp.tanh(a1 * h) + row(vec20, 15 + i)
            z1 = z1 + dot(t, p30[o30[i]:o30[i] + H, :])
        z1 = _gelu(z1)
        z2 = _gelu(dot(z1, p30[o30[3]:o30[3] + X0, :]) + row(vec30, 1))
        z3 = dot(z2, p266[o266[0]:o266[0] + X1, :]) + row(vec266, 0)
        z = row(vec266, 1) * jnp.tanh(a2 * z3) + row(vec266, 2)   # DyT2

        # residual + L2 normalize (f32, EUP reciprocal)
        z = z + x
        nrm = jnp.sqrt(jnp.sum(z * z, axis=1, keepdims=True))
        z = z * pl.reciprocal(nrm + 1e-10, approx=True)

        # ---- contact_mlp on cat([z[src], z[dst]]): split first Linear and
        #      gather via one-hot selection matmuls (no concat, no gather op). -
        ua = dot(z, p10[o10[0]:o10[0] + LASTLIN, :])              # (N, C0)
        ub = dot(z, p10[o10[1]:o10[1] + LASTLIN, :])
        c = _gelu(dot(Ssrc, ua) + dot(Sdst, ub) + row(vec10, 0))  # (EP, C0)
        c = _gelu(dot(c, p10[o10[2]:o10[2] + C0, :]) + row(vec10, 1))
        logits = jnp.sum(c * row(vec10, 2), axis=1, keepdims=True) + bc3
        out_ref[0] = 1.0 / (1.0 + jnp.exp(-logits))               # sigmoid

    return kernel


# ------------------------------- wrapper ---------------------------------------
def hetero_gae_geo_decoder(x_res, positions, edge_index, contact_pred_index,
                           params):
    """Batched forward.
       x_res:              (B, N, RES_RAW) f32
       positions:          (B, N, POS_DIM) f32
       edge_index:         (B, 2, E_bb)    int32  backbone edges (src, dst)
       contact_pred_index: (B, 2, E_c)     int32  node pairs to score
    """
    B, N, _ = x_res.shape
    E_c = contact_pred_index.shape[-1]
    EP = ((E_c + 127) // 128) * 128        # lane-pad the edge axis

    # concat_positions=True; dropout is identity in eval.
    x_in = jnp.concatenate([x_res, positions], axis=-1).astype(jnp.float32)

    # Dense row-normalized mean-aggregation operator per graph (bf16: matmul-only).
    def build_adj(ei):
        src, dst = ei[0], ei[1]
        adj = jnp.zeros((N, N), jnp.float32).at[dst, src].add(1.0)
        deg = jnp.sum(adj, axis=1, keepdims=True)
        return adj / jnp.maximum(deg, 1.0)   # deg=0 rows -> 0 (PyG mean-agg)
    A = jax.vmap(build_adj)(edge_index).astype(jnp.bfloat16)

    # One-hot selection matrices for the z[contact_pred_index[k]] gathers
    # (padded slots use index -1 -> all-zero rows, sliced off afterwards).
    pad = jnp.full((B, 2, EP - E_c), -1, contact_pred_index.dtype)
    cpi = jnp.concatenate([contact_pred_index, pad], axis=-1)
    Ssrc = jax.nn.one_hot(cpi[:, 0, :], N, dtype=jnp.bfloat16)    # (B, EP, N)
    Sdst = jax.nn.one_hot(cpi[:, 1, :], N, dtype=jnp.bfloat16)

    (p20, p30, p266, p10), offs = pack_params(params)
    kernel = _build_kernel(offs)

    out = pl.pallas_call(
        kernel,
        out_shape=jax.ShapeDtypeStruct((B, EP, 1), jnp.float32),
        grid=(B,),
        in_specs=[
            pl.BlockSpec((1, N, IN_RES), lambda b: (b, 0, 0)),
            pl.BlockSpec((1, N, N), lambda b: (b, 0, 0)),
            pl.BlockSpec((1, EP, N), lambda b: (b, 0, 0)),
            pl.BlockSpec((1, EP, N), lambda b: (b, 0, 0)),
            pl.BlockSpec(p20.shape, lambda b: (0, 0)),
            pl.BlockSpec(p30.shape, lambda b: (0, 0)),
            pl.BlockSpec(p266.shape, lambda b: (0, 0)),
            pl.BlockSpec(p10.shape, lambda b: (0, 0)),
        ],
        out_specs=pl.BlockSpec((1, EP, 1), lambda b: (b, 0, 0)),
        compiler_params=pltpu.CompilerParams(
            dimension_semantics=("parallel",)),      # graphs -> megacore
    )(x_in, A, Ssrc, Sdst, p20, p30, p266, p10)

    edge_probs = out[:, :E_c, 0]
    # output_fft=False / output_rt=False -> remaining heads are not evaluated.
    return {'edge_probs': edge_probs, 'zgodnode': None,
            'fft2pred': None, 'rt_pred': None}


# --------------------------- synthetic parameters ------------------------------
def init_params(key):
    def lin(k, fin, fout):
        k1, k2 = jax.random.split(k)
        bound = 1.0 / np.sqrt(fin)
        w = jax.random.uniform(k1, (fin, fout), jnp.float32, -bound, bound)
        b = jax.random.uniform(k2, (fout,), jnp.float32, -bound, bound)
        return w, b

    ks = jax.random.split(key, 16)
    p = {'sage_wn': [], 'sage_wr': [], 'sage_bias': []}
    conv_in = [IN_RES, HIDDEN, HIDDEN]
    for i in range(LAYERS):
        wn, b = lin(ks[i], conv_in[i], HIDDEN)                       # lin_l
        wr, _ = lin(jax.random.fold_in(ks[i], 7), conv_in[i], HIDDEN)  # lin_r
        p['sage_wn'].append(wn); p['sage_wr'].append(wr); p['sage_bias'].append(b)

    p['gn_weight'] = [jnp.ones((HIDDEN,), jnp.float32)] * LAYERS
    p['gn_bias'] = [jnp.zeros((HIDDEN,), jnp.float32)] * LAYERS
    p['gn_mean_scale'] = [jnp.ones((HIDDEN,), jnp.float32)] * LAYERS

    p['dyt1_weight'] = jnp.ones((HIDDEN * LAYERS,), jnp.float32)
    p['dyt1_bias'] = jnp.zeros((HIDDEN * LAYERS,), jnp.float32)
    p['dyt1_alpha'] = DYT_ALPHA0
    p['lin1_w'], p['lin1_b'] = lin(ks[4], HIDDEN * LAYERS, XDEC[0])
    p['lin2_w'], p['lin2_b'] = lin(ks[5], XDEC[0], XDEC[1])
    p['lin3_w'], p['lin3_b'] = lin(ks[6], XDEC[1], LASTLIN)
    p['dyt2_weight'] = jnp.ones((LASTLIN,), jnp.float32)
    p['dyt2_bias'] = jnp.zeros((LASTLIN,), jnp.float32)
    p['dyt2_alpha'] = DYT_ALPHA0

    p['wc1_w'], p['wc1_b'] = lin(ks[7], 2 * LASTLIN, CDEC[0])
    p['wc2_w'], p['wc2_b'] = lin(ks[8], CDEC[0], CDEC[1])
    wc3, bc3 = lin(ks[9], CDEC[1], 1)
    p['wc3_w'] = wc3
    p['wc3_bias'] = float(bc3[0])
    return p


# ----------------------------------- main --------------------------------------
if __name__ == "__main__":
    key = jax.random.PRNGKey(0)
    k_x, k_p, k_c, k_w = jax.random.split(key, 4)

    B, N, E_C = 2, 64, 100
    x_res = jax.random.normal(k_x, (B, N, RES_RAW), jnp.float32)
    positions = jax.random.normal(k_p, (B, N, POS_DIM), jnp.float32)

    # backbone chain edges i <-> i+1 per graph ('res','backbone','res')
    fwd = jnp.arange(N - 1, dtype=jnp.int32)
    src = jnp.concatenate([fwd, fwd + 1])
    dst = jnp.concatenate([fwd + 1, fwd])
    edge_index = jnp.broadcast_to(jnp.stack([src, dst], 0)[None],
                                  (B, 2, 2 * (N - 1)))

    # random node pairs to score for contacts
    contact_pred_index = jax.random.randint(k_c, (B, 2, E_C), 0, N, jnp.int32)

    params = init_params(k_w)

    out = hetero_gae_geo_decoder(x_res, positions, edge_index,
                                 contact_pred_index, params)
    probs = jax.block_until_ready(out['edge_probs'])

    assert probs.shape == (B, E_C)
    assert bool(jnp.all(jnp.isfinite(probs)))
    assert bool(jnp.all((probs >= 0.0) & (probs <= 1.0)))
    print("KERNEL_OK")
</pallas_src>

<mosaic_0001>
module attributes {stable_mosaic.version = 11 : i64} {
  func.func @kernel(%arg0: i32, %arg1: memref<1x64x266xf32, #tpu.memory_space<vmem>>, %arg2: memref<1x64x64xbf16, #tpu.memory_space<vmem>>, %arg3: memref<1x128x64xbf16, #tpu.memory_space<vmem>>, %arg4: memref<1x128x64xbf16, #tpu.memory_space<vmem>>, %arg5: memref<664x20xf32, #tpu.memory_space<vmem>>, %arg6: memref<112x30xf32, #tpu.memory_space<vmem>>, %arg7: memref<40x266xf32, #tpu.memory_space<vmem>>, %arg8: memref<568x10xf32, #tpu.memory_space<vmem>>, %arg9: memref<1x128x1xf32, #tpu.memory_space<vmem>>) attributes {dimension_semantics = [#tpu.dimension_semantics<parallel>], iteration_bounds = array<i64: 2>, scalar_prefetch = 0 : i64, scratch_operands = 0 : i64, tpu.core_type = #tpu.core_type<tc>, window_params = [{transform_indices = @transform_0, window_bounds = array<i64: 1, 64, 266>}, {transform_indices = @transform_1, window_bounds = array<i64: 1, 64, 64>}, {transform_indices = @transform_2, window_bounds = array<i64: 1, 128, 64>}, {transform_indices = @transform_3, window_bounds = array<i64: 1, 128, 64>}, {pipeline_mode = #tpu.pipeline_mode<synchronous>, transform_indices = @transform_4, window_bounds = array<i64: 664, 20>}, {pipeline_mode = #tpu.pipeline_mode<synchronous>, transform_indices = @transform_5, window_bounds = array<i64: 112, 30>}, {pipeline_mode = #tpu.pipeline_mode<synchronous>, transform_indices = @transform_6, window_bounds = array<i64: 40, 266>}, {pipeline_mode = #tpu.pipeline_mode<synchronous>, transform_indices = @transform_7, window_bounds = array<i64: 568, 10>}, {transform_indices = @transform_8, window_bounds = array<i64: 1, 128, 1>}]} {
    %c0 = arith.constant 0 : index
    %c0_0 = arith.constant 0 : index
    %c0_1 = arith.constant 0 : index
    %0 = vector.load %arg1[%c0, %c0_0, %c0_1] : memref<1x64x266xf32, #tpu.memory_space<vmem>>, vector<1x64x266xf32>
    %1 = vector.shape_cast %0 : vector<1x64x266xf32> to vector<64x266xf32>
    %c0_2 = arith.constant 0 : index
    %c0_3 = arith.constant 0 : index
    %c0_4 = arith.constant 0 : index
    %2 = vector.load %arg2[%c0_2, %c0_3, %c0_4] : memref<1x64x64xbf16, #tpu.memory_space<vmem>>, vector<1x64x64xbf16>
    %3 = vector.shape_cast %2 : vector<1x64x64xbf16> to vector<64x64xbf16>
    %c0_5 = arith.constant 0 : index
    %c0_6 = arith.constant 0 : index
    %c0_7 = arith.constant 0 : index
    %4 = vector.load %arg3[%c0_5, %c0_6, %c0_7] : memref<1x128x64xbf16, #tpu.memory_space<vmem>>, vector<1x128x64xbf16>
    %5 = vector.shape_cast %4 : vector<1x128x64xbf16> to vector<128x64xbf16>
    %c0_8 = arith.constant 0 : index
    %c0_9 = arith.constant 0 : index
    %c0_10 = arith.constant 0 : index
    %6 = vector.load %arg4[%c0_8, %c0_9, %c0_10] : memref<1x128x64xbf16, #tpu.memory_space<vmem>>, vector<1x128x64xbf16>
    %7 = vector.shape_cast %6 : vector<1x128x64xbf16> to vector<128x64xbf16>
    %c640 = arith.constant 640 : index
    %c0_11 = arith.constant 0 : index
    %8 = vector.load %arg5[%c640, %c0_11] : memref<664x20xf32, #tpu.memory_space<vmem>>, vector<19x20xf32>
    %c104 = arith.constant 104 : index
    %c0_12 = arith.constant 0 : index
    %9 = vector.load %arg6[%c104, %c0_12] : memref<112x30xf32, #tpu.memory_space<vmem>>, vector<2x30xf32>
    %c32 = arith.constant 32 : index
    %c0_13 = arith.constant 0 : index
    %10 = vector.load %arg7[%c32, %c0_13] : memref<40x266xf32, #tpu.memory_space<vmem>>, vector<3x266xf32>
    %c560 = arith.constant 560 : index
    %c0_14 = arith.constant 0 : index
    %11 = vector.load %arg8[%c560, %c0_14] : memref<568x10xf32, #tpu.memory_space<vmem>>, vector<3x10xf32>
    %12 = vector.extract_strided_slice %8 {offsets = [18, 0], sizes = [1, 20], strides = [1, 1]} : vector<19x20xf32> to vector<1x20xf32>
    %13 = vector.extract_strided_slice %12 {offsets = [0, 0], sizes = [1, 1], strides = [1, 1]} : vector<1x20xf32> to vector<1x1xf32>
    %14 = vector.extract_strided_slice %12 {offsets = [0, 1], sizes = [1, 1], strides = [1, 1]} : vector<1x20xf32> to vector<1x1xf32>
    %15 = vector.extract_strided_slice %12 {offsets = [0, 2], sizes = [1, 1], strides = [1, 1]} : vector<1x20xf32> to vector<1x1xf32>
    %c0_15 = arith.constant 0 : index
    %c0_16 = arith.constant 0 : index
    %16 = vector.load %arg5[%c0_15, %c0_16] : memref<664x20xf32, #tpu.memory_space<vmem>>, vector<266x20xf32>
    %c272 = arith.constant 272 : index
    %c0_17 = arith.constant 0 : index
    %17 = vector.load %arg5[%c272, %c0_17] : memref<664x20xf32, #tpu.memory_space<vmem>>, vector<266x20xf32>
    %18 = arith.truncf %1 : vector<64x266xf32> to vector<64x266xbf16>
    %19 = arith.truncf %16 : vector<266x20xf32> to vector<266x20xbf16>
    %cst = arith.constant dense<0.000000e+00> : vector<64x20xf32>
    %20 = tpu.matmul %18, %19, %cst {dimension_numbers = #tpu.dot_dimension_numbers<[1], [0], [0], [1], [0, 0, 1, 1], [], []>} : vector<64x266xbf16>, vector<266x20xbf16>, vector<64x20xf32> -> vector<64x20xf32>
    %21 = arith.truncf %20 : vector<64x20xf32> to vector<64x20xbf16>
    %cst_18 = arith.constant dense<0.000000e+00> : vector<64x20xf32>
    %22 = tpu.matmul %3, %21, %cst_18 {dimension_numbers = #tpu.dot_dimension_numbers<[1], [0], [0], [1], [0, 0, 1, 1], [], []>} : vector<64x64xbf16>, vector<64x20xbf16>, vector<64x20xf32> -> vector<64x20xf32>
    %23 = arith.truncf %1 : vector<64x266xf32> to vector<64x266xbf16>
    %24 = arith.truncf %17 : vector<266x20xf32> to vector<266x20xbf16>
    %cst_19 = arith.constant dense<0.000000e+00> : vector<64x20xf32>
    %25 = tpu.matmul %23, %24, %cst_19 {dimension_numbers = #tpu.dot_dimension_numbers<[1], [0], [0], [1], [0, 0, 1, 1], [], []>} : vector<64x266xbf16>, vector<266x20xbf16>, vector<64x20xf32> -> vector<64x20xf32>
    %26 = arith.addf %22, %25 : vector<64x20xf32>
    %27 = vector.extract_strided_slice %8 {offsets = [0, 0], sizes = [1, 20], strides = [1, 1]} : vector<19x20xf32> to vector<1x20xf32>
    %28 = vector.broadcast %27 : vector<1x20xf32> to vector<64x20xf32>
    %29 = arith.addf %26, %28 : vector<64x20xf32>
    %cst_20 = arith.constant 5.000000e-01 : f32
    %30 = vector.broadcast %cst_20 : f32 to vector<64x20xf32>
    %31 = arith.mulf %30, %29 : vector<64x20xf32>
    %cst_21 = arith.constant 4.471500e-02 : f32
    %32 = vector.broadcast %cst_21 : f32 to vector<64x20xf32>
    %33 = arith.mulf %32, %29 : vector<64x20xf32>
    %34 = arith.mulf %33, %29 : vector<64x20xf32>
    %35 = arith.mulf %34, %29 : vector<64x20xf32>
    %36 = arith.addf %29, %35 : vector<64x20xf32>
    %cst_22 = arith.constant 0.797884583 : f32
    %37 = vector.broadcast %cst_22 : f32 to vector<64x20xf32>
    %38 = arith.mulf %37, %36 : vector<64x20xf32>
    %39 = math.tanh %38 : vector<64x20xf32>
    %cst_23 = arith.constant 1.000000e+00 : f32
    %40 = vector.broadcast %cst_23 : f32 to vector<64x20xf32>
    %41 = arith.addf %40, %39 : vector<64x20xf32>
    %42 = arith.mulf %31, %41 : vector<64x20xf32>
    %43 = vector.extract_strided_slice %8 {offsets = [3, 0], sizes = [1, 20], strides = [1, 1]} : vector<19x20xf32> to vector<1x20xf32>
    %44 = vector.extract_strided_slice %8 {offsets = [6, 0], sizes = [1, 20], strides = [1, 1]} : vector<19x20xf32> to vector<1x20xf32>
    %45 = vector.extract_strided_slice %8 {offsets = [9, 0], sizes = [1, 20], strides = [1, 1]} : vector<19x20xf32> to vector<1x20xf32>
    %cst_24 = arith.constant dense<0.000000e+00> : vector<20xf32>
    %46 = vector.multi_reduction <add>, %42, %cst_24 [0] : vector<64x20xf32> to vector<20xf32>
    %47 = vector.shape_cast %46 : vector<20xf32> to vector<1x20xf32>
    %cst_25 = arith.constant 6.400000e+01 : f32
    %48 = vector.broadcast %cst_25 : f32 to vector<1x20xf32>
    %49 = arith.divf %47, %48 : vector<1x20xf32>
    %50 = arith.mulf %45, %49 : vector<1x20xf32>
    %51 = vector.broadcast %50 : vector<1x20xf32> to vector<64x20xf32>
    %52 = arith.subf %42, %51 : vector<64x20xf32>
    %53 = arith.mulf %52, %52 : vector<64x20xf32>
    %cst_26 = arith.constant dense<0.000000e+00> : vector<20xf32>
    %54 = vector.multi_reduction <add>, %53, %cst_26 [0] : vector<64x20xf32> to vector<20xf32>
    %55 = vector.shape_cast %54 : vector<20xf32> to vector<1x20xf32>
    %cst_27 = arith.constant 6.400000e+01 : f32
    %56 = vector.broadcast %cst_27 : f32 to vector<1x20xf32>
    %57 = arith.divf %55, %56 : vector<1x20xf32>
    %58 = vector.broadcast %43 : vector<1x20xf32> to vector<64x20xf32>
    %59 = arith.mulf %58, %52 : vector<64x20xf32>
    %cst_28 = arith.constant 9.99999974E-6 : f32
    %60 = vector.broadcast %cst_28 : f32 to vector<1x20xf32>
    %61 = arith.addf %57, %60 : vector<1x20xf32>
    %62 = math.rsqrt %61 : vector<1x20xf32>
    %63 = vector.broadcast %62 : vector<1x20xf32> to vector<64x20xf32>
    %64 = arith.mulf %59, %63 : vector<64x20xf32>
    %65 = vector.broadcast %44 : vector<1x20xf32> to vector<64x20xf32>
    %66 = arith.addf %64, %65 : vector<64x20xf32>
    %c544 = arith.constant 544 : index
    %c0_29 = arith.constant 0 : index
    %67 = vector.load %arg5[%c544, %c0_29] : memref<664x20xf32, #tpu.memory_space<vmem>>, vector<20x20xf32>
    %c568 = arith.constant 568 : index
    %c0_30 = arith.constant 0 : index
    %68 = vector.load %arg5[%c568, %c0_30] : memref<664x20xf32, #tpu.memory_space<vmem>>, vector<20x20xf32>
    %69 = arith.truncf %66 : vector<64x20xf32> to vector<64x20xbf16>
    %70 = arith.truncf %67 : vector<20x20xf32> to vector<20x20xbf16>
    %cst_31 = arith.constant dense<0.000000e+00> : vector<64x20xf32>
    %71 = tpu.matmul %69, %70, %cst_31 {dimension_numbers = #tpu.dot_dimension_numbers<[1], [0], [0], [1], [0, 0, 1, 1], [], []>} : vector<64x20xbf16>, vector<20x20xbf16>, vector<64x20xf32> -> vector<64x20xf32>
    %72 = arith.truncf %71 : vector<64x20xf32> to vector<64x20xbf16>
    %cst_32 = arith.constant dense<0.000000e+00> : vector<64x20xf32>
    %73 = tpu.matmul %3, %72, %cst_32 {dimension_numbers = #tpu.dot_dimension_numbers<[1], [0], [0], [1], [0, 0, 1, 1], [], []>} : vector<64x64xbf16>, vector<64x20xbf16>, vector<64x20xf32> -> vector<64x20xf32>
    %74 = arith.truncf %66 : vector<64x20xf32> to vector<64x20xbf16>
    %75 = arith.truncf %68 : vector<20x20xf32> to vector<20x20xbf16>
    %cst_33 = arith.constant dense<0.000000e+00> : vector<64x20xf32>
    %76 = tpu.matmul %74, %75, %cst_33 {dimension_numbers = #tpu.dot_dimension_numbers<[1], [0], [0], [1], [0, 0, 1, 1], [], []>} : vector<64x20xbf16>, vector<20x20xbf16>, vector<64x20xf32> -> vector<64x20xf32>
    %77 = arith.addf %73, %76 : vector<64x20xf32>
    %78 = vector.extract_strided_slice %8 {offsets = [1, 0], sizes = [1, 20], strides = [1, 1]} : vector<19x20xf32> to vector<1x20xf32>
    %79 = vector.broadcast %78 : vector<1x20xf32> to vector<64x20xf32>
    %80 = arith.addf %77, %79 : vector<64x20xf32>
    %cst_34 = arith.constant 5.000000e-01 : f32
    %81 = vector.broadcast %cst_34 : f32 to vector<64x20xf32>
    %82 = arith.mulf %81, %80 : vector<64x20xf32>
    %cst_35 = arith.constant 4.471500e-02 : f32
    %83 = vector.broadcast %cst_35 : f32 to vector<64x20xf32>
    %84 = arith.mulf %83, %80 : vector<64x20xf32>
    %85 = arith.mulf %84, %80 : vector<64x20xf32>
    %86 = arith.mulf %85, %80 : vector<64x20xf32>
    %87 = arith.addf %80, %86 : vector<64x20xf32>
    %cst_36 = arith.constant 0.797884583 : f32
    %88 = vector.broadcast %cst_36 : f32 to vector<64x20xf32>
    %89 = arith.mulf %88, %87 : vector<64x20xf32>
    %90 = math.tanh %89 : vector<64x20xf32>
    %cst_37 = arith.constant 1.000000e+00 : f32
    %91 = vector.broadcast %cst_37 : f32 to vector<64x20xf32>
    %92 = arith.addf %91, %90 : vector<64x20xf32>
    %93 = arith.mulf %82, %92 : vector<64x20xf32>
    %94 = vector.extract_strided_slice %8 {offsets = [4, 0], sizes = [1, 20], strides = [1, 1]} : vector<19x20xf32> to vector<1x20xf32>
    %95 = vector.extract_strided_slice %8 {offsets = [7, 0], sizes = [1, 20], strides = [1, 1]} : vector<19x20xf32> to vector<1x20xf32>
    %96 = vector.extract_strided_slice %8 {offsets = [10, 0], sizes = [1, 20], strides = [1, 1]} : vector<19x20xf32> to vector<1x20xf32>
    %cst_38 = arith.constant dense<0.000000e+00> : vector<20xf32>
    %97 = vector.multi_reduction <add>, %93, %cst_38 [0] : vector<64x20xf32> to vector<20xf32>
    %98 = vector.shape_cast %97 : vector<20xf32> to vector<1x20xf32>
    %cst_39 = arith.constant 6.400000e+01 : f32
    %99 = vector.broadcast %cst_39 : f32 to vector<1x20xf32>
    %100 = arith.divf %98, %99 : vector<1x20xf32>
    %101 = arith.mulf %96, %100 : vector<1x20xf32>
    %102 = vector.broadcast %101 : vector<1x20xf32> to vector<64x20xf32>
    %103 = arith.subf %93, %102 : vector<64x20xf32>
    %104 = arith.mulf %103, %103 : vector<64x20xf32>
    %cst_40 = arith.constant dense<0.000000e+00> : vector<20xf32>
    %105 = vector.multi_reduction <add>, %104, %cst_40 [0] : vector<64x20xf32> to vector<20xf32>
    %106 = vector.shape_cast %105 : vector<20xf32> to vector<1x20xf32>
    %cst_41 = arith.constant 6.400000e+01 : f32
    %107 = vector.broadcast %cst_41 : f32 to vector<1x20xf32>
    %108 = arith.divf %106, %107 : vector<1x20xf32>
    %109 = vector.broadcast %94 : vector<1x20xf32> to vector<64x20xf32>
    %110 = arith.mulf %109, %103 : vector<64x20xf32>
    %cst_42 = arith.constant 9.99999974E-6 : f32
    %111 = vector.broadcast %cst_42 : f32 to vector<1x20xf32>
    %112 = arith.addf %108, %111 : vector<1x20xf32>
    %113 = math.rsqrt %112 : vector<1x20xf32>
    %114 = vector.broadcast %113 : vector<1x20xf32> to vector<64x20xf32>
    %115 = arith.mulf %110, %114 : vector<64x20xf32>
    %116 = vector.broadcast %95 : vector<1x20xf32> to vector<64x20xf32>
    %117 = arith.addf %115, %116 : vector<64x20xf32>
    %118 = arith.addf %117, %66 : vector<64x20xf32>
    %c592 = arith.constant 592 : index
    %c0_43 = arith.constant 0 : index
    %119 = vector.load %arg5[%c592, %c0_43] : memref<664x20xf32, #tpu.memory_space<vmem>>, vector<20x20xf32>
    %c616 = arith.constant 616 : index
    %c0_44 = arith.constant 0 : index
    %120 = vector.load %arg5[%c616, %c0_44] : memref<664x20xf32, #tpu.memory_space<vmem>>, vector<20x20xf32>
    %121 = arith.truncf %118 : vector<64x20xf32> to vector<64x20xbf16>
    %122 = arith.truncf %119 : vector<20x20xf32> to vector<20x20xbf16>
    %cst_45 = arith.constant dense<0.000000e+00> : vector<64x20xf32>
    %123 = tpu.matmul %121, %122, %cst_45 {dimension_numbers = #tpu.dot_dimension_numbers<[1], [0], [0], [1], [0, 0, 1, 1], [], []>} : vector<64x20xbf16>, vector<20x20xbf16>, vector<64x20xf32> -> vector<64x20xf32>
    %124 = arith.truncf %123 : vector<64x20xf32> to vector<64x20xbf16>
    %cst_46 = arith.constant dense<0.000000e+00> : vector<64x20xf32>
    %125 = tpu.matmul %3, %124, %cst_46 {dimension_numbers = #tpu.dot_dimension_numbers<[1], [0], [0], [1], [0, 0, 1, 1], [], []>} : vector<64x64xbf16>, vector<64x20xbf16>, vector<64x20xf32> -> vector<64x20xf32>
    %126 = arith.truncf %118 : vector<64x20xf32> to vector<64x20xbf16>
    %127 = arith.truncf %120 : vector<20x20xf32> to vector<20x20xbf16>
    %cst_47 = arith.constant dense<0.000000e+00> : vector<64x20xf32>
    %128 = tpu.matmul %126, %127, %cst_47 {dimension_numbers = #tpu.dot_dimension_numbers<[1], [0], [0], [1], [0, 0, 1, 1], [], []>} : vector<64x20xbf16>, vector<20x20xbf16>, vector<64x20xf32> -> vector<64x20xf32>
    %129 = arith.addf %125, %128 : vector<64x20xf32>
    %130 = vector.extract_strided_slice %8 {offsets = [2, 0], sizes = [1, 20], strides = [1, 1]} : vector<19x20xf32> to vector<1x20xf32>
    %131 = vector.broadcast %130 : vector<1x20xf32> to vector<64x20xf32>
    %132 = arith.addf %129, %131 : vector<64x20xf32>
    %cst_48 = arith.constant 5.000000e-01 : f32
    %133 = vector.broadcast %cst_48 : f32 to vector<64x20xf32>
    %134 = arith.mulf %133, %132 : vector<64x20xf32>
    %cst_49 = arith.constant 4.471500e-02 : f32
    %135 = vector.broadcast %cst_49 : f32 to vector<64x20xf32>
    %136 = arith.mulf %135, %132 : vector<64x20xf32>
    %137 = arith.mulf %136, %132 : vector<64x20xf32>
    %138 = arith.mulf %137, %132 : vector<64x20xf32>
    %139 = arith.addf %132, %138 : vector<64x20xf32>
    %cst_50 = arith.constant 0.797884583 : f32
    %140 = vector.broadcast %cst_50 : f32 to vector<64x20xf32>
    %141 = arith.mulf %140, %139 : vector<64x20xf32>
    %142 = math.tanh %141 : vector<64x20xf32>
    %cst_51 = arith.constant 1.000000e+00 : f32
    %143 = vector.broadcast %cst_51 : f32 to vector<64x20xf32>
    %144 = arith.addf %143, %142 : vector<64x20xf32>
    %145 = arith.mulf %134, %144 : vector<64x20xf32>
    %146 = vector.extract_strided_slice %8 {offsets = [5, 0], sizes = [1, 20], strides = [1, 1]} : vector<19x20xf32> to vector<1x20xf32>
    %147 = vector.extract_strided_slice %8 {offsets = [8, 0], sizes = [1, 20], strides = [1, 1]} : vector<19x20xf32> to vector<1x20xf32>
    %148 = vector.extract_strided_slice %8 {offsets = [11, 0], sizes = [1, 20], strides = [1, 1]} : vector<19x20xf32> to vector<1x20xf32>
    %cst_52 = arith.constant dense<0.000000e+00> : vector<20xf32>
    %149 = vector.multi_reduction <add>, %145, %cst_52 [0] : vector<64x20xf32> to vector<20xf32>
    %150 = vector.shape_cast %149 : vector<20xf32> to vector<1x20xf32>
    %cst_53 = arith.constant 6.400000e+01 : f32
    %151 = vector.broadcast %cst_53 : f32 to vector<1x20xf32>
    %152 = arith.divf %150, %151 : vector<1x20xf32>
    %153 = arith.mulf %148, %152 : vector<1x20xf32>
    %154 = vector.broadcast %153 : vector<1x20xf32> to vector<64x20xf32>
    %155 = arith.subf %145, %154 : vector<64x20xf32>
    %156 = arith.mulf %155, %155 : vector<64x20xf32>
    %cst_54 = arith.constant dense<0.000000e+00> : vector<20xf32>
    %157 = vector.multi_reduction <add>, %156, %cst_54 [0] : vector<64x20xf32> to vector<20xf32>
    %158 = vector.shape_cast %157 : vector<20xf32> to vector<1x20xf32>
    %cst_55 = arith.constant 6.400000e+01 : f32
    %159 = vector.broadcast %cst_55 : f32 to vector<1x20xf32>
    %160 = arith.divf %158, %159 : vector<1x20xf32>
    %161 = vector.broadcast %146 : vector<1x20xf32> to vector<64x20xf32>
    %162 = arith.mulf %161, %155 : vector<64x20xf32>
    %cst_56 = arith.constant 9.99999974E-6 : f32
    %163 = vector.broadcast %cst_56 : f32 to vector<1x20xf32>
    %164 = arith.addf %160, %163 : vector<1x20xf32>
    %165 = math.rsqrt %164 : vector<1x20xf32>
    %166 = vector.broadcast %165 : vector<1x20xf32> to vector<64x20xf32>
    %167 = arith.mulf %162, %166 : vector<64x20xf32>
    %168 = vector.broadcast %147 : vector<1x20xf32> to vector<64x20xf32>
    %169 = arith.addf %167, %168 : vector<64x20xf32>
    %170 = arith.addf %169, %118 : vector<64x20xf32>
    %171 = vector.extract_strided_slice %9 {offsets = [0, 0], sizes = [1, 30], strides = [1, 1]} : vector<2x30xf32> to vector<1x30xf32>
    %172 = vector.extract_strided_slice %8 {offsets = [12, 0], sizes = [1, 20], strides = [1, 1]} : vector<19x20xf32> to vector<1x20xf32>
    %173 = vector.broadcast %13 : vector<1x1xf32> to vector<64x20xf32>
    %174 = arith.mulf %173, %66 : vector<64x20xf32>
    %175 = math.tanh %174 : vector<64x20xf32>
    %176 = vector.broadcast %172 : vector<1x20xf32> to vector<64x20xf32>
    %177 = arith.mulf %176, %175 : vector<64x20xf32>
    %178 = vector.extract_strided_slice %8 {offsets = [15, 0], sizes = [1, 20], strides = [1, 1]} : vector<19x20xf32> to vector<1x20xf32>
    %179 = vector.broadcast %178 : vector<1x20xf32> to vector<64x20xf32>
    %180 = arith.addf %177, %179 : vector<64x20xf32>
    %c0_57 = arith.constant 0 : index
    %c0_58 = arith.constant 0 : index
    %181 = vector.load %arg6[%c0_57, %c0_58] : memref<112x30xf32, #tpu.memory_space<vmem>>, vector<20x30xf32>
    %182 = arith.truncf %180 : vector<64x20xf32> to vector<64x20xbf16>
    %183 = arith.truncf %181 : vector<20x30xf32> to vector<20x30xbf16>
    %cst_59 = arith.constant dense<0.000000e+00> : vector<64x30xf32>
    %184 = tpu.matmul %182, %183, %cst_59 {dimension_numbers = #tpu.dot_dimension_numbers<[1], [0], [0], [1], [0, 0, 1, 1], [], []>} : vector<64x20xbf16>, vector<20x30xbf16>, vector<64x30xf32> -> vector<64x30xf32>
    %185 = vector.broadcast %171 : vector<1x30xf32> to vector<64x30xf32>
    %186 = arith.addf %185, %184 : vector<64x30xf32>
    %187 = vector.extract_strided_slice %8 {offsets = [13, 0], sizes = [1, 20], strides = [1, 1]} : vector<19x20xf32> to vector<1x20xf32>
    %188 = vector.broadcast %13 : vector<1x1xf32> to vector<64x20xf32>
    %189 = arith.mulf %188, %118 : vector<64x20xf32>
    %190 = math.tanh %189 : vector<64x20xf32>
    %191 = vector.broadcast %187 : vector<1x20xf32> to vector<64x20xf32>
    %192 = arith.mulf %191, %190 : vector<64x20xf32>
    %193 = vector.extract_strided_slice %8 {offsets = [16, 0], sizes = [1, 20], strides = [1, 1]} : vector<19x20xf32> to vector<1x20xf32>
    %194 = vector.broadcast %193 : vector<1x20xf32> to vector<64x20xf32>
    %195 = arith.addf %192, %194 : vector<64x20xf32>
    %c24 = arith.constant 24 : index
    %c0_60 = arith.constant 0 : index
    %196 = vector.load %arg6[%c24, %c0_60] : memref<112x30xf32, #tpu.memory_space<vmem>>, vector<20x30xf32>
    %197 = arith.truncf %195 : vector<64x20xf32> to vector<64x20xbf16>
    %198 = arith.truncf %196 : vector<20x30xf32> to vector<20x30xbf16>
    %cst_61 = arith.constant dense<0.000000e+00> : vector<64x30xf32>
    %199 = tpu.matmul %197, %198, %cst_61 {dimension_numbers = #tpu.dot_dimension_numbers<[1], [0], [0], [1], [0, 0, 1, 1], [], []>} : vector<64x20xbf16>, vector<20x30xbf16>, vector<64x30xf32> -> vector<64x30xf32>
    %200 = arith.addf %186, %199 : vector<64x30xf32>
    %201 = vector.extract_strided_slice %8 {offsets = [14, 0], sizes = [1, 20], strides = [1, 1]} : vector<19x20xf32> to vector<1x20xf32>
    %202 = vector.broadcast %13 : vector<1x1xf32> to vector<64x20xf32>
    %203 = arith.mulf %202, %170 : vector<64x20xf32>
    %204 = math.tanh %203 : vector<64x20xf32>
    %205 = vector.broadcast %201 : vector<1x20xf32> to vector<64x20xf32>
    %206 = arith.mulf %205, %204 : vector<64x20xf32>
    %207 = vector.extract_strided_slice %8 {offsets = [17, 0], sizes = [1, 20], strides = [1, 1]} : vector<19x20xf32> to vector<1x20xf32>
    %208 = vector.broadcast %207 : vector<1x20xf32> to vector<64x20xf32>
    %209 = arith.addf %206, %208 : vector<64x20xf32>
    %c48 = arith.constant 48 : index
    %c0_62 = arith.constant 0 : index
    %210 = vector.load %arg6[%c48, %c0_62] : memref<112x30xf32, #tpu.memory_space<vmem>>, vector<20x30xf32>
    %211 = arith.truncf %209 : vector<64x20xf32> to vector<64x20xbf16>
    %212 = arith.truncf %210 : vector<20x30xf32> to vector<20x30xbf16>
    %cst_63 = arith.constant dense<0.000000e+00> : vector<64x30xf32>
    %213 = tpu.matmul %211, %212, %cst_63 {dimension_numbers = #tpu.dot_dimension_numbers<[1], [0], [0], [1], [0, 0, 1, 1], [], []>} : vector<64x20xbf16>, vector<20x30xbf16>, vector<64x30xf32> -> vector<64x30xf32>
    %214 = arith.addf %200, %213 : vector<64x30xf32>
    %cst_64 = arith.constant 5.000000e-01 : f32
    %215 = vector.broadcast %cst_64 : f32 to vector<64x30xf32>
    %216 = arith.mulf %215, %214 : vector<64x30xf32>
    %cst_65 = arith.constant 4.471500e-02 : f32
    %217 = vector.broadcast %cst_65 : f32 to vector<64x30xf32>
    %218 = arith.mulf %217, %214 : vector<64x30xf32>
    %219 = arith.mulf %218, %214 : vector<64x30xf32>
    %220 = arith.mulf %219, %214 : vector<64x30xf32>
    %221 = arith.addf %214, %220 : vector<64x30xf32>
    %cst_66 = arith.constant 0.797884583 : f32
    %222 = vector.broadcast %cst_66 : f32 to vector<64x30xf32>
    %223 = arith.mulf %222, %221 : vector<64x30xf32>
    %224 = math.tanh %223 : vector<64x30xf32>
    %cst_67 = arith.constant 1.000000e+00 : f32
    %225 = vector.broadcast %cst_67 : f32 to vector<64x30xf32>
    %226 = arith.addf %225, %224 : vector<64x30xf32>
    %227 = arith.mulf %216, %226 : vector<64x30xf32>
    %c72 = arith.constant 72 : index
    %c0_68 = arith.constant 0 : index
    %228 = vector.load %arg6[%c72, %c0_68] : memref<112x30xf32, #tpu.memory_space<vmem>>, vector<30x30xf32>
    %229 = arith.truncf %227 : vector<64x30xf32> to vector<64x30xbf16>
    %230 = arith.truncf %228 : vector<30x30xf32> to vector<30x30xbf16>
    %cst_69 = arith.constant dense<0.000000e+00> : vector<64x30xf32>
    %231 = tpu.matmul %229, %230, %cst_69 {dimension_numbers = #tpu.dot_dimension_numbers<[1], [0], [0], [1], [0, 0, 1, 1], [], []>} : vector<64x30xbf16>, vector<30x30xbf16>, vector<64x30xf32> -> vector<64x30xf32>
    %232 = vector.extract_strided_slice %9 {offsets = [1, 0], sizes = [1, 30], strides = [1, 1]} : vector<2x30xf32> to vector<1x30xf32>
    %233 = vector.broadcast %232 : vector<1x30xf32> to vector<64x30xf32>
    %234 = arith.addf %231, %233 : vector<64x30xf32>
    %cst_70 = arith.constant 5.000000e-01 : f32
    %235 = vector.broadcast %cst_70 : f32 to vector<64x30xf32>
    %236 = arith.mulf %235, %234 : vector<64x30xf32>
    %cst_71 = arith.constant 4.471500e-02 : f32
    %237 = vector.broadcast %cst_71 : f32 to vector<64x30xf32>
    %238 = arith.mulf %237, %234 : vector<64x30xf32>
    %239 = arith.mulf %238, %234 : vector<64x30xf32>
    %240 = arith.mulf %239, %234 : vector<64x30xf32>
    %241 = arith.addf %234, %240 : vector<64x30xf32>
    %cst_72 = arith.constant 0.797884583 : f32
    %242 = vector.broadcast %cst_72 : f32 to vector<64x30xf32>
    %243 = arith.mulf %242, %241 : vector<64x30xf32>
    %244 = math.tanh %243 : vector<64x30xf32>
    %cst_73 = arith.constant 1.000000e+00 : f32
    %245 = vector.broadcast %cst_73 : f32 to vector<64x30xf32>
    %246 = arith.addf %245, %244 : vector<64x30xf32>
    %247 = arith.mulf %236, %246 : vector<64x30xf32>
    %c0_74 = arith.constant 0 : index
    %c0_75 = arith.constant 0 : index
    %248 = vector.load %arg7[%c0_74, %c0_75] : memref<40x266xf32, #tpu.memory_space<vmem>>, vector<30x266xf32>
    %249 = arith.truncf %247 : vector<64x30xf32> to vector<64x30xbf16>
    %250 = arith.truncf %248 : vector<30x266xf32> to vector<30x266xbf16>
    %cst_76 = arith.constant dense<0.000000e+00> : vector<64x266xf32>
    %251 = tpu.matmul %249, %250, %cst_76 {dimension_numbers = #tpu.dot_dimension_numbers<[1], [0], [0], [1], [0, 0, 1, 1], [], []>} : vector<64x30xbf16>, vector<30x266xbf16>, vector<64x266xf32> -> vector<64x266xf32>
    %252 = vector.extract_strided_slice %10 {offsets = [0, 0], sizes = [1, 266], strides = [1, 1]} : vector<3x266xf32> to vector<1x266xf32>
    %253 = vector.broadcast %252 : vector<1x266xf32> to vector<64x266xf32>
    %254 = arith.addf %251, %253 : vector<64x266xf32>
    %255 = vector.extract_strided_slice %10 {offsets = [1, 0], sizes = [1, 266], strides = [1, 1]} : vector<3x266xf32> to vector<1x266xf32>
    %256 = vector.broadcast %14 : vector<1x1xf32> to vector<64x266xf32>
    %257 = arith.mulf %256, %254 : vector<64x266xf32>
    %258 = math.tanh %257 : vector<64x266xf32>
    %259 = vector.broadcast %255 : vector<1x266xf32> to vector<64x266xf32>
    %260 = arith.mulf %259, %258 : vector<64x266xf32>
    %261 = vector.extract_strided_slice %10 {offsets = [2, 0], sizes = [1, 266], strides = [1, 1]} : vector<3x266xf32> to vector<1x266xf32>
    %262 = vector.broadcast %261 : vector<1x266xf32> to vector<64x266xf32>
    %263 = arith.addf %260, %262 : vector<64x266xf32>
    %264 = arith.addf %263, %1 : vector<64x266xf32>
    %265 = arith.mulf %264, %264 : vector<64x266xf32>
    %cst_77 = arith.constant dense<0.000000e+00> : vector<64xf32>
    %266 = vector.multi_reduction <add>, %265, %cst_77 [1] : vector<64x266xf32> to vector<64xf32>
    %267 = vector.shape_cast %266 : vector<64xf32> to vector<64x1xf32>
    %268 = math.sqrt %267 : vector<64x1xf32>
    %cst_78 = arith.constant 1.000000e-10 : f32
    %269 = vector.broadcast %cst_78 : f32 to vector<64x1xf32>
    %270 = arith.addf %268, %269 : vector<64x1xf32>
    %271 = tpu.reciprocal %270 {approx = true} : vector<64x1xf32> -> vector<64x1xf32>
    %272 = vector.broadcast %271 : vector<64x1xf32> to vector<64x266xf32>
    %273 = arith.mulf %264, %272 : vector<64x266xf32>
    %c0_79 = arith.constant 0 : index
    %c0_80 = arith.constant 0 : index
    %274 = vector.load %arg8[%c0_79, %c0_80] : memref<568x10xf32, #tpu.memory_space<vmem>>, vector<266x10xf32>
    %275 = arith.truncf %273 : vector<64x266xf32> to vector<64x266xbf16>
    %276 = arith.truncf %274 : vector<266x10xf32> to vector<266x10xbf16>
    %cst_81 = arith.constant dense<0.000000e+00> : vector<64x10xf32>
    %277 = tpu.matmul %275, %276, %cst_81 {dimension_numbers = #tpu.dot_dimension_numbers<[1], [0], [0], [1], [0, 0, 1, 1], [], []>} : vector<64x266xbf16>, vector<266x10xbf16>, vector<64x10xf32> -> vector<64x10xf32>
    %c272_82 = arith.constant 272 : index
    %c0_83 = arith.constant 0 : index
    %278 = vector.load %arg8[%c272_82, %c0_83] : memref<568x10xf32, #tpu.memory_space<vmem>>, vector<266x10xf32>
    %279 = arith.truncf %273 : vector<64x266xf32> to vector<64x266xbf16>
    %280 = arith.truncf %278 : vector<266x10xf32> to vector<266x10xbf16>
    %cst_84 = arith.constant dense<0.000000e+00> : vector<64x10xf32>
    %281 = tpu.matmul %279, %280, %cst_84 {dimension_numbers = #tpu.dot_dimension_numbers<[1], [0], [0], [1], [0, 0, 1, 1], [], []>} : vector<64x266xbf16>, vector<266x10xbf16>, vector<64x10xf32> -> vector<64x10xf32>
    %282 = arith.truncf %277 : vector<64x10xf32> to vector<64x10xbf16>
    %cst_85 = arith.constant dense<0.000000e+00> : vector<128x10xf32>
    %283 = tpu.matmul %5, %282, %cst_85 {dimension_numbers = #tpu.dot_dimension_numbers<[1], [0], [0], [1], [0, 0, 1, 1], [], []>} : vector<128x64xbf16>, vector<64x10xbf16>, vector<128x10xf32> -> vector<128x10xf32>
    %284 = arith.truncf %281 : vector<64x10xf32> to vector<64x10xbf16>
    %cst_86 = arith.constant dense<0.000000e+00> : vector<128x10xf32>
    %285 = tpu.matmul %7, %284, %cst_86 {dimension_numbers = #tpu.dot_dimension_numbers<[1], [0], [0], [1], [0, 0, 1, 1], [], []>} : vector<128x64xbf16>, vector<64x10xbf16>, vector<128x10xf32> -> vector<128x10xf32>
    %286 = arith.addf %283, %285 : vector<128x10xf32>
    %287 = vector.extract_strided_slice %11 {offsets = [0, 0], sizes = [1, 10], strides = [1, 1]} : vector<3x10xf32> to vector<1x10xf32>
    %288 = vector.broadcast %287 : vector<1x10xf32> to vector<128x10xf32>
    %289 = arith.addf %286, %288 : vector<128x10xf32>
    %cst_87 = arith.constant 5.000000e-01 : f32
    %290 = vector.broadcast %cst_87 : f32 to vector<128x10xf32>
    %291 = arith.mulf %290, %289 : vector<128x10xf32>
    %cst_88 = arith.constant 4.471500e-02 : f32
    %292 = vector.broadcast %cst_88 : f32 to vector<128x10xf32>
    %293 = arith.mulf %292, %289 : vector<128x10xf32>
    %294 = arith.mulf %293, %289 : vector<128x10xf32>
    %295 = arith.mulf %294, %289 : vector<128x10xf32>
    %296 = arith.addf %289, %295 : vector<128x10xf32>
    %cst_89 = arith.constant 0.797884583 : f32
    %297 = vector.broadcast %cst_89 : f32 to vector<128x10xf32>
    %298 = arith.mulf %297, %296 : vector<128x10xf32>
    %299 = math.tanh %298 : vector<128x10xf32>
    %cst_90 = arith.constant 1.000000e+00 : f32
    %300 = vector.broadcast %cst_90 : f32 to vector<128x10xf32>
    %301 = arith.addf %300, %299 : vector<128x10xf32>
    %302 = arith.mulf %291, %301 : vector<128x10xf32>
    %c544_91 = arith.constant 544 : index
    %c0_92 = arith.constant 0 : index
    %303 = vector.load %arg8[%c544_91, %c0_92] : memref<568x10xf32, #tpu.memory_space<vmem>>, vector<10x10xf32>
    %304 = arith.truncf %302 : vector<128x10xf32> to vector<128x10xbf16>
    %305 = arith.truncf %303 : vector<10x10xf32> to vector<10x10xbf16>
    %cst_93 = arith.constant dense<0.000000e+00> : vector<128x10xf32>
    %306 = tpu.matmul %304, %305, %cst_93 {dimension_numbers = #tpu.dot_dimension_numbers<[1], [0], [0], [1], [0, 0, 1, 1], [], []>} : vector<128x10xbf16>, vector<10x10xbf16>, vector<128x10xf32> -> vector<128x10xf32>
    %307 = vector.extract_strided_slice %11 {offsets = [1, 0], sizes = [1, 10], strides = [1, 1]} : vector<3x10xf32> to vector<1x10xf32>
    %308 = vector.broadcast %307 : vector<1x10xf32> to vector<128x10xf32>
    %309 = arith.addf %306, %308 : vector<128x10xf32>
    %cst_94 = arith.constant 5.000000e-01 : f32
    %310 = vector.broadcast %cst_94 : f32 to vector<128x10xf32>
    %311 = arith.mulf %310, %309 : vector<128x10xf32>
    %cst_95 = arith.constant 4.471500e-02 : f32
    %312 = vector.broadcast %cst_95 : f32 to vector<128x10xf32>
    %313 = arith.mulf %312, %309 : vector<128x10xf32>
    %314 = arith.mulf %313, %309 : vector<128x10xf32>
    %315 = arith.mulf %314, %309 : vector<128x10xf32>
    %316 = arith.addf %309, %315 : vector<128x10xf32>
    %cst_96 = arith.constant 0.797884583 : f32
    %317 = vector.broadcast %cst_96 : f32 to vector<128x10xf32>
    %318 = arith.mulf %317, %316 : vector<128x10xf32>
    %319 = math.tanh %318 : vector<128x10xf32>
    %cst_97 = arith.constant 1.000000e+00 : f32
    %320 = vector.broadcast %cst_97 : f32 to vector<128x10xf32>
    %321 = arith.addf %320, %319 : vector<128x10xf32>
    %322 = arith.mulf %311, %321 : vector<128x10xf32>
    %323 = vector.extract_strided_slice %11 {offsets = [2, 0], sizes = [1, 10], strides = [1, 1]} : vector<3x10xf32> to vector<1x10xf32>
    %324 = vector.broadcast %323 : vector<1x10xf32> to vector<128x10xf32>
    %325 = arith.mulf %322, %324 : vector<128x10xf32>
    %cst_98 = arith.constant dense<0.000000e+00> : vector<128xf32>
    %326 = vector.multi_reduction <add>, %325, %cst_98 [1] : vector<128x10xf32> to vector<128xf32>
    %327 = vector.shape_cast %326 : vector<128xf32> to vector<128x1xf32>
    %328 = vector.broadcast %15 : vector<1x1xf32> to vector<128x1xf32>
    %329 = arith.addf %327, %328 : vector<128x1xf32>
    %cst_99 = arith.constant 0.000000e+00 : f32
    %330 = vector.broadcast %cst_99 : f32 to vector<128x1xf32>
    %331 = arith.subf %330, %329 : vector<128x1xf32>
    %332 = math.exp %331 : vector<128x1xf32>
    %cst_100 = arith.constant 1.000000e+00 : f32
    %333 = vector.broadcast %cst_100 : f32 to vector<128x1xf32>
    %334 = arith.addf %333, %332 : vector<128x1xf32>
    %cst_101 = arith.constant 1.000000e+00 : f32
    %335 = vector.broadcast %cst_101 : f32 to vector<128x1xf32>
    %336 = arith.divf %335, %334 : vector<128x1xf32>
    %c0_102 = arith.constant 0 : index
    %c0_103 = arith.constant 0 : index
    %c0_104 = arith.constant 0 : index
    %337 = vector.load %arg9[%c0_102, %c0_103, %c0_104] : memref<1x128x1xf32, #tpu.memory_space<vmem>>, vector<1x128x1xf32>
    %338 = vector.shape_cast %337 : vector<1x128x1xf32> to vector<128x1xf32>
    %339 = vector.shape_cast %336 : vector<128x1xf32> to vector<1x128x1xf32>
    tpu.vector_store %arg9[%c0_102, %c0_103, %c0_104], %339 {strides = array<i32>} : memref<1x128x1xf32, #tpu.memory_space<vmem>>, vector<1x128x1xf32>,
    return
  }
  func.func @transform_0(%arg0: i32) -> (i32, i32, i32) {
    %c0_i32 = arith.constant 0 : i32
    %c0_i32_0 = arith.constant 0 : i32
    %c0_i32_1 = arith.constant 0 : i32
    return %arg0, %c0_i32, %c0_i32_0 : i32, i32, i32
  }
  func.func @transform_1(%arg0: i32) -> (i32, i32, i32) {
    %c0_i32 = arith.constant 0 : i32
    %c0_i32_0 = arith.constant 0 : i32
    %c0_i32_1 = arith.constant 0 : i32
    return %arg0, %c0_i32, %c0_i32_0 : i32, i32, i32
  }
  func.func @transform_2(%arg0: i32) -> (i32, i32, i32) {
    %c0_i32 = arith.constant 0 : i32
    %c0_i32_0 = arith.constant 0 : i32
    %c0_i32_1 = arith.constant 0 : i32
    return %arg0, %c0_i32, %c0_i32_0 : i32, i32, i32
  }
  func.func @transform_3(%arg0: i32) -> (i32, i32, i32) {
    %c0_i32 = arith.constant 0 : i32
    %c0_i32_0 = arith.constant 0 : i32
    %c0_i32_1 = arith.constant 0 : i32
    return %arg0, %c0_i32, %c0_i32_0 : i32, i32, i32
  }
  func.func @transform_4(%arg0: i32) -> (i32, i32) {
    %c0_i32 = arith.constant 0 : i32
    %c0_i32_0 = arith.constant 0 : i32
    %c0_i32_1 = arith.constant 0 : i32
    return %c0_i32, %c0_i32_0 : i32, i32
  }
  func.func @transform_5(%arg0: i32) -> (i32, i32) {
    %c0_i32 = arith.constant 0 : i32
    %c0_i32_0 = arith.constant 0 : i32
    %c0_i32_1 = arith.constant 0 : i32
    return %c0_i32, %c0_i32_0 : i32, i32
  }
  func.func @transform_6(%arg0: i32) -> (i32, i32) {
    %c0_i32 = arith.constant 0 : i32
    %c0_i32_0 = arith.constant 0 : i32
    %c0_i32_1 = arith.constant 0 : i32
    return %c0_i32, %c0_i32_0 : i32, i32
  }
  func.func @transform_7(%arg0: i32) -> (i32, i32) {
    %c0_i32 = arith.constant 0 : i32
    %c0_i32_0 = arith.constant 0 : i32
    %c0_i32_1 = arith.constant 0 : i32
    return %c0_i32, %c0_i32_0 : i32, i32
  }
  func.func @transform_8(%arg0: i32) -> (i32, i32, i32) {
    %c0_i32 = arith.constant 0 : i32
    %c0_i32_0 = arith.constant 0 : i32
    %c0_i32_1 = arith.constant 0 : i32
    return %arg0, %c0_i32, %c0_i32_0 : i32, i32, i32
  }
}

</mosaic_0001>

<bundles_post_ra>
// kernel: tpu_custom_call.1
= control target key start
LH: loop header
LB: loop body
LE: loop exit
PB: predicated region body
PF: predicated region fallthrough
CT: control target
= control target key end

     0   :  { %s4743_s27 = smov 0   ;;  %s6401_s0 = inlined_call_operand.vmem [shape: f32[2,64,266], index: 0, kind: input, shape index: {}]   ;;  %s6402_s1 = inlined_call_operand.vmem [shape: bf16[2,64,64], index: 1, kind: input, shape index: {}]   ;;  %s6403_s2 = inlined_call_operand.vmem [shape: bf16[2,128,64], index: 2, kind: input, shape index: {}]   ;;  %s6404_s3 = inlined_call_operand.vmem [shape: bf16[2,128,64], index: 3, kind: input, shape index: {}]   ;;  %s6405_s4 = inlined_call_operand.vmem [shape: f32[664,20], index: 4, kind: input, shape index: {}]   ;;  %s6406_s5 = inlined_call_operand.vmem [shape: f32[112,30], index: 5, kind: input, shape index: {}]   ;;  %s6407_s6 = inlined_call_operand.vmem [shape: f32[40,266], index: 6, kind: input, shape index: {}]   ;;  %s6408_s7 = inlined_call_operand.vmem [shape: f32[568,10], index: 7, kind: input, shape index: {}]   ;;  %s6409_s8 = inlined_call_operand.vmem [shape: f32[2,128,1], index: 8, kind: output, shape index: {}]  }
   0x1 LB: > { %s4071_s28 = sadd.s32 4294967295, %s4693_s27   ;;  %p4075_p0 = scmp.ge.s32.totalorder %s4693_s27, 1  ;;  %s4693_s27 = sphi %s4743_s27, %s18_s27  }
   0x2   : > { %p292_p1 = scmp.lt.s32.totalorder %s4693_s27, 3 }
   0x4   : > { %p293_p2 = pnand %p4075_p0, %p292_p1 }
   0x5   : > { %p341_p3 = scmp.lt.s32.totalorder (!%p293_p2), %s4071_s28, 1  ;;  %s4696_s17 = smov (!%p293_p2), 127  }
   0x6   : > { %296 = sbr.rel (%p293_p2) target bundleno = 3157 (0xc55), region = 52  ;;  %s4697_s10 = smov (!%p293_p2), 126  }
   0xb   : > { %v453_v0 = vld [vmem:[%s6405_s4 + $0x70] sm:$0xff]  ;;  %v454_v1 = vld [vmem:[%s6405_s4 + $0x78] sm:$0xff]  ;;  %v451_v5 = vld [vmem:[%s6405_s4 + $0x60] sm:$0xff]  ;;  %s6411_s28 = smov (!%p341_p3, %s4071_s28), 1  ;;  %vm549_vm0 = vcmask 1044480   ;;  %vm536_vm1 = vcmask 80896  }
   0xc   : > { %v469_v2 = vld [vmem:[%s6405_s4 + $0xf0] sm:$0xff]  ;;  %v526_v3 = vpack.c.bf16 %v454_v1, %v453_v0  ;;  %v470_v4 = vld [vmem:[%s6405_s4 + $0xf8] sm:$0xff]  ;;  %v452_v6 = vld [vmem:[%s6405_s4 + $0x68] sm:$0xff]  ;;  %s4295_s29 = smul.u32 192, %s6411_s28  ;;  %s4263_s12 = sshll.u32 %s6411_s28, 5  ;;  %vm771_vm2 = vcmask 523264  }
   0xd   : > { %v534_v7 = vpack.c.bf16 %v470_v4, %v469_v2  ;;  %v467_v8 = vld [vmem:[%s6405_s4 + $0xe0] sm:$0xff]  ;;  %v468_v9 = vld [vmem:[%s6405_s4 + $0xe8] sm:$0xff]  ;;  %v525_v10 = vpack.c.bf16 %v452_v6, %v451_v5  ;;  %v449_v12 = vld [vmem:[%s6405_s4 + $0x50] sm:$0xff]  ;;  %s5037_s15 = scalar_lea.vmem %s6402_s1, %s4263_s12  ;;  %vm894_vm3 = vcmask 162816   ;;  %vm1025_vm4 = vcmask 1041408   ;;  %s4266_s11 = sshll.u32 %s6411_s28, 7 }
   0xe   : > { %553 = vmatpush.bf16.msra.mxu0 %v526_v3  ;;  %v533_v11 = vpack.c.bf16 %v468_v9, %v467_v8  ;;  %v450_v13 = vld [vmem:[%s6405_s4 + $0x58] sm:$0xff]  ;;  %v465_v14 = vld [vmem:[%s6405_s4 + $0xd0] sm:$0xff]  ;;  %v471_v16 = vld [vmem:[%s6405_s4 + $0x100] sm:$0xff]  ;;  %s4796_s16 = scalar_lea.vmem %s6401_s0, %s4295_s29  ;;  %vm2011_vm15 = vcmask 1046528   ;;  %s6362_s14 = scalar_lea.vmem %s6409_s8, %s4266_s11 }
   0xf   : > { %582 = vmatpush.bf16.msra.mxu1 %v534_v7  ;;  %v466_v15 = vld [vmem:[%s6405_s4 + $0xd8] sm:$0xff]  ;;  %v524_v17 = vpack.c.bf16 %v450_v13, %v449_v12  ;;  %v472_v18 = vld [vmem:[%s6405_s4 + $0x108] sm:$0x3]  ;;  %v369_v19 = vld [vmem:[%s4796_s16 + $0x10] sm:$0xff] }
  0x10   : > { %v372_v20 = vld [vmem:[%s4796_s16 + $0x28] sm:$0xff]  ;;  %v532_v21 = vpack.c.bf16 %v466_v15, %v465_v14  ;;  %v447_v22 = vld [vmem:[%s6405_s4 + $0x40] sm:$0xff]  ;;  %v535_v24 = vpack.c.bf16 %v472_v18, %v471_v16  ;;  %v445_v31 = vld [vmem:[%s6405_s4 + $0x30] sm:$0xff] }
  0x11   : > { %v448_v23 = vld [vmem:[%s6405_s4 + $0x48] sm:$0xff]  ;;  %v463_v25 = vld [vmem:[%s6405_s4 + $0xc0] sm:$0xff]  ;;  %v4816_v28 = vpack.c.bf16 %v372_v20, %v369_v19  ;;  %v446_v32 = vld [vmem:[%s6405_s4 + $0x38] sm:$0xff] }
  0x12   : > { %554 = vmatpush.bf16.msra.mxu0 %v525_v10  ;;  %v464_v26 = vld [vmem:[%s6405_s4 + $0xc8] sm:$0xff]  ;;  %v551_v27 = vsel %vm549_vm0, %v535_v24, 0  ;;  %v523_v29 = vpack.c.bf16 %v448_v23, %v447_v22  ;;  %v461_v33 = vld [vmem:[%s6405_s4 + $0xb0] sm:$0xff]  ;;  %v462_v34 = vld [vmem:[%s6405_s4 + $0xb8] sm:$0xff]  ;;  %v522_v35 = vpack.c.bf16 %v446_v32, %v445_v31 }
  0x13   : > { %583 = vmatpush.bf16.msra.mxu1 %v533_v11  ;;  %618 = vmatpush.bf16.msra.mxu2 %v551_v27  ;;  %v531_v30 = vpack.c.bf16 %v464_v26, %v463_v25  ;;  %v530_v36 = vpack.c.bf16 %v462_v34, %v461_v33  ;;  %v443_v37 = vld [vmem:[%s6405_s4 + $0x20] sm:$0xff]  ;;  %v444_v38 = vld [vmem:[%s6405_s4 + $0x28] sm:$0xff]  ;;  %v441_v43 = vld [vmem:[%s6405_s4 + $0x10] sm:$0xff] }
  0x14   : > { %v459_v39 = vld [vmem:[%s6405_s4 + $0xa0] sm:$0xff]  ;;  %v460_v40 = vld [vmem:[%s6405_s4 + $0xa8] sm:$0xff]  ;;  %v521_v41 = vpack.c.bf16 %v444_v38, %v443_v37  ;;  %v442_v44 = vld [vmem:[%s6405_s4 + $0x18] sm:$0xff] }
  0x15   : > { %v529_v42 = vpack.c.bf16 %v460_v40, %v459_v39  ;;  %v457_v45 = vld [vmem:[%s6405_s4 + $0x90] sm:$0xff]  ;;  %v458_v46 = vld [vmem:[%s6405_s4 + $0x98] sm:$0xff]  ;;  %v520_v47 = vpack.c.bf16 %v442_v44, %v441_v43  ;;  %v375_v48 = vld [vmem:[%s4796_s16 + $0x40] sm:$0xff] }
  0x16   : > { %555 = vmatpush.bf16.msra.mxu0 %v524_v17  ;;  %4085 = vmatmul.msk.bf16.vlgmr.msra.gmra.mxu2 %vm536_vm1, %v4816_v28  ;;  %v378_v49 = vld [vmem:[%s4796_s16 + $0x58] sm:$0xff]  ;;  %v528_v50 = vpack.c.bf16 %v458_v46, %v457_v45  ;;  %v439_v51 = vld [vmem:[%s6405_s4] sm:$0xff]  ;;  %v440_v52 = vld [vmem:[%s6405_s4 + $0x8] sm:$0xff] }
  0x17   : > { %584 = vmatpush.bf16.msra.mxu1 %v532_v21  ;;  %v455_v53 = vld [vmem:[%s6405_s4 + $0x80] sm:$0xff]  ;;  %v456_v54 = vld [vmem:[%s6405_s4 + $0x88] sm:$0xff]  ;;  %v4870_v55 = vpack.c.bf16 %v378_v49, %v375_v48  ;;  %v519_v56 = vpack.c.bf16 %v440_v52, %v439_v51  ;;  %v370_v58 = vld [vmem:[%s4796_s16 + $0x18] sm:$0xff] }
  0x18   : > { %v367_v57 = vld [vmem:[%s4796_s16] sm:$0xff]  ;;  %v527_v59 = vpack.c.bf16 %v456_v54, %v455_v53  ;;  %v368_v60 = vld [vmem:[%s4796_s16 + $0x8] sm:$0xff]  ;;  %v381_v0 = vld [vmem:[%s4796_s16 + $0x70] sm:$0xff] }
  0x19   : > { %v371_v61 = vld [vmem:[%s4796_s16 + $0x20] sm:$0xff]  ;;  %v4876_v62 = vpack.c.bf16 %v370_v58, %v367_v57  ;;  %v384_v1 = vld [vmem:[%s4796_s16 + $0x88] sm:$0xff]  ;;  %v373_v3 = vld [vmem:[%s4796_s16 + $0x30] sm:$0xff] }
  0x1a   : > { %556 = vmatpush.bf16.msra.mxu0 %v523_v29  ;;  %v4880_v63 = vpack.c.bf16 %v371_v61, %v368_v60  ;;  %v4886_v2 = vpack.c.bf16 %v384_v1, %v381_v0  ;;  %v376_v4 = vld [vmem:[%s4796_s16 + $0x48] sm:$0xff]  ;;  %v374_v5 = vld [vmem:[%s4796_s16 + $0x38] sm:$0xff]  ;;  %v377_v6 = vld [vmem:[%s4796_s16 + $0x50] sm:$0xff] }
  0x1b   : > { %585 = vmatpush.bf16.msra.mxu1 %v531_v30  ;;  %v4892_v7 = vpack.c.bf16 %v376_v4, %v373_v3  ;;  %v4896_v8 = vpack.c.bf16 %v377_v6, %v374_v5  ;;  %v503_v9 = vld [vmem:[%s6405_s4 + $0x200] sm:$0xff]  ;;  %v504_v10 = vld [vmem:[%s6405_s4 + $0x208] sm:$0xff]  ;;  %v501_v11 = vld [vmem:[%s6405_s4 + $0x1f0] sm:$0xff] }
  0x1c   : > { %v659_v12 = vpack.c.bf16 %v504_v10, %v503_v9  ;;  %v502_v13 = vld [vmem:[%s6405_s4 + $0x1f8] sm:$0xff]  ;;  %v387_v14 = vld [vmem:[%s4796_s16 + $0xa0] sm:$0xff]  ;;  %v500_v18 = vld [vmem:[%s6405_s4 + $0x1e8] sm:$0xff] }
  0x1d   : > { %v658_v15 = vpack.c.bf16 %v502_v13, %v501_v11  ;;  %v390_v16 = vld [vmem:[%s4796_s16 + $0xb8] sm:$0xff]  ;;  %v499_v17 = vld [vmem:[%s6405_s4 + $0x1e0] sm:$0xff]  ;;  %v380_v23 = vld [vmem:[%s4796_s16 + $0x68] sm:$0xff] }
  0x1e   : > { %557 = vmatpush.bf16.msra.mxu0 %v522_v35  ;;  %4287 = vmatpush.bf16.msrb.mxu2 %v659_v12  ;;  %v4920_v19 = vpack.c.bf16 %v390_v16, %v387_v14  ;;  %v657_v20 = vpack.c.bf16 %v500_v18, %v499_v17  ;;  %v379_v21 = vld [vmem:[%s4796_s16 + $0x60] sm:$0xff]  ;;  %v382_v22 = vld [vmem:[%s4796_s16 + $0x78] sm:$0xff]  ;;  %v497_v25 = vld [vmem:[%s6405_s4 + $0x1d0] sm:$0xff] }
  0x1f   : > { %586 = vmatpush.bf16.msra.mxu1 %v530_v36  ;;  %v383_v24 = vld [vmem:[%s4796_s16 + $0x80] sm:$0xff]  ;;  %v498_v26 = vld [vmem:[%s6405_s4 + $0x1d8] sm:$0xff]  ;;  %v4932_v27 = vpack.c.bf16 %v382_v22, %v379_v21  ;;  %v496_v32 = vld [vmem:[%s6405_s4 + $0x1c8] sm:$0xff] }
  0x20   : > { %v514_v29 = vpack.c.bf16 %v383_v24, %v380_v23  ;;  %v656_v30 = vpack.c.bf16 %v498_v26, %v497_v25  ;;  %v495_v31 = vld [vmem:[%s6405_s4 + $0x1c0] sm:$0xff]  ;;  %v488_v34 = vld [vmem:[%s6405_s4 + $0x188] sm:$0xff]  ;;  %v485_v35 = vld [vmem:[%s6405_s4 + $0x170] sm:$0xff] }
  0x21   : > { %v487_v33 = vld [vmem:[%s6405_s4 + $0x180] sm:$0xff]  ;;  %v655_v36 = vpack.c.bf16 %v496_v32, %v495_v31  ;;  %v486_v38 = vld [vmem:[%s6405_s4 + $0x178] sm:$0xff]  ;;  %v493_v39 = vld [vmem:[%s6405_s4 + $0x1b0] sm:$0xff] }
  0x22   : > { %558 = vmatpush.bf16.msra.mxu0 %v521_v41  ;;  %4288 = vmatpush.bf16.msrb.mxu2 %v658_v15  ;;  %v651_v37 = vpack.c.bf16 %v488_v34, %v487_v33  ;;  %v494_v40 = vld [vmem:[%s6405_s4 + $0x1b8] sm:$0xff]  ;;  %v650_v41 = vpack.c.bf16 %v486_v38, %v485_v35  ;;  %v491_v43 = vld [vmem:[%s6405_s4 + $0x1a0] sm:$0xff]  ;;  %v492_v44 = vld [vmem:[%s6405_s4 + $0x1a8] sm:$0xff] }
  0x23   : > { %587 = vmatpush.bf16.msra.mxu1 %v529_v42  ;;  %v654_v42 = vpack.c.bf16 %v494_v40, %v493_v39  ;;  %v385_v45 = vld [vmem:[%s4796_s16 + $0x90] sm:$0xff]  ;;  %v388_v46 = vld [vmem:[%s4796_s16 + $0xa8] sm:$0xff]  ;;  %v653_v48 = vpack.c.bf16 %v492_v44, %v491_v43  ;;  %v490_v51 = vld [vmem:[%s6405_s4 + $0x198] sm:$0xff] }
  0x24   : > { %664 = vmatpush.bf16.msra.mxu3 %v651_v37  ;;  %v389_v49 = vld [vmem:[%s4796_s16 + $0xb0] sm:$0xff]  ;;  %v516_v52 = vpack.c.bf16 %v388_v46, %v385_v45  ;;  %v484_v57 = vld [vmem:[%s6405_s4 + $0x168] sm:$0xff]  ;;  %v482_v60 = vld [vmem:[%s6405_s4 + $0x158] sm:$0xff] }
  0x25   : > { %v479_v61 = vld [vmem:[%s6405_s4 + $0x140] sm:$0xff]  ;;  %v480_v1 = vld [vmem:[%s6405_s4 + $0x148] sm:$0xff]  ;;  %v477_v3 = vld [vmem:[%s6405_s4 + $0x130] sm:$0xff] }
  0x26   : > { %559 = vmatpush.bf16.msra.mxu0 %v520_v47  ;;  %4086 = vmatmul.msk.bf16.gmra.mxu2 %vm536_vm1, %v4870_v55  ;;  %v386_v47 = vld [vmem:[%s4796_s16 + $0x98] sm:$0xff]  ;;  %v475_v6 = vld [vmem:[%s6405_s4 + $0x120] sm:$0xff]  ;;  %v473_v10 = vld [vmem:[%s6405_s4 + $0x110] sm:$0xff] }
  0x27   : > { %588 = vmatpush.bf16.msra.mxu1 %v528_v50  ;;  %4289 = vmatpush.bf16.msrb.mxu2 %v657_v20  ;;  %v489_v50 = vld [vmem:[%s6405_s4 + $0x190] sm:$0xff]  ;;  %v517_v53 = vpack.c.bf16 %v389_v49, %v386_v47  ;;  %v478_v4 = vld [vmem:[%s6405_s4 + $0x138] sm:$0xff] }
  0x28   : > { %665 = vmatpush.bf16.msra.mxu3 %v650_v41  ;;  %v652_v54 = vpack.c.bf16 %v490_v51, %v489_v50  ;;  %v646_v5 = vpack.c.bf16 %v478_v4, %v477_v3  ;;  %v474_v11 = vld [vmem:[%s6405_s4 + $0x118] sm:$0xff]  ;;  %v505_v13 = vld [vmem:[%s6405_s4 + $0x210] sm:$0xff] }
  0x29   : > { %v506_v14 = vld [vmem:[%s6405_s4 + $0x218] sm:$0x3] }
  0x2a   : > { %560 = vmatpush.bf16.msra.mxu0 %v519_v56  ;;  %v483_v56 = vld [vmem:[%s6405_s4 + $0x160] sm:$0xff] }
  0x2b   : > { %589 = vmatpush.bf16.msra.mxu1 %v527_v59  ;;  %4290 = vmatpush.bf16.msrb.mxu2 %v656_v30  ;;  %v649_v58 = vpack.c.bf16 %v484_v57, %v483_v56  ;;  %v481_v59 = vld [vmem:[%s6405_s4 + $0x150] sm:$0xff] }
  0x2c   : > { %v648_v0 = vpack.c.bf16 %v482_v60, %v481_v59  ;;  %v5045_v59 = vld [vmem:[%s5037_s15 + $0x8] sm:$0xff]  ;;  %v5050_v60 = vld [vmem:[%s5037_s15 + $0x10] sm:$0xff] }
  0x2d   : > { %561 = vmatmul.bf16.vlgmr.msra.gmra.mxu0 %v4876_v62  ;;  %666 = vmatpush.bf16.msra.mxu3 %v649_v58  ;;  %v5040_v58 = vld [vmem:[%s5037_s15] sm:$0xff] }
  0x2e   : > { %590 = vmatmul.bf16.vlgmr.msra.gmra.mxu1 %v4880_v63  ;;  %693 = vmatpush.bf16.msrb.mxu0 %v659_v12  ;;  %v644_v12 = vpack.c.bf16 %v474_v11, %v473_v10 }
  0x2f   : > { %4291 = vmatpush.bf16.msrb.mxu2 %v655_v36 }
  0x31   : > { %667 = vmatpush.bf16.msra.mxu3 %v648_v0 }
  0x32   : > { %694 = vmatpush.bf16.msrb.mxu0 %v658_v15  ;;  %v660_v15 = vpack.c.bf16 %v506_v14, %v505_v13 }
  0x33   : > { %4292 = vmatpush.bf16.msrb.mxu2 %v654_v42 }
  0x34   : > { %v662_v16 = vsel %vm549_vm0, %v660_v15, 0 }
  0x36   : > { %4087 = vmatmul.msk.bf16.gmra.mxu2 %vm536_vm1, %v4886_v2  ;;  %695 = vmatpush.bf16.msrb.mxu0 %v657_v20 }
  0x37   : > { %4293 = vmatpush.bf16.msrb.mxu2 %v653_v48 }
  0x3a   : > { %696 = vmatpush.bf16.msrb.mxu0 %v656_v30 }
  0x3b   : > { %4294 = vmatpush.bf16.msrb.mxu2 %v652_v54 }
  0x3d   : > { %566 = vmatmul.bf16.gmra.mxu0 %v4892_v7 }
  0x3e   : > { %595 = vmatmul.bf16.gmra.mxu1 %v4896_v8  ;;  %697 = vmatpush.bf16.msrb.mxu0 %v655_v36 }
  0x42   : > { %698 = vmatpush.bf16.msrb.mxu0 %v654_v42 }
  0x46   : > { %4088 = vmatmul.msk.bf16.gmra.mxu2 %vm536_vm1, %v4920_v19  ;;  %699 = vmatpush.bf16.msrb.mxu0 %v653_v48 }
  0x4a   : > { %700 = vmatpush.bf16.msrb.mxu0 %v652_v54 }
  0x4d   : > { %571 = vmatmul.bf16.gmra.mxu0 %v4932_v27 }
  0x4e   : > { %600 = vmatmul.bf16.gmra.mxu1 %v514_v29  ;;  %729 = vmatpush.bf16.msra.mxu0 %v662_v16 }
  0x56   : > { %716 = vmatmul.bf16.vlgmr.msrb.gmra.mxu2 %v517_v53 }
  0x5d   : > { %576 = vmatmul.bf16.gmra.mxu0 %v516_v52 }
  0x5e   : > { %605 = vmatmul.bf16.gmra.mxu1 %v517_v53 }
  0x6d   : > { %701 = vmatmul.bf16.vlgmr.msrb.gmra.mxu0 %v4880_v63  ;;  %v647_v63 = vpack.c.bf16 %v480_v1, %v479_v61  ;;  %v5055_v61 = vld [vmem:[%s5037_s15 + $0x18] sm:$0xff] }
  0x6f   : > { %668 = vmatpush.bf16.msra.mxu3 %v647_v63 }
  0x73   : > { %669 = vmatpush.bf16.msra.mxu3 %v646_v5 }
  0x7d   : > { %706 = vmatmul.bf16.gmra.mxu0 %v4896_v8  ;;  %v476_v8 = vld [vmem:[%s6405_s4 + $0x128] sm:$0xff] }
  0x7e   : > { %v645_v9 = vpack.c.bf16 %v476_v8, %v475_v6 }
  0x80   : > { %670 = vmatpush.bf16.msra.mxu3 %v645_v9 }
  0x84   : > { %671 = vmatpush.bf16.msra.mxu3 %v644_v12  ;;  %v5064_v12 = vld [vmem:[%s6405_s4 + $0x280] sm:$0xff] }
  0x85   : > { %v5067_v15 = vperm.slane %v5064_v12, 0 }
  0x87   : > { %672 = vmatmul.bf16.vlgmr.msra.gmra.mxu3 %v4876_v62 }
  0x8d   : > { %711 = vmatmul.bf16.gmra.mxu0 %v514_v29 }
  0x97   : > { %677 = vmatmul.bf16.gmra.mxu3 %v4892_v7 }
  0x99   : > { %v620_v17 = vpop.f32.mrf.mxu2 }
  0x9d   : > { %4089 = vmatmul.msk.bf16.vlgmr.msra.gmra.mxu0 %vm536_vm1, %v4816_v28 }
  0xa1   : > { %v622_v18 = vpop.f32.mrf.mxu2 }
  0xa7   : > { %682 = vmatmul.bf16.gmra.mxu3 %v4932_v27 }
  0xa9   : > { %v625_v25 = vpop.f32.mrf.mxu2 }
  0xaa   : > { %v562_v62 = vpop.f32.mrf.mxu0 }
  0xab   : > { %v591_v20 = vpop.f32.mrf.mxu1 }
  0xac   : > { %v592_v21 = vadd.f32 %v591_v20, %v562_v62 }
  0xad   : > { %4090 = vmatmul.msk.bf16.gmra.mxu0 %vm536_vm1, %v4870_v55 }
  0xae   : > { %v621_v22 = vadd.f32 %v620_v17, %v592_v21 }
  0xb1   : > { %v627_v30 = vpop.f32.mrf.mxu2 }
  0xb2   : > { %v564_v23 = vpop.f32.mrf.mxu0 }
  0xb3   : > { %v593_v24 = vpop.f32.mrf.mxu1 }
  0xb4   : > { %v594_v50 = vadd.f32 %v593_v24, %v564_v23 }
  0xb6   : > { %v623_v56 = vadd.f32 %v622_v18, %v594_v50 }
  0xb7   : > { %687 = vmatmul.bf16.gmra.mxu3 %v516_v52 }
  0xb8   : > { %v640_v57 = vpack.c.bf16 %v623_v56, %v621_v22 }
  0xb9   : > { %v630_v31 = vpop.f32.mrf.mxu2 }
  0xba   : > { %v567_v26 = vpop.f32.mrf.mxu0 }
  0xbb   : > { %v596_v29 = vpop.f32.mrf.mxu1 }
  0xbc   : > { %v597_v49 = vadd.f32 %v596_v29, %v567_v26 }
  0xbd   : > { %4091 = vmatmul.msk.bf16.gmra.mxu0 %vm536_vm1, %v4886_v2 }
  0xbe   : > { %v626_v53 = vadd.f32 %v625_v25, %v597_v49 }
  0xc1   : > { %v632_v34 = vpop.f32.mrf.mxu2 }
  0xc2   : > { %v569_v28 = vpop.f32.mrf.mxu0 }
  0xc3   : > { %v598_v7 = vpop.f32.mrf.mxu1 }
  0xc4   : > { %v599_v46 = vadd.f32 %v598_v7, %v569_v28 }
  0xc6   : > { %v628_v52 = vadd.f32 %v627_v30, %v599_v46 }
  0xc8   : > { %v641_v54 = vpack.c.bf16 %v628_v52, %v626_v53 }
  0xc9   : > { %v635_v27 = vpop.f32.mrf.mxu2 }
  0xca   : > { %v572_v32 = vpop.f32.mrf.mxu0 }
  0xcb   : > { %v601_v33 = vpop.f32.mrf.mxu1 }
  0xcc   : > { %v602_v43 = vadd.f32 %v601_v33, %v572_v32 }
  0xcd   : > { %4092 = vmatmul.msk.bf16.gmra.mxu0 %vm536_vm1, %v4920_v19 }
  0xce   : > { %v631_v19 = vadd.f32 %v630_v31, %v602_v43 }
  0xd1   : > { %v637_v42 = vpop.f32.mrf.mxu2 }
  0xd2   : > { %v574_v55 = vpop.f32.mrf.mxu0 }
  0xd3   : > { %v603_v35 = vpop.f32.mrf.mxu1 }
  0xd4   : > { %v604_v41 = vadd.f32 %v603_v35, %v574_v55 }
  0xd6   : > { %v633_v48 = vadd.f32 %v632_v34, %v604_v41 }
  0xd8   : > { %v642_v51 = vpack.c.bf16 %v633_v48, %v631_v19 }
  0xda   : > { %v577_v36 = vpop.f32.mrf.mxu0 }
  0xdb   : > { %v606_v37 = vpop.f32.mrf.mxu1 }
  0xdc   : > { %v607_v38 = vadd.f32 %v606_v37, %v577_v36 }
  0xde   : > { %v636_v44 = vadd.f32 %v635_v27, %v607_v38 }
  0xe2   : > { %v579_v39 = vpop.f32.mrf.mxu0 }
  0xe3   : > { %v608_v40 = vpop.f32.mrf.mxu1 }
  0xe4   : > { %v609_v2 = vadd.f32 %v608_v40, %v579_v39 }
  0xe6   : > { %v638_v45 = vadd.f32 %v637_v42, %v609_v2 }
  0xe8   : > { %v643_v47 = vpack.c.bf16 %v638_v45, %v636_v44 }
  0xea   : > { %788 = vmatpush.bf16.msrb.mxu1 %v643_v47  ;;  %v702_v0 = vpop.f32.mrf.mxu0 }
  0xee   : > { %789 = vmatpush.bf16.msrb.mxu1 %v642_v51 }
  0xf2   : > { %790 = vmatpush.bf16.msrb.mxu1 %v641_v54  ;;  %v704_v1 = vpop.f32.mrf.mxu0 }
  0xf6   : > { %791 = vmatpush.bf16.msrb.mxu1 %v640_v57 }
  0xf9   : > { %4109 = vmatmul.msk.bf16.vlgmr.msrb.gmra.mxu1 %vm771_vm2, %v5040_v58 }
  0xfa   : > { %v707_v63 = vpop.f32.mrf.mxu0 }
 0x102   : > { %v709_v3 = vpop.f32.mrf.mxu0 }
 0x109   : > { %4110 = vmatmul.msk.bf16.gmra.mxu1 %vm771_vm2, %v5045_v59 }
 0x10a   : > { %v712_v4 = vpop.f32.mrf.mxu0  ;;  %v673_v6 = vpop.f32.mrf.mxu3 }
 0x10b   : > { %v703_v11 = vadd.f32 %v702_v0, %v673_v6 }
 0x112   : > { %v5059_v5 = vpop.f32.mrf.mxu0  ;;  %v675_v9 = vpop.f32.mrf.mxu3 }
 0x113   : > { %v705_v18 = vadd.f32 %v704_v1, %v675_v9 }
 0x119   : > { %4111 = vmatmul.msk.bf16.gmra.mxu1 %vm771_vm2, %v5050_v60 }
 0x11a   : > { %v731_v8 = vpop.f32.mrf.mxu0  ;;  %v678_v14 = vpop.f32.mrf.mxu3 }
 0x11b   : > { %v732_v13 = vadd.f32 %v731_v8, %v703_v11  ;;  %v708_v30 = vadd.f32 %v707_v63, %v678_v14 }
 0x122   : > { %v733_v10 = vpop.f32.mrf.mxu0  ;;  %v680_v25 = vpop.f32.mrf.mxu3 }
 0x123   : > { %v734_v22 = vadd.f32 %v733_v10, %v705_v18  ;;  %v710_v37 = vadd.f32 %v709_v3, %v680_v25 }
 0x129   : > { %4112 = vmatmul.msk.bf16.gmra.mxu1 %vm771_vm2, %v5055_v61 }
 0x12a   : > { %v736_v20 = vpop.f32.mrf.mxu0  ;;  %v683_v38 = vpop.f32.mrf.mxu3 }
 0x12b   : > { %v737_v33 = vadd.f32 %v736_v20, %v708_v30  ;;  %v713_v48 = vadd.f32 %v712_v4, %v683_v38 }
 0x132   : > { %v738_v31 = vpop.f32.mrf.mxu0  ;;  %v685_v52 = vpop.f32.mrf.mxu3 }
 0x133   : > { %v739_v42 = vadd.f32 %v738_v31, %v710_v37  ;;  %v715_v11 = vadd.f32 %v5059_v5, %v685_v52 }
 0x13a   : > { %v741_v44 = vpop.f32.mrf.mxu0 }
 0x13b   : > { %v742_v57 = vadd.f32 %v741_v44, %v713_v48 }
 0x142   : > { %v743_v9 = vpop.f32.mrf.mxu0 }
 0x143   : > { %v744_v25 = vadd.f32 %v743_v9, %v715_v11 }
 0x176   : > { %v793_v16 = vpop.f32.mrf.mxu1 }
 0x177   : > { %v794_v17 = vadd.f32 %v793_v16, %v732_v13 }
 0x179   : > { %v814_v62 = vadd.f32 %v5067_v15, %v794_v17 }
 0x17b   : > { %v830_v21 = vmul.f32 0.044715, %v814_v62  ;;  %v822_v10 = vmul.f32 0.5, %v814_v62 }
 0x17d   : > { %v838_v23 = vmul.f32 %v830_v21, %v814_v62  ;;  %v688_v21 = vpop.f32.mrf.mxu3 }
 0x17e   : > { %v795_v24 = vpop.f32.mrf.mxu1 }
 0x17f   : > { %v796_v26 = vadd.f32 %v795_v24, %v734_v22  ;;  %v846_v29 = vmul.f32 %v838_v23, %v814_v62 }
 0x181   : > { %v815_v28 = vadd.f32 %v5067_v15, %v796_v26  ;;  %v854_v32 = vadd.f32 %v846_v29, %v814_v62  ;;  %v717_v62 = vpop.f32.mrf.mxu2 }
 0x182   : > { %v718_v31 = vadd.f32 %v717_v62, %v688_v21  ;;  %v4695_v62 = vmov 64.0  }
 0x183   : > { %v831_v7 = vmul.f32 0.044715, %v815_v28  ;;  %v862_v27 = vmul.f32 0.7978846, %v854_v32  ;;  %v823_v63 = vmul.f32 0.5, %v815_v28 }
 0x185   : > { %v839_v34 = vmul.f32 %v831_v7, %v815_v28  ;;  %4311 = vtanh.f32 %v862_v27 }
 0x186   : > { %v798_v55 = vpop.f32.mrf.mxu1 }
 0x187   : > { %v847_v35 = vmul.f32 %v839_v34, %v815_v28  ;;  %v799_v36 = vadd.f32 %v798_v55, %v737_v33  ;;  %v746_v34 = vpop.f32.mrf.mxu0 }
 0x188   : > { %v747_v38 = vadd.f32 %v746_v34, %v718_v31  ;;  %v1003_v34 = vld [vmem:[%s6405_s4 + $0x230] sm:$0xf] }
 0x189   : > { %v855_v39 = vadd.f32 %v847_v35, %v815_v28  ;;  %v816_v40 = vadd.f32 %v5067_v15, %v799_v36 }
 0x18b   : > { %v863_v41 = vmul.f32 0.7978846, %v855_v39  ;;  %v832_v2 = vmul.f32 0.044715, %v816_v40  ;;  %v4312_v50 = vpop.eup %4311  ;;  %v824_v23 = vmul.f32 0.5, %v816_v40 }
 0x18c   : > { %v878_v1 = vadd.f32 1.0, %v4312_v50 }
 0x18d   : > { %4313 = vtanh.f32 %v863_v41  ;;  %v840_v43 = vmul.f32 %v832_v2, %v816_v40  ;;  %v690_v2 = vpop.f32.mrf.mxu3 }
 0x18e   : > { %v800_v45 = vpop.f32.mrf.mxu1  ;;  %v5077_v16 = vmul.f32 %v878_v1, %v822_v10 }
 0x18f   : > { %v848_v46 = vmul.f32 %v840_v43, %v816_v40  ;;  %v801_v47 = vadd.f32 %v800_v45, %v739_v42  ;;  %v719_v43 = vpop.f32.mrf.mxu2 }
 0x190   : > { %v895_v5 = vsel %vm894_vm3, %v5077_v16, 0.0 }
 0x191   : > { %v856_v49 = vadd.f32 %v848_v46, %v816_v40  ;;  %v817_v19 = vadd.f32 %v5067_v15, %v801_v47 }
 0x193   : > { %v4314_v51 = vpop.eup %4313  ;;  %v864_v53 = vmul.f32 0.7978846, %v856_v49  ;;  %v833_v54 = vmul.f32 0.044715, %v817_v19  ;;  %v825_v42 = vmul.f32 0.5, %v817_v19  ;;  %v720_v49 = vadd.f32 %v719_v43, %v690_v2 }
 0x194   : > { %v879_v56 = vadd.f32 1.0, %v4314_v51  ;;  %v748_v51 = vpop.f32.mrf.mxu0 }
 0x195   : > { %4315 = vtanh.f32 %v864_v53  ;;  %v841_v0 = vmul.f32 %v833_v54, %v817_v19 }
 0x196   : > { %v803_v3 = vpop.f32.mrf.mxu1  ;;  %v5073_v4 = vmul.f32 %v879_v56, %v823_v63 }
 0x197   : > { %v849_v6 = vmul.f32 %v841_v0, %v817_v19  ;;  %v804_v8 = vadd.f32 %v803_v3, %v742_v57 }
 0x198   : > { %v896_v22 = vsel %vm894_vm3, %v5073_v4, 0.0 }
 0x199   : > { %v857_v13 = vadd.f32 %v849_v6, %v817_v19  ;;  %v818_v14 = vadd.f32 %v5067_v15, %v804_v8  ;;  %v897_v28 = vadd.f32 %v896_v22, %v895_v5  ;;  %v749_v19 = vadd.f32 %v748_v51, %v720_v49 }
 0x19b   : > { %v4316_v17 = vpop.eup %4315  ;;  %v865_v18 = vmul.f32 0.7978846, %v857_v13  ;;  %v834_v20 = vmul.f32 0.044715, %v818_v14  ;;  %v826_v56 = vmul.f32 0.5, %v818_v14 }
 0x19c   : > { %v880_v24 = vadd.f32 1.0, %v4316_v17 }
 0x19d   : > { %4317 = vtanh.f32 %v865_v18  ;;  %v842_v26 = vmul.f32 %v834_v20, %v818_v14 }
 0x19e   : > { %v5083_v29 = vmul.f32 %v880_v24, %v824_v23  ;;  %v805_v30 = vpop.f32.mrf.mxu1 }
 0x19f   : > { %v850_v7 = vmul.f32 %v842_v26, %v818_v14  ;;  %v806_v32 = vadd.f32 %v805_v30, %v744_v25 }
 0x1a0   : > { %v898_v33 = vsel %vm894_vm3, %v5083_v29, 0.0 }
 0x1a1   : > { %v899_v55 = vadd.f32 %v898_v33, %v897_v28  ;;  %v858_v35 = vadd.f32 %v850_v7, %v818_v14  ;;  %v819_v36 = vadd.f32 %v5067_v15, %v806_v32 }
 0x1a3   : > { %v4318_v27 = vpop.eup %4317  ;;  %v866_v37 = vmul.f32 0.7978846, %v858_v35  ;;  %v835_v39 = vmul.f32 0.044715, %v819_v36  ;;  %v827_v5 = vmul.f32 0.5, %v819_v36  ;;  %v1012_v35 = vpack.c.bf16 %v1003_v34, %v1003_v34 }
 0x1a4   : > { %v881_v40 = vadd.f32 1.0, %v4318_v27 }
 0x1a5   : > { %4319 = vtanh.f32 %v866_v37  ;;  %v843_v41 = vmul.f32 %v835_v39, %v819_v36  ;;  %v1027_v2 = vsel %vm1025_vm4, %v1012_v35, 0 }
 0x1a6   : > { %v808_v44 = vpop.f32.mrf.mxu1  ;;  %v5088_v47 = vmul.f32 %v881_v40, %v825_v42  ;;  %1035 = vmatpush.bf16.msrb.mxu3 %v1027_v2 }
 0x1a7   : > { %v851_v45 = vmul.f32 %v843_v41, %v819_v36  ;;  %v809_v46 = vadd.f32 %v808_v44, %v747_v38 }
 0x1a8   : > { %v900_v54 = vsel %vm894_vm3, %v5088_v47, 0.0 }
 0x1a9   : > { %v859_v48 = vadd.f32 %v851_v45, %v819_v36  ;;  %v820_v50 = vadd.f32 %v5067_v15, %v809_v46  ;;  %v901_v6 = vadd.f32 %v900_v54, %v899_v55  ;;  %v1006_v36 = vld [vmem:[%s6405_s4 + $0x248] sm:$0xf] }
 0x1aa   : > { %v1063_v38 = vpack.c.bf16 %v1006_v36, %v1006_v36 }
 0x1ab   : > { %v4320_v52 = vpop.eup %4319  ;;  %v836_v53 = vmul.f32 0.044715, %v820_v50  ;;  %v867_v0 = vmul.f32 0.7978846, %v859_v48  ;;  %v828_v7 = vmul.f32 0.5, %v820_v50 }
 0x1ac   : > { %v882_v57 = vadd.f32 1.0, %v4320_v52  ;;  %v1065_v43 = vsel %vm1025_vm4, %v1063_v38, 0 }
 0x1ad   : > { %v844_v1 = vmul.f32 %v836_v53, %v820_v50  ;;  %4321 = vtanh.f32 %v867_v0  ;;  %1073 = vmatpush.bf16.msra.mxu2 %v1065_v43 }
 0x1ae   : > { %v5093_v63 = vmul.f32 %v882_v57, %v826_v56  ;;  %v810_v3 = vpop.f32.mrf.mxu1 }
 0x1af   : > { %v852_v8 = vmul.f32 %v844_v1, %v820_v50  ;;  %v811_v9 = vadd.f32 %v810_v3, %v749_v19  ;;  %v1001_v1 = vld [vmem:[%s6405_s4 + $0x220] sm:$0xff]  ;;  %v1002_v3 = vld [vmem:[%s6405_s4 + $0x228] sm:$0xff] }
 0x1b0   : > { %v902_v10 = vsel %vm894_vm3, %v5093_v63, 0.0 }
 0x1b1   : > { %v903_v11 = vadd.f32 %v902_v10, %v901_v6  ;;  %v860_v13 = vadd.f32 %v852_v8, %v820_v50  ;;  %v821_v17 = vadd.f32 %v5067_v15, %v811_v9  ;;  %v5101_v15 = vld [vmem:[%s6405_s4 + $0x290] sm:$0x7]  ;;  %v1004_v6 = vld [vmem:[%s6405_s4 + $0x238] sm:$0xff]  ;;  %v5131_v8 = vld [vmem:[%s6405_s4 + $0x288] sm:$0xff]  ;;  %v1011_v9 = vpack.c.bf16 %v1002_v3, %v1001_v1 }
 0x1b2   : > { %v1625_v33 = vrot.slane %v5101_v15, 2  ;;  %v1005_v10 = vld [vmem:[%s6405_s4 + $0x240] sm:$0xff] }
 0x1b3   : > { %v868_v18 = vmul.f32 0.7978846, %v860_v13  ;;  %v837_v14 = vmul.f32 0.044715, %v821_v17  ;;  %v4322_v21 = vpop.eup %4321  ;;  %v829_v40 = vmul.f32 0.5, %v821_v17  ;;  %v1062_v13 = vpack.c.bf16 %v1005_v10, %v1004_v6  ;;  %1036 = vmatpush.bf16.msrb.mxu3 %v1011_v9 }
 0x1b4   : > { %v883_v24 = vadd.f32 1.0, %v4322_v21  ;;  %4296 = vpush %v1625_v33  ;;  %v992_v6 = vperm.slane %v5064_v12, 6  ;;  %2249 = vrot.lane.b32.xlu0 %v1625_v33, %s4696_s17  ;;  %s4264_s17 = sshll.u32 %s6411_s28, 6 }
 0x1b5   : > { %4323 = vtanh.f32 %v868_v18  ;;  %v845_v20 = vmul.f32 %v837_v14, %v821_v17  ;;  %1074 = vmatpush.bf16.msra.mxu2 %v1062_v13  ;;  %s6199_s20 = scalar_lea.vmem %s6403_s2, %s4264_s17 }
 0x1b6   : > { %4325 = vrcp.f32 %v4695_v62  ;;  %v891_v28 = vmul.f32 %v883_v24, %v827_v5 }
 0x1b7   : > { %v853_v22 = vmul.f32 %v845_v20, %v821_v17 }
 0x1b8   : > { %v904_v55 = vsel %vm894_vm3, %v891_v28, 0.0 }
 0x1b9   : > { %v861_v23 = vadd.f32 %v853_v22, %v821_v17  ;;  %v905_v42 = vadd.f32 %v904_v55, %v903_v11 }
 0x1bb   : > { %v4324_v25 = vpop.eup %4323  ;;  %v869_v26 = vmul.f32 0.7978846, %v861_v23 }
 0x1bc   : > { %v884_v30 = vadd.f32 1.0, %v4324_v25  ;;  %v4326_v31 = vpop.eup %4325 }
 0x1bd   : > { %4327 = vtanh.f32 %v869_v26  ;;  %v917_v37 = vmul.f32 64.0, %v4326_v31  ;;  %vm921_vm5 = vweird.f32 %v4326_v31 }
 0x1be   : > { %v892_v32 = vmul.f32 %v884_v30, %v828_v7 }
 0x1bf   : > { %v918_v48 = vsub.f32 1.0, %v917_v37 }
 0x1c0   : > { %v906_v39 = vsel %vm894_vm3, %v892_v32, 0.0 }
 0x1c1   : > { %v907_v45 = vadd.f32 %v906_v39, %v905_v42  ;;  %v919_v51 = vmul.f32 %v4326_v31, %v918_v48 }
 0x1c3   : > { %v4328_v27 = vpop.eup %4327  ;;  %v920_v54 = vadd.f32 %v4326_v31, %v919_v51 }
 0x1c4   : > { %v885_v41 = vadd.f32 1.0, %v4328_v27 }
 0x1c5   : > { %v5117_v0 = vsel %vm921_vm5, %v4326_v31, %v920_v54  ;;  %v964_v54 = vperm.slane %v5064_v12, 3 }
 0x1c6   : > { %v893_v44 = vmul.f32 %v885_v41, %v829_v40 }
 0x1c8   : > { %v908_v46 = vsel %vm894_vm3, %v893_v44, 0.0 }
 0x1c9   : > { %v909_v49 = vadd.f32 %v908_v46, %v907_v45 }
 0x1cb   : > { %v910_v50 = vrot.slane %v909_v49, 4 }
 0x1cd   : > { %v911_v52 = vadd.f32 %v910_v50, %v909_v49 }
 0x1cf   : > { %v912_v53 = vrot.slane %v911_v52, 2 }
 0x1d1   : > { %v913_v56 = vadd.f32 %v912_v53, %v911_v52 }
 0x1d3   : > { %v914_v57 = vrot.slane %v913_v56, 1 }
 0x1d5   : > { %v915_v19 = vadd.f32 %v914_v57, %v913_v56 }
 0x1d7   : > { %v923_v11 = vmul.f32 %v5117_v0, %v915_v19 }
 0x1d9   : > { %v924_v17 = vmul.f32 %v923_v11, %v5131_v8 }
 0x1db   : > { %v925_v18 = vperm.slane %v924_v17, 1 }
 0x1dd   : > { %v926_v14 = vsub.f32 %v5077_v16, %v925_v18  ;;  %v927_v20 = vsub.f32 %v5073_v4, %v925_v18  ;;  %v928_v21 = vsub.f32 %v5083_v29, %v925_v18  ;;  %v929_v22 = vsub.f32 %v5088_v47, %v925_v18 }
 0x1de   : > { %v930_v23 = vsub.f32 %v5093_v63, %v925_v18  ;;  %v931_v26 = vsub.f32 %v891_v28, %v925_v18  ;;  %v932_v34 = vsub.f32 %v892_v32, %v925_v18  ;;  %v933_v29 = vsub.f32 %v893_v44, %v925_v18 }
 0x1df   : > { %v934_v24 = vmul.f32 %v926_v14, %v926_v14  ;;  %v935_v62 = vmul.f32 %v927_v20, %v927_v20  ;;  %v936_v25 = vmul.f32 %v928_v21, %v928_v21  ;;  %v937_v5 = vmul.f32 %v929_v22, %v929_v22 }
 0x1e0   : > { %v938_v16 = vmul.f32 %v930_v23, %v930_v23  ;;  %v939_v35 = vmul.f32 %v931_v26, %v931_v26  ;;  %v940_v36 = vmul.f32 %v932_v34, %v932_v34  ;;  %v941_v37 = vmul.f32 %v933_v29, %v933_v29 }
 0x1e1   : > { %v942_v30 = vsel %vm894_vm3, %v934_v24, 0.0  ;;  %v943_v7 = vsel %vm894_vm3, %v935_v62, 0.0  ;;  %v945_v4 = vsel %vm894_vm3, %v936_v25, 0.0  ;;  %v947_v47 = vsel %vm894_vm3, %v937_v5, 0.0 }
 0x1e2   : > { %v944_v31 = vadd.f32 %v943_v7, %v942_v30  ;;  %v949_v27 = vsel %vm894_vm3, %v938_v16, 0.0  ;;  %v951_v38 = vsel %vm894_vm3, %v939_v35, 0.0  ;;  %v953_v40 = vsel %vm894_vm3, %v940_v36, 0.0 }
 0x1e3   : > { %v955_v41 = vsel %vm894_vm3, %v941_v37, 0.0  ;;  %v965_v19 = vmul.f32 %v964_v54, %v926_v14  ;;  %v966_v1 = vmul.f32 %v964_v54, %v927_v20  ;;  %v967_v9 = vmul.f32 %v964_v54, %v928_v21 }
 0x1e4   : > { %v946_v55 = vadd.f32 %v945_v4, %v944_v31  ;;  %v968_v10 = vmul.f32 %v964_v54, %v929_v22  ;;  %v969_v11 = vmul.f32 %v964_v54, %v930_v23  ;;  %v970_v17 = vmul.f32 %v964_v54, %v931_v26 }
 0x1e5   : > { %v971_v18 = vmul.f32 %v964_v54, %v932_v34  ;;  %v972_v24 = vmul.f32 %v964_v54, %v933_v29  ;;  %s4297_s23 = spop %4296 }
 0x1e6   : > { %v948_v63 = vadd.f32 %v947_v47, %v946_v55 }
 0x1e8   : > { %v950_v28 = vadd.f32 %v949_v27, %v948_v63 }
 0x1ea   : > { %v952_v39 = vadd.f32 %v951_v38, %v950_v28 }
 0x1ec   : > { %v954_v32 = vadd.f32 %v953_v40, %v952_v39 }
 0x1ee   : > { %v956_v2 = vadd.f32 %v955_v41, %v954_v32 }
 0x1f0   : > { %v957_v42 = vrot.slane %v956_v2, 4 }
 0x1f2   : > { %v958_v43 = vadd.f32 %v957_v42, %v956_v2 }
 0x1f4   : > { %v959_v44 = vrot.slane %v958_v43, 2 }
 0x1f6   : > { %v960_v45 = vadd.f32 %v959_v44, %v958_v43  ;;  %v1665_v44 = vld [vmem:[%s6406_s5 + $0x10] sm:$0xf] }
 0x1f8   : > { %v961_v46 = vrot.slane %v960_v45, 1 }
 0x1fa   : > { %v962_v48 = vadd.f32 %v961_v46, %v960_v45  ;;  %v1671_v45 = vpack.c.bf16 %v1665_v44, %v1665_v44  ;;  %v1663_v46 = vld [vmem:[%s6406_s5] sm:$0xff] }
 0x1fc   : > { %v963_v49 = vmul.f32 %v962_v48, %v5117_v0  ;;  %v1664_v48 = vld [vmem:[%s6406_s5 + $0x8] sm:$0xff] }
 0x1fe   : > { %v973_v50 = vadd.f32 1e-05, %v963_v49  ;;  %v1685_v49 = vsel %vm1025_vm4, %v1671_v45, 0 }
 0x200   : > { %4329 = vrsqrt.f32 %v973_v50  ;;  %vm980_vm7 = vweird.f32 %v973_v50 }
 0x206   : > { %v4330_v51 = vpop.eup %4329 }
 0x207   : > { %v975_v52 = vmul.f32 %v4330_v51, %v973_v50  ;;  %vm981_vm6 = vweird.f32 %v4330_v51 }
 0x208   : > { %vm982_vm8 = vmor %vm980_vm7, %vm981_vm6 }
 0x209   : > { %v976_v53 = vmul.f32 %v4330_v51, %v975_v52 }
 0x20b   : > { %v977_v56 = vmul.f32 0.5, %v976_v53  ;;  %v1645_v53 = vperm.slane %v5131_v8, 4 }
 0x20d   : > { %v978_v57 = vsub.f32 1.5, %v977_v56 }
 0x20f   : > { %v979_v3 = vmul.f32 %v4330_v51, %v978_v57  ;;  %v1654_v57 = vperm.slane %v5131_v8, 7 }
 0x211   : > { %v983_v13 = vsel %vm982_vm8, %v4330_v51, %v979_v3 }
 0x212   : > { %v984_v62 = vmul.f32 %v983_v13, %v965_v19  ;;  %v985_v25 = vmul.f32 %v983_v13, %v966_v1  ;;  %v986_v5 = vmul.f32 %v983_v13, %v967_v9  ;;  %v987_v30 = vmul.f32 %v983_v13, %v968_v10 }
 0x213   : > { %v988_v7 = vmul.f32 %v983_v13, %v969_v11  ;;  %v989_v31 = vmul.f32 %v983_v13, %v970_v17  ;;  %v990_v14 = vmul.f32 %v983_v13, %v971_v18  ;;  %v991_v20 = vmul.f32 %v983_v13, %v972_v24 }
 0x214   : > { %v5154_v16 = vadd.f32 %v992_v6, %v984_v62  ;;  %v5156_v4 = vadd.f32 %v992_v6, %v985_v25  ;;  %v5162_v22 = vadd.f32 %v992_v6, %v986_v5  ;;  %v5164_v23 = vadd.f32 %v992_v6, %v987_v30 }
 0x215   : > { %v5170_v34 = vadd.f32 %v992_v6, %v988_v7  ;;  %v5172_v55 = vadd.f32 %v992_v6, %v989_v31  ;;  %v5178_v35 = vadd.f32 %v992_v6, %v990_v14  ;;  %v5180_v47 = vadd.f32 %v992_v6, %v991_v20 }
 0x216   : > { %v1007_v21 = vpack.c.bf16 %v5156_v4, %v5154_v16  ;;  %v1008_v26 = vpack.c.bf16 %v5164_v23, %v5162_v22 }
 0x217   : > { %v1009_v29 = vpack.c.bf16 %v5172_v55, %v5170_v34  ;;  %v1010_v63 = vpack.c.bf16 %v5180_v47, %v5178_v35 }
 0x218   : > { %4113 = vmatmul.msk.bf16.vlgmr.msrb.gmra.mxu3 %vm894_vm3, %v1007_v21  ;;  %4117 = vmatmul.msk.bf16.vlgmr.msra.gmra.mxu2 %vm894_vm3, %v1007_v21 }
 0x228   : > { %4114 = vmatmul.msk.bf16.gmra.mxu3 %vm894_vm3, %v1008_v26  ;;  %4118 = vmatmul.msk.bf16.gmra.mxu2 %vm894_vm3, %v1008_v26 }
 0x238   : > { %4115 = vmatmul.msk.bf16.gmra.mxu3 %vm894_vm3, %v1009_v29  ;;  %4119 = vmatmul.msk.bf16.gmra.mxu2 %vm894_vm3, %v1009_v29 }
 0x248   : > { %4116 = vmatmul.msk.bf16.gmra.mxu3 %vm894_vm3, %v1010_v63  ;;  %4120 = vmatmul.msk.bf16.gmra.mxu2 %vm894_vm3, %v1010_v63 }
 0x29b   : > { %v1038_v36 = vpop.f32.mrf.mxu3 }
 0x2a3   : > { %v1040_v27 = vpop.f32.mrf.mxu3 }
 0x2a4   : > { %v1058_v43 = vpack.c.bf16 %v1040_v27, %v1038_v36 }
 0x2ab   : > { %v1043_v28 = vpop.f32.mrf.mxu3 }
 0x2b3   : > { %v1045_v37 = vpop.f32.mrf.mxu3 }
 0x2b4   : > { %v1059_v42 = vpack.c.bf16 %v1045_v37, %v1043_v28 }
 0x2bb   : > { %v1048_v38 = vpop.f32.mrf.mxu3 }
 0x2c3   : > { %v1050_v39 = vpop.f32.mrf.mxu3 }
 0x2c4   : > { %v1060_v2 = vpack.c.bf16 %v1050_v39, %v1048_v38 }
 0x2cb   : > { %v1053_v40 = vpop.f32.mrf.mxu3 }
 0x2d3   : > { %v1055_v32 = vpop.f32.mrf.mxu3 }
 0x2d4   : > { %v1061_v41 = vpack.c.bf16 %v1055_v32, %v1053_v40  ;;  %v1076_v40 = vpop.f32.mrf.mxu2 }
 0x2d6   : > { %1100 = vmatpush.bf16.msrb.mxu0 %v1061_v41 }
 0x2da   : > { %1101 = vmatpush.bf16.msrb.mxu0 %v1060_v2 }
 0x2dc   : > { %v1078_v32 = vpop.f32.mrf.mxu2 }
 0x2de   : > { %1102 = vmatpush.bf16.msrb.mxu0 %v1059_v42 }
 0x2e2   : > { %1103 = vmatpush.bf16.msrb.mxu0 %v1058_v43 }
 0x2e4   : > { %v1081_v2 = vpop.f32.mrf.mxu2 }
 0x2e5   : > { %4121 = vmatmul.msk.bf16.vlgmr.msrb.gmra.mxu0 %vm771_vm2, %v5040_v58  ;;  %v1670_v58 = vpack.c.bf16 %v1664_v48, %v1663_v46  ;;  %v5229_v48 = vperm.slane %v5064_v12, 1 }
 0x2e6   : > { %1693 = vmatpush.bf16.msra.mxu0 %v1685_v49 }
 0x2ea   : > { %1694 = vmatpush.bf16.msra.mxu0 %v1670_v58 }
 0x2ec   : > { %v1083_v43 = vpop.f32.mrf.mxu2 }
 0x2f5   : > { %4122 = vmatmul.msk.bf16.gmra.mxu0 %vm771_vm2, %v5045_v59  ;;  %v5202_v59 = vstv %s4297_s23  ;;  %s360_s23 = scalar_lea.vmem %s6404_s3, %s4264_s17 }
 0x2f6   : > { %v1629_v50 = vmul.f32 %v5202_v59, %v5154_v16  ;;  %v1630_v51 = vmul.f32 %v5202_v59, %v5156_v4  ;;  %v1631_v19 = vmul.f32 %v5202_v59, %v5162_v22  ;;  %v1632_v1 = vmul.f32 %v5202_v59, %v5164_v23 }
 0x2f7   : > { %v1633_v17 = vmul.f32 %v5202_v59, %v5170_v34  ;;  %v1634_v18 = vmul.f32 %v5202_v59, %v5172_v55  ;;  %v1635_v14 = vmul.f32 %v5202_v59, %v5178_v35  ;;  %v1636_v20 = vmul.f32 %v5202_v59, %v5180_v47 }
 0x2f8   : > { %4331 = vtanh.f32 %v1629_v50  ;;  %v1086_v50 = vpop.f32.mrf.mxu2 }
 0x2f9   : > { %4333 = vtanh.f32 %v1630_v51 }
 0x2fa   : > { %4335 = vtanh.f32 %v1631_v19 }
 0x2fb   : > { %4337 = vtanh.f32 %v1632_v1 }
 0x2fc   : > { %4339 = vtanh.f32 %v1633_v17 }
 0x2fd   : > { %4341 = vtanh.f32 %v1634_v18 }
 0x2fe   : > { %v4332_v52 = vpop.eup %4331  ;;  %4343 = vtanh.f32 %v1635_v14 }
 0x2ff   : > { %v4334_v54 = vpop.eup %4333  ;;  %v1646_v56 = vmul.f32 %v4332_v52, %v1645_v53  ;;  %4345 = vtanh.f32 %v1636_v20 }
 0x301   : > { %v1655_v3 = vadd.f32 %v1654_v57, %v1646_v56 }
 0x305   : > { %4123 = vmatmul.msk.bf16.gmra.mxu0 %vm771_vm2, %v5050_v60  ;;  %v1647_v60 = vmul.f32 %v4334_v54, %v1645_v53 }
 0x307   : > { %v1656_v6 = vadd.f32 %v1654_v57, %v1647_v60 }
 0x309   : > { %v1666_v9 = vpack.c.bf16 %v1656_v6, %v1655_v3 }
 0x315   : > { %4124 = vmatmul.msk.bf16.gmra.mxu0 %vm771_vm2, %v5055_v61  ;;  %v4336_v61 = vpop.eup %4335 }
 0x316   : > { %v4338_v10 = vpop.eup %4337  ;;  %v1648_v11 = vmul.f32 %v4336_v61, %v1645_v53  ;;  %v1088_v61 = vpop.f32.mrf.mxu2 }
 0x317   : > { %v1649_v13 = vmul.f32 %v4338_v10, %v1645_v53  ;;  %v4340_v5 = vpop.eup %4339 }
 0x318   : > { %v1657_v24 = vadd.f32 %v1654_v57, %v1648_v11  ;;  %v4342_v30 = vpop.eup %4341  ;;  %v1650_v7 = vmul.f32 %v4340_v5, %v1645_v53 }
 0x319   : > { %v1658_v62 = vadd.f32 %v1654_v57, %v1649_v13  ;;  %v1651_v31 = vmul.f32 %v4342_v30, %v1645_v53  ;;  %v4344_v63 = vpop.eup %4343 }
 0x31a   : > { %v1659_v21 = vadd.f32 %v1654_v57, %v1650_v7  ;;  %v4346_v36 = vpop.eup %4345  ;;  %v1652_v27 = vmul.f32 %v4344_v63, %v1645_v53 }
 0x31b   : > { %v1667_v25 = vpack.c.bf16 %v1658_v62, %v1657_v24  ;;  %v1660_v26 = vadd.f32 %v1654_v57, %v1651_v31  ;;  %v1653_v28 = vmul.f32 %v4346_v36, %v1645_v53 }
 0x31c   : > { %v1661_v37 = vadd.f32 %v1654_v57, %v1652_v27 }
 0x31d   : > { %v1668_v29 = vpack.c.bf16 %v1660_v26, %v1659_v21  ;;  %v1662_v38 = vadd.f32 %v1654_v57, %v1653_v28 }
 0x31e   : > { %v1091_v63 = vpop.f32.mrf.mxu2 }
 0x31f   : > { %v1669_v39 = vpack.c.bf16 %v1662_v38, %v1661_v37 }
 0x325   : > { %4137 = vmatmul.msk.bf16.vlgmr.msra.gmra.mxu0 %vm894_vm3, %v1666_v9 }
 0x335   : > { %4138 = vmatmul.msk.bf16.gmra.mxu0 %vm894_vm3, %v1667_v25 }
 0x345   : > { %4139 = vmatmul.msk.bf16.gmra.mxu0 %vm894_vm3, %v1668_v29 }
 0x355   : > { %4140 = vmatmul.msk.bf16.gmra.mxu0 %vm894_vm3, %v1669_v39 }
 0x362   : > { %v1105_v41 = vpop.f32.mrf.mxu0 }
 0x363   : > { %v1106_v46 = vadd.f32 %v1105_v41, %v1076_v40 }
 0x365   : > { %v5235_v53 = vadd.f32 %v5229_v48, %v1106_v46 }
 0x367   : > { %v1142_v12 = vmul.f32 0.044715, %v5235_v53 }
 0x369   : > { %v1150_v10 = vmul.f32 %v1142_v12, %v5235_v53 }
 0x36a   : > { %v1107_v42 = vpop.f32.mrf.mxu0 }
 0x36b   : > { %v1108_v45 = vadd.f32 %v1107_v42, %v1078_v32  ;;  %v1158_v24 = vmul.f32 %v1150_v10, %v5235_v53 }
 0x36d   : > { %v5232_v51 = vadd.f32 %v5229_v48, %v1108_v45  ;;  %v1166_v20 = vadd.f32 %v1158_v24, %v5235_v53 }
 0x36f   : > { %v1143_v56 = vmul.f32 0.044715, %v5232_v51  ;;  %v1174_v37 = vmul.f32 0.7978846, %v1166_v20 }
 0x371   : > { %v1151_v3 = vmul.f32 %v1143_v56, %v5232_v51 }
 0x372   : > { %v1110_v44 = vpop.f32.mrf.mxu0 }
 0x373   : > { %v1111_v58 = vadd.f32 %v1110_v44, %v1081_v2  ;;  %v1159_v17 = vmul.f32 %v1151_v3, %v5232_v51 }
 0x375   : > { %v5238_v54 = vadd.f32 %v5229_v48, %v1111_v58  ;;  %v1167_v7 = vadd.f32 %v1159_v17, %v5232_v51  ;;  %v1093_v58 = vpop.f32.mrf.mxu2  ;;  %v1135_v17 = vmul.f32 0.5, %v5232_v51 }
 0x377   : > { %v1144_v19 = vmul.f32 0.044715, %v5238_v54  ;;  %v1175_v36 = vmul.f32 0.7978846, %v1167_v7 }
 0x379   : > { %v1152_v11 = vmul.f32 %v1144_v19, %v5238_v54  ;;  %4347 = vtanh.f32 %v1175_v36 }
 0x37a   : > { %v1112_v49 = vpop.f32.mrf.mxu0  ;;  %4349 = vtanh.f32 %v1174_v37 }
 0x37b   : > { %v1113_v52 = vadd.f32 %v1112_v49, %v1083_v43  ;;  %v1160_v25 = vmul.f32 %v1152_v11, %v5238_v54 }
 0x37d   : > { %v5242_v60 = vadd.f32 %v5229_v48, %v1113_v52  ;;  %v1168_v21 = vadd.f32 %v1160_v25, %v5238_v54 }
 0x37f   : > { %v1145_v6 = vmul.f32 0.044715, %v5242_v60  ;;  %v1176_v39 = vmul.f32 0.7978846, %v1168_v21  ;;  %v4348_v52 = vpop.eup %4347 }
 0x381   : > { %v1153_v18 = vmul.f32 %v1145_v6, %v5242_v60  ;;  %4351 = vtanh.f32 %v1176_v39  ;;  %v1191_v6 = vadd.f32 1.0, %v4348_v52 }
 0x382   : > { %v1115_v57 = vpop.f32.mrf.mxu0 }
 0x383   : > { %v1116_v1 = vadd.f32 %v1115_v57, %v1086_v50  ;;  %v1161_v31 = vmul.f32 %v1153_v18, %v5242_v60  ;;  %v4350_v57 = vpop.eup %4349 }
 0x384   : > { %v1190_v10 = vadd.f32 1.0, %v4350_v57 }
 0x385   : > { %v5249_v9 = vadd.f32 %v5229_v48, %v1116_v1  ;;  %v1169_v27 = vadd.f32 %v1161_v31, %v5242_v60 }
 0x387   : > { %v1146_v13 = vmul.f32 0.044715, %v5249_v9  ;;  %v1177_v2 = vmul.f32 0.7978846, %v1169_v27  ;;  %v4352_v19 = vpop.eup %4351 }
 0x388   : > { %v1192_v18 = vadd.f32 1.0, %v4352_v19 }
 0x389   : > { %v1154_v5 = vmul.f32 %v1146_v13, %v5249_v9  ;;  %4353 = vtanh.f32 %v1177_v2 }
 0x38a   : > { %v1117_v62 = vpop.f32.mrf.mxu0 }
 0x38b   : > { %v1118_v30 = vadd.f32 %v1117_v62, %v1088_v61  ;;  %v1162_v26 = vmul.f32 %v1154_v5, %v5249_v9  ;;  %v1134_v62 = vmul.f32 0.5, %v5235_v53  ;;  %v5277_v5 = vmul.f32 %v1191_v6, %v1135_v17 }
 0x38c   : > { %v1138_v53 = vmul.f32 0.5, %v5249_v9 }
 0x38d   : > { %v5262_v14 = vadd.f32 %v5229_v48, %v1118_v30  ;;  %v1170_v40 = vadd.f32 %v1162_v26, %v5249_v9  ;;  %v1136_v30 = vmul.f32 0.5, %v5238_v54  ;;  %v1137_v26 = vmul.f32 0.5, %v5242_v60 }
 0x38e   : > { %v1207_v51 = vsel %vm894_vm3, %v5277_v5, 0.0 }
 0x38f   : > { %v1147_v29 = vmul.f32 0.044715, %v5262_v14  ;;  %v1178_v44 = vmul.f32 0.7978846, %v1170_v40  ;;  %v4354_v61 = vpop.eup %4353  ;;  %v1200_v21 = vmul.f32 %v1192_v18, %v1136_v30  ;;  %v1139_v40 = vmul.f32 0.5, %v5262_v14 }
 0x390   : > { %v1193_v7 = vadd.f32 1.0, %v4354_v61 }
 0x391   : > { %v1155_v28 = vmul.f32 %v1147_v29, %v5262_v14  ;;  %4355 = vtanh.f32 %v1178_v44 }
 0x392   : > { %v1120_v38 = vpop.f32.mrf.mxu0  ;;  %v1201_v36 = vmul.f32 %v1193_v7, %v1137_v26 }
 0x393   : > { %v1163_v32 = vmul.f32 %v1155_v28, %v5262_v14  ;;  %v1121_v41 = vadd.f32 %v1120_v38, %v1091_v63  ;;  %v1209_v38 = vsel %vm894_vm3, %v1200_v21, 0.0 }
 0x395   : > { %v1171_v42 = vadd.f32 %v1163_v32, %v5262_v14  ;;  %v1132_v43 = vadd.f32 %v5229_v48, %v1121_v41  ;;  %v1211_v41 = vsel %vm894_vm3, %v1201_v36, 0.0 }
 0x397   : > { %v1148_v45 = vmul.f32 0.044715, %v1132_v43  ;;  %v1179_v46 = vmul.f32 0.7978846, %v1171_v42  ;;  %v4356_v24 = vpop.eup %4355  ;;  %v1140_v42 = vmul.f32 0.5, %v1132_v43 }
 0x398   : > { %v1194_v29 = vadd.f32 1.0, %v4356_v24  ;;  %v1314_v24 = vld [vmem:[%s6405_s4 + $0x258] sm:$0xff] }
 0x399   : > { %v1156_v49 = vmul.f32 %v1148_v45, %v1132_v43  ;;  %4357 = vtanh.f32 %v1179_v46 }
 0x39a   : > { %v1122_v50 = vpop.f32.mrf.mxu0  ;;  %v1202_v39 = vmul.f32 %v1194_v29, %v1138_v53 }
 0x39b   : > { %v1164_v56 = vmul.f32 %v1156_v49, %v1132_v43  ;;  %v1123_v12 = vadd.f32 %v1122_v50, %v1093_v58 }
 0x39c   : > { %v1213_v9 = vsel %vm894_vm3, %v1202_v39, 0.0 }
 0x39d   : > { %v1172_v1 = vadd.f32 %v1164_v56, %v1132_v43  ;;  %v1133_v3 = vadd.f32 %v5229_v48, %v1123_v12  ;;  %v1198_v48 = vmul.f32 %v1190_v10, %v1134_v62  ;;  %v1316_v62 = vld [vmem:[%s6405_s4 + $0x268] sm:$0xff] }
 0x39f   : > { %v1180_v11 = vmul.f32 0.7978846, %v1172_v1  ;;  %v1149_v13 = vmul.f32 0.044715, %v1133_v3  ;;  %v4358_v31 = vpop.eup %4357  ;;  %v1206_v37 = vsel %vm894_vm3, %v1198_v48, 0.0  ;;  %v1141_v56 = vmul.f32 0.5, %v1133_v3 }
 0x3a0   : > { %v1195_v27 = vadd.f32 1.0, %v4358_v31  ;;  %v1208_v60 = vadd.f32 %v1207_v51, %v1206_v37 }
 0x3a1   : > { %4359 = vtanh.f32 %v1180_v11  ;;  %v1157_v25 = vmul.f32 %v1149_v13, %v1133_v3  ;;  %v1315_v11 = vld [vmem:[%s6405_s4 + $0x260] sm:$0xf]  ;;  %v1318_v13 = vld [vmem:[%s6405_s4 + $0x278] sm:$0xf] }
 0x3a2   : > { %v1203_v2 = vmul.f32 %v1195_v27, %v1139_v40  ;;  %v1210_v44 = vadd.f32 %v1209_v38, %v1208_v60  ;;  %v1324_v17 = vpack.c.bf16 %v1315_v11, %v1315_v11  ;;  %v1374_v18 = vpack.c.bf16 %v1318_v13, %v1318_v13 }
 0x3a3   : > { %v1165_v20 = vmul.f32 %v1157_v25, %v1133_v3  ;;  %v1317_v25 = vld [vmem:[%s6405_s4 + $0x270] sm:$0xff] }
 0x3a4   : > { %v1212_v46 = vadd.f32 %v1211_v41, %v1210_v44  ;;  %v1215_v49 = vsel %vm894_vm3, %v1203_v2, 0.0  ;;  %v1338_v7 = vsel %vm1025_vm4, %v1324_v17, 0  ;;  %v1376_v31 = vsel %vm1025_vm4, %v1374_v18, 0 }
 0x3a5   : > { %v1173_v63 = vadd.f32 %v1165_v20, %v1133_v3  ;;  %v1313_v3 = vld [vmem:[%s6405_s4 + $0x250] sm:$0xff]  ;;  %1346 = vmatpush.bf16.msra.mxu1 %v1338_v7  ;;  %1384 = vmatpush.bf16.msra.mxu3 %v1376_v31  ;;  %v1373_v29 = vpack.c.bf16 %v1317_v25, %v1316_v62  ;;  %v5343_v31 = vld [vmem:[%s6405_s4 + $0x280] sm:$0xff] }
 0x3a6   : > { %v1214_v50 = vadd.f32 %v1213_v9, %v1212_v46  ;;  %v1323_v26 = vpack.c.bf16 %v1314_v24, %v1313_v3 }
 0x3a7   : > { %v4360_v28 = vpop.eup %4359  ;;  %v1181_v54 = vmul.f32 0.7978846, %v1173_v63 }
 0x3a8   : > { %v1196_v32 = vadd.f32 1.0, %v4360_v28  ;;  %v1216_v12 = vadd.f32 %v1215_v49, %v1214_v50 }
 0x3a9   : > { %4361 = vtanh.f32 %v1181_v54  ;;  %1347 = vmatpush.bf16.msra.mxu1 %v1323_v26  ;;  %1385 = vmatpush.bf16.msra.mxu3 %v1373_v29 }
 0x3aa   : > { %v1204_v45 = vmul.f32 %v1196_v32, %v1140_v42 }
 0x3ac   : > { %v1217_v52 = vsel %vm894_vm3, %v1204_v45, 0.0 }
 0x3ad   : > { %v1218_v19 = vadd.f32 %v1217_v52, %v1216_v12 }
 0x3af   : > { %v4362_v58 = vpop.eup %4361 }
 0x3b0   : > { %v1197_v14 = vadd.f32 1.0, %v4362_v58 }
 0x3b2   : > { %v1205_v57 = vmul.f32 %v1197_v14, %v1141_v56 }
 0x3b4   : > { %v1219_v1 = vsel %vm894_vm3, %v1205_v57, 0.0 }
 0x3b5   : > { %v1220_v6 = vadd.f32 %v1219_v1, %v1218_v19 }
 0x3b7   : > { %v1221_v43 = vrot.slane %v1220_v6, 4 }
 0x3b9   : > { %v1222_v61 = vadd.f32 %v1221_v43, %v1220_v6 }
 0x3bb   : > { %v1223_v10 = vrot.slane %v1222_v61, 2 }
 0x3bd   : > { %v1224_v30 = vadd.f32 %v1223_v10, %v1222_v61 }
 0x3bf   : > { %v1225_v20 = vrot.slane %v1224_v30, 1 }
 0x3c1   : > { %v1226_v63 = vadd.f32 %v1225_v20, %v1224_v30  ;;  %v1268_v20 = vperm.slane %v5343_v31, 4 }
 0x3c3   : > { %v1227_v51 = vmul.f32 %v1226_v63, %v5117_v0 }
 0x3c5   : > { %v1228_v53 = vmul.f32 %v1227_v51, %v5131_v8 }
 0x3c7   : > { %v1229_v27 = vperm.slane %v1228_v53, 2  ;;  %v1296_v53 = vperm.slane %v5343_v31, 7 }
 0x3c9   : > { %v1230_v28 = vsub.f32 %v1198_v48, %v1229_v27  ;;  %v1231_v37 = vsub.f32 %v5277_v5, %v1229_v27  ;;  %v1232_v54 = vsub.f32 %v1200_v21, %v1229_v27  ;;  %v1233_v38 = vsub.f32 %v1201_v36, %v1229_v27 }
 0x3ca   : > { %v5315_v40 = vsub.f32 %v1202_v39, %v1229_v27  ;;  %v5317_v42 = vsub.f32 %v1203_v2, %v1229_v27  ;;  %v5321_v58 = vsub.f32 %v1204_v45, %v1229_v27  ;;  %v5326_v36 = vsub.f32 %v1205_v57, %v1229_v27 }
 0x3cb   : > { %v1238_v32 = vmul.f32 %v1230_v28, %v1230_v28  ;;  %v1239_v60 = vmul.f32 %v1231_v37, %v1231_v37  ;;  %v1240_v41 = vmul.f32 %v1232_v54, %v1232_v54  ;;  %v1241_v44 = vmul.f32 %v1233_v38, %v1233_v38 }
 0x3cc   : > { %v1242_v5 = vmul.f32 %v5315_v40, %v5315_v40  ;;  %v1243_v39 = vmul.f32 %v5317_v42, %v5317_v42  ;;  %v1244_v52 = vmul.f32 %v5321_v58, %v5321_v58  ;;  %v1245_v14 = vmul.f32 %v5326_v36, %v5326_v36 }
 0x3cd   : > { %v1246_v9 = vsel %vm894_vm3, %v1238_v32, 0.0  ;;  %v1247_v46 = vsel %vm894_vm3, %v1239_v60, 0.0  ;;  %v1249_v48 = vsel %vm894_vm3, %v1240_v41, 0.0  ;;  %v1251_v2 = vsel %vm894_vm3, %v1241_v44, 0.0 }
 0x3ce   : > { %v1248_v49 = vadd.f32 %v1247_v46, %v1246_v9  ;;  %v1253_v45 = vsel %vm894_vm3, %v1242_v5, 0.0  ;;  %v1255_v12 = vsel %vm894_vm3, %v1243_v39, 0.0  ;;  %v1257_v57 = vsel %vm894_vm3, %v1244_v52, 0.0  ;;  %v1760_v52 = vld [vmem:[%s6406_s5 + $0x20] sm:$0xff] }
 0x3cf   : > { %v1259_v6 = vsel %vm894_vm3, %v1245_v14, 0.0  ;;  %v1269_v63 = vmul.f32 %v1268_v20, %v1230_v28  ;;  %v1270_v51 = vmul.f32 %v1268_v20, %v1231_v37  ;;  %v1271_v28 = vmul.f32 %v1268_v20, %v1232_v54 }
 0x3d0   : > { %v1250_v21 = vadd.f32 %v1249_v48, %v1248_v49  ;;  %v1272_v37 = vmul.f32 %v1268_v20, %v1233_v38  ;;  %v1273_v54 = vmul.f32 %v1268_v20, %v5315_v40  ;;  %v1274_v38 = vmul.f32 %v1268_v20, %v5317_v42 }
 0x3d2   : > { %v1252_v50 = vadd.f32 %v1251_v2, %v1250_v21 }
 0x3d4   : > { %v1254_v56 = vadd.f32 %v1253_v45, %v1252_v50  ;;  %v1761_v50 = vld [vmem:[%s6406_s5 + $0x28] sm:$0xf] }
 0x3d6   : > { %v1256_v19 = vadd.f32 %v1255_v12, %v1254_v56 }
 0x3d8   : > { %v1258_v1 = vadd.f32 %v1257_v57, %v1256_v19 }
 0x3da   : > { %v1260_v43 = vadd.f32 %v1259_v6, %v1258_v1  ;;  %v1275_v6 = vmul.f32 %v1268_v20, %v5321_v58 }
 0x3dc   : > { %v1261_v61 = vrot.slane %v1260_v43, 4 }
 0x3de   : > { %v1262_v10 = vadd.f32 %v1261_v61, %v1260_v43  ;;  %v1276_v43 = vmul.f32 %v1268_v20, %v5326_v36 }
 0x3e0   : > { %v1263_v11 = vrot.slane %v1262_v10, 2 }
 0x3e2   : > { %v1264_v13 = vadd.f32 %v1263_v11, %v1262_v10 }
 0x3e4   : > { %v1265_v3 = vrot.slane %v1264_v13, 1 }
 0x3e6   : > { %v1266_v17 = vadd.f32 %v1265_v3, %v1264_v13 }
 0x3e8   : > { %v1267_v18 = vmul.f32 %v1266_v17, %v5117_v0 }
 0x3ea   : > { %v1277_v24 = vadd.f32 1e-05, %v1267_v18  ;;  %v1741_v18 = vperm.slane %v5131_v8, 5 }
 0x3ec   : > { %4363 = vrsqrt.f32 %v1277_v24  ;;  %vm1284_vm10 = vweird.f32 %v1277_v24 }
 0x3f2   : > { %v4364_v62 = vpop.eup %4363 }
 0x3f3   : > { %v1279_v25 = vmul.f32 %v4364_v62, %v1277_v24  ;;  %vm1285_vm9 = vweird.f32 %v4364_v62 }
 0x3f4   : > { %vm1286_vm11 = vmor %vm1284_vm10, %vm1285_vm9 }
 0x3f5   : > { %v1280_v30 = vmul.f32 %v4364_v62, %v1279_v25 }
 0x3f7   : > { %v1281_v7 = vmul.f32 0.5, %v1280_v30 }
 0x3f9   : > { %v1282_v26 = vsub.f32 1.5, %v1281_v7 }
 0x3fb   : > { %v1283_v29 = vmul.f32 %v4364_v62, %v1282_v26 }
 0x3fd   : > { %v1287_v27 = vsel %vm1286_vm11, %v4364_v62, %v1283_v29  ;;  %v1750_v62 = vperm.slane %v5101_v15, 0  ;;  %v1990_v15 = vld [vmem:[%s6406_s5 + $0x60] sm:$0x3f] }
 0x3fe   : > { %v1288_v32 = vmul.f32 %v1287_v27, %v1269_v63  ;;  %v1289_v60 = vmul.f32 %v1287_v27, %v1270_v51  ;;  %v1290_v5 = vmul.f32 %v1287_v27, %v1271_v28  ;;  %v1291_v48 = vmul.f32 %v1287_v27, %v1272_v37 }
 0x3ff   : > { %v1292_v45 = vmul.f32 %v1287_v27, %v1273_v54  ;;  %v1293_v56 = vmul.f32 %v1287_v27, %v1274_v38  ;;  %v1294_v61 = vmul.f32 %v1287_v27, %v1275_v6  ;;  %v1295_v10 = vmul.f32 %v1287_v27, %v1276_v43 }
 0x400   : > { %v1297_v41 = vadd.f32 %v1296_v53, %v1288_v32  ;;  %v1298_v44 = vadd.f32 %v1296_v53, %v1289_v60  ;;  %v1299_v21 = vadd.f32 %v1296_v53, %v1290_v5  ;;  %v1300_v39 = vadd.f32 %v1296_v53, %v1291_v48 }
 0x401   : > { %v1301_v42 = vadd.f32 %v1296_v53, %v1292_v45  ;;  %v1302_v12 = vadd.f32 %v1296_v53, %v1293_v56  ;;  %v1303_v11 = vadd.f32 %v1296_v53, %v1294_v61  ;;  %v1304_v13 = vadd.f32 %v1296_v53, %v1295_v10 }
 0x402   : > { %v5348_v9 = vadd.f32 %v1297_v41, %v5154_v16  ;;  %v5351_v46 = vadd.f32 %v1298_v44, %v5156_v4  ;;  %v5358_v2 = vadd.f32 %v1299_v21, %v5162_v22  ;;  %v5361_v16 = vadd.f32 %v1300_v39, %v5164_v23  ;;  %v1759_v23 = vld [vmem:[%s6406_s5 + $0x18] sm:$0xff] }
 0x403   : > { %v1767_v22 = vpack.c.bf16 %v1761_v50, %v1761_v50  ;;  %v1766_v40 = vpack.c.bf16 %v1760_v52, %v1759_v23  ;;  %v5380_v19 = vadd.f32 %v1301_v42, %v5170_v34  ;;  %v5383_v57 = vadd.f32 %v1302_v12, %v5172_v55 }
 0x404   : > { %v1319_v49 = vpack.c.bf16 %v5351_v46, %v5348_v9  ;;  %v1320_v4 = vpack.c.bf16 %v5361_v16, %v5358_v2  ;;  %v1725_v34 = vmul.f32 %v5202_v59, %v5348_v9  ;;  %v1726_v55 = vmul.f32 %v5202_v59, %v5351_v46 }
 0x405   : > { %v1781_v14 = vsel %vm1025_vm4, %v1767_v22, 0  ;;  %v1321_v1 = vpack.c.bf16 %v5383_v57, %v5380_v19  ;;  %v5396_v3 = vadd.f32 %v1303_v11, %v5178_v35  ;;  %v5399_v17 = vadd.f32 %v1304_v13, %v5180_v47 }
 0x406   : > { %4125 = vmatmul.msk.bf16.vlgmr.msra.gmra.mxu1 %vm894_vm3, %v1319_v49  ;;  %4129 = vmatmul.msk.bf16.vlgmr.msra.gmra.mxu3 %vm894_vm3, %v1319_v49  ;;  %4365 = vtanh.f32 %v1725_v34  ;;  %v1727_v47 = vmul.f32 %v5202_v59, %v5358_v2  ;;  %v1728_v30 = vmul.f32 %v5202_v59, %v5361_v16  ;;  %v1729_v53 = vmul.f32 %v5202_v59, %v5380_v19  ;;  %v4656_v34 = vld [vmem:[%s5037_s15] sm:$0xff] }
 0x407   : > { %1789 = vmatpush.bf16.msrb.mxu1 %v1781_v14  ;;  %4367 = vtanh.f32 %v1726_v55  ;;  %v1322_v58 = vpack.c.bf16 %v5399_v17, %v5396_v3  ;;  %v1730_v27 = vmul.f32 %v5202_v59, %v5383_v57  ;;  %v1731_v5 = vmul.f32 %v5202_v59, %v5396_v3  ;;  %v4657_v55 = vld [vmem:[%s5037_s15 + $0x8] sm:$0xff] }
 0x408   : > { %4369 = vtanh.f32 %v1727_v47  ;;  %v1732_v48 = vmul.f32 %v5202_v59, %v5399_v17 }
 0x409   : > { %4371 = vtanh.f32 %v1728_v30 }
 0x40a   : > { %4373 = vtanh.f32 %v1729_v53 }
 0x40b   : > { %1790 = vmatpush.bf16.msrb.mxu1 %v1766_v40  ;;  %4375 = vtanh.f32 %v1730_v27 }
 0x40c   : > { %v4366_v36 = vpop.eup %4365  ;;  %4377 = vtanh.f32 %v1731_v5 }
 0x40d   : > { %v4368_v24 = vpop.eup %4367  ;;  %v1742_v35 = vmul.f32 %v4366_v36, %v1741_v18  ;;  %4379 = vtanh.f32 %v1732_v48  ;;  %v4659_v36 = vld [vmem:[%s5037_s15 + $0x18] sm:$0xff] }
 0x40e   : > { %v1743_v25 = vmul.f32 %v4368_v24, %v1741_v18  ;;  %v4370_v29 = vpop.eup %4369 }
 0x40f   : > { %v1751_v7 = vadd.f32 %v1750_v62, %v1742_v35  ;;  %v4372_v8 = vpop.eup %4371  ;;  %v1744_v63 = vmul.f32 %v4370_v29, %v1741_v18 }
 0x410   : > { %v1752_v20 = vadd.f32 %v1750_v62, %v1743_v25  ;;  %v1745_v51 = vmul.f32 %v4372_v8, %v1741_v18  ;;  %v4374_v44 = vpop.eup %4373 }
 0x411   : > { %v1753_v32 = vadd.f32 %v1750_v62, %v1744_v63  ;;  %v4376_v49 = vpop.eup %4375  ;;  %v1746_v28 = vmul.f32 %v4374_v44, %v1741_v18 }
 0x412   : > { %v1762_v26 = vpack.c.bf16 %v1752_v20, %v1751_v7  ;;  %v1754_v60 = vadd.f32 %v1750_v62, %v1745_v51  ;;  %v1747_v37 = vmul.f32 %v4376_v49, %v1741_v18  ;;  %v4378_v54 = vpop.eup %4377 }
 0x413   : > { %v1755_v21 = vadd.f32 %v1750_v62, %v1746_v28  ;;  %v4380_v38 = vpop.eup %4379  ;;  %v1748_v50 = vmul.f32 %v4378_v54, %v1741_v18 }
 0x414   : > { %v1763_v41 = vpack.c.bf16 %v1754_v60, %v1753_v32  ;;  %v1756_v39 = vadd.f32 %v1750_v62, %v1747_v37  ;;  %v1749_v22 = vmul.f32 %v4380_v38, %v1741_v18 }
 0x415   : > { %v1757_v23 = vadd.f32 %v1750_v62, %v1748_v50 }
 0x416   : > { %4126 = vmatmul.msk.bf16.gmra.mxu1 %vm894_vm3, %v1320_v4  ;;  %4130 = vmatmul.msk.bf16.gmra.mxu3 %vm894_vm3, %v1320_v4  ;;  %v1764_v4 = vpack.c.bf16 %v1756_v39, %v1755_v21  ;;  %v1758_v52 = vadd.f32 %v1750_v62, %v1749_v22 }
 0x418   : > { %v1765_v45 = vpack.c.bf16 %v1758_v52, %v1757_v23 }
 0x426   : > { %4127 = vmatmul.msk.bf16.gmra.mxu1 %vm894_vm3, %v1321_v1  ;;  %4131 = vmatmul.msk.bf16.gmra.mxu3 %vm894_vm3, %v1321_v1 }
 0x436   : > { %4128 = vmatmul.msk.bf16.gmra.mxu1 %vm894_vm3, %v1322_v58  ;;  %4132 = vmatmul.msk.bf16.gmra.mxu3 %vm894_vm3, %v1322_v58  ;;  %v4658_v58 = vld [vmem:[%s5037_s15 + $0x10] sm:$0xff] }
 0x446   : > { %4141 = vmatmul.msk.bf16.vlgmr.msrb.gmra.mxu1 %vm894_vm3, %v1762_v26  ;;  %v5432_v26 = vperm.slane %v5343_v31, 2 }
 0x456   : > { %4142 = vmatmul.msk.bf16.gmra.mxu1 %vm894_vm3, %v1763_v41 }
 0x466   : > { %4143 = vmatmul.msk.bf16.gmra.mxu1 %vm894_vm3, %v1764_v4 }
 0x476   : > { %4144 = vmatmul.msk.bf16.gmra.mxu1 %vm894_vm3, %v1765_v45 }
 0x483   : > { %v1349_v56 = vpop.f32.mrf.mxu1 }
 0x489   : > { %v1387_v18 = vpop.f32.mrf.mxu3 }
 0x48b   : > { %v1351_v14 = vpop.f32.mrf.mxu1 }
 0x48c   : > { %v1369_v13 = vpack.c.bf16 %v1351_v14, %v1349_v56 }
 0x491   : > { %v1389_v24 = vpop.f32.mrf.mxu3 }
 0x493   : > { %v1354_v40 = vpop.f32.mrf.mxu1 }
 0x499   : > { %v1392_v35 = vpop.f32.mrf.mxu3 }
 0x49b   : > { %v1356_v42 = vpop.f32.mrf.mxu1 }
 0x49c   : > { %v1370_v11 = vpack.c.bf16 %v1356_v42, %v1354_v40 }
 0x4a1   : > { %v1394_v47 = vpop.f32.mrf.mxu3 }
 0x4a3   : > { %v1359_v12 = vpop.f32.mrf.mxu1 }
 0x4a9   : > { %v1397_v63 = vpop.f32.mrf.mxu3 }
 0x4ab   : > { %v1361_v1 = vpop.f32.mrf.mxu1 }
 0x4ac   : > { %v1371_v10 = vpack.c.bf16 %v1361_v1, %v1359_v12 }
 0x4b1   : > { %v1399_v39 = vpop.f32.mrf.mxu3 }
 0x4b3   : > { %v1364_v6 = vpop.f32.mrf.mxu1 }
 0x4bb   : > { %v1366_v43 = vpop.f32.mrf.mxu1 }
 0x4bc   : > { %v1372_v61 = vpack.c.bf16 %v1366_v43, %v1364_v6 }
 0x4be   : > { %1411 = vmatpush.bf16.msrb.mxu2 %v1372_v61 }
 0x4c2   : > { %1412 = vmatpush.bf16.msrb.mxu2 %v1371_v10  ;;  %v1402_v10 = vpop.f32.mrf.mxu3 }
 0x4c6   : > { %1413 = vmatpush.bf16.msrb.mxu2 %v1370_v11 }
 0x4ca   : > { %1414 = vmatpush.bf16.msrb.mxu2 %v1369_v13 }
 0x4cd   : > { %4133 = vmatmul.msk.bf16.vlgmr.msrb.gmra.mxu2 %vm771_vm2, %v4656_v34 }
 0x4dd   : > { %4134 = vmatmul.msk.bf16.gmra.mxu2 %vm771_vm2, %v4657_v55 }
 0x4ed   : > { %4135 = vmatmul.msk.bf16.gmra.mxu2 %vm771_vm2, %v4658_v58 }
 0x4fd   : > { %4136 = vmatmul.msk.bf16.gmra.mxu2 %vm771_vm2, %v4659_v36 }
 0x550   : > { %v1416_v62 = vpop.f32.mrf.mxu2 }
 0x551   : > { %v1417_v20 = vadd.f32 %v1416_v62, %v1387_v18 }
 0x553   : > { %v5438_v27 = vadd.f32 %v5432_v26, %v1417_v20 }
 0x555   : > { %v1453_v44 = vmul.f32 0.044715, %v5438_v27 }
 0x557   : > { %v1461_v4 = vmul.f32 %v1453_v44, %v5438_v27 }
 0x558   : > { %v1418_v25 = vpop.f32.mrf.mxu2 }
 0x559   : > { %v1419_v7 = vadd.f32 %v1418_v25, %v1389_v24  ;;  %v1469_v23 = vmul.f32 %v1461_v4, %v5438_v27 }
 0x55b   : > { %v5435_v51 = vadd.f32 %v5432_v26, %v1419_v7  ;;  %v1477_v1 = vadd.f32 %v1469_v23, %v5438_v27 }
 0x55d   : > { %v1454_v60 = vmul.f32 0.044715, %v5435_v51  ;;  %v1485_v55 = vmul.f32 0.7978846, %v1477_v1 }
 0x55f   : > { %v1462_v5 = vmul.f32 %v1454_v60, %v5435_v51 }
 0x560   : > { %v1421_v30 = vpop.f32.mrf.mxu2 }
 0x561   : > { %v1422_v8 = vadd.f32 %v1421_v30, %v1392_v35  ;;  %v1470_v50 = vmul.f32 %v1462_v5, %v5435_v51 }
 0x563   : > { %v5441_v32 = vadd.f32 %v5432_v26, %v1422_v8  ;;  %v1478_v40 = vadd.f32 %v1470_v50, %v5435_v51  ;;  %v1404_v8 = vpop.f32.mrf.mxu3  ;;  %v1446_v50 = vmul.f32 0.5, %v5435_v51 }
 0x565   : > { %v1455_v28 = vmul.f32 0.044715, %v5441_v32  ;;  %v1486_v11 = vmul.f32 0.7978846, %v1478_v40 }
 0x567   : > { %v1463_v54 = vmul.f32 %v1455_v28, %v5441_v32  ;;  %4381 = vtanh.f32 %v1486_v11 }
 0x568   : > { %v1423_v29 = vpop.f32.mrf.mxu2  ;;  %4383 = vtanh.f32 %v1485_v55 }
 0x569   : > { %v1424_v53 = vadd.f32 %v1423_v29, %v1394_v47  ;;  %v1471_v45 = vmul.f32 %v1463_v54, %v5441_v32 }
 0x56b   : > { %v5445_v41 = vadd.f32 %v5432_v26, %v1424_v53  ;;  %v1479_v6 = vadd.f32 %v1471_v45, %v5441_v32 }
 0x56d   : > { %v1456_v48 = vmul.f32 0.044715, %v5445_v41  ;;  %v1487_v36 = vmul.f32 0.7978846, %v1479_v6  ;;  %v4382_v53 = vpop.eup %4381 }
 0x56f   : > { %v1464_v22 = vmul.f32 %v1456_v48, %v5445_v41  ;;  %4385 = vtanh.f32 %v1487_v36  ;;  %v1502_v48 = vadd.f32 1.0, %v4382_v53 }
 0x570   : > { %v1426_v49 = vpop.f32.mrf.mxu2 }
 0x571   : > { %v1427_v37 = vadd.f32 %v1426_v49, %v1397_v63  ;;  %v1472_v42 = vmul.f32 %v1464_v22, %v5445_v41  ;;  %v4384_v49 = vpop.eup %4383 }
 0x572   : > { %v1501_v4 = vadd.f32 1.0, %v4384_v49 }
 0x573   : > { %v5452_v21 = vadd.f32 %v5432_v26, %v1427_v37  ;;  %v1480_v13 = vadd.f32 %v1472_v42, %v5445_v41 }
 0x575   : > { %v1457_v38 = vmul.f32 0.044715, %v5452_v21  ;;  %v1488_v35 = vmul.f32 0.7978846, %v1480_v13  ;;  %v4386_v28 = vpop.eup %4385  ;;  %v1449_v13 = vmul.f32 0.5, %v5452_v21 }
 0x576   : > { %v1503_v22 = vadd.f32 1.0, %v4386_v28 }
 0x577   : > { %v1465_v56 = vmul.f32 %v1457_v38, %v5452_v21  ;;  %4387 = vtanh.f32 %v1488_v35 }
 0x578   : > { %v1428_v52 = vpop.f32.mrf.mxu2 }
 0x579   : > { %v1429_v14 = vadd.f32 %v1428_v52, %v1399_v39  ;;  %v1473_v43 = vmul.f32 %v1465_v56, %v5452_v21  ;;  %v1445_v52 = vmul.f32 0.5, %v5438_v27  ;;  %v1510_v56 = vmul.f32 %v1502_v48, %v1446_v50 }
 0x57b   : > { %v5465_v12 = vadd.f32 %v5432_v26, %v1429_v14  ;;  %v1481_v18 = vadd.f32 %v1473_v43, %v5452_v21  ;;  %v1447_v14 = vmul.f32 0.5, %v5441_v32  ;;  %v1509_v1 = vmul.f32 %v1501_v4, %v1445_v52 }
 0x57c   : > { %v1448_v43 = vmul.f32 0.5, %v5445_v41  ;;  %v1518_v51 = vsel %vm894_vm3, %v1510_v56, 0.0 }
 0x57d   : > { %v1458_v61 = vmul.f32 0.044715, %v5465_v12  ;;  %v1489_v30 = vmul.f32 0.7978846, %v1481_v18  ;;  %v4388_v39 = vpop.eup %4387  ;;  %v1511_v6 = vmul.f32 %v1503_v22, %v1447_v14  ;;  %v1517_v55 = vsel %vm894_vm3, %v1509_v1, 0.0 }
 0x57e   : > { %v1504_v40 = vadd.f32 1.0, %v4388_v39  ;;  %v1450_v18 = vmul.f32 0.5, %v5465_v12 }
 0x57f   : > { %v1466_v34 = vmul.f32 %v1458_v61, %v5465_v12  ;;  %4389 = vtanh.f32 %v1489_v30  ;;  %v1520_v32 = vsel %vm894_vm3, %v1511_v6, 0.0 }
 0x580   : > { %v1431_v58 = vpop.f32.mrf.mxu2  ;;  %v1512_v11 = vmul.f32 %v1504_v40, %v1448_v43 }
 0x581   : > { %v1474_v24 = vmul.f32 %v1466_v34, %v5465_v12  ;;  %v1432_v62 = vadd.f32 %v1431_v58, %v1402_v10 }
 0x582   : > { %v1522_v41 = vsel %vm894_vm3, %v1512_v11, 0.0 }
 0x583   : > { %v1482_v25 = vadd.f32 %v1474_v24, %v5465_v12  ;;  %v1443_v47 = vadd.f32 %v5432_v26, %v1432_v62  ;;  %v1519_v62 = vadd.f32 %v1518_v51, %v1517_v55 }
 0x585   : > { %v1459_v7 = vmul.f32 0.044715, %v1443_v47  ;;  %v1490_v20 = vmul.f32 0.7978846, %v1482_v25  ;;  %v4390_v23 = vpop.eup %4389  ;;  %v1451_v25 = vmul.f32 0.5, %v1443_v47  ;;  %v1521_v30 = vadd.f32 %v1520_v32, %v1519_v62 }
 0x586   : > { %v1505_v61 = vadd.f32 1.0, %v4390_v23  ;;  %v5496_v23 = vld [vmem:[%s6405_s4 + $0x288] sm:$0xff] }
 0x587   : > { %v1467_v29 = vmul.f32 %v1459_v7, %v1443_v47  ;;  %4391 = vtanh.f32 %v1490_v20  ;;  %v1523_v20 = vadd.f32 %v1522_v41, %v1521_v30 }
 0x588   : > { %v1433_v63 = vpop.f32.mrf.mxu2  ;;  %v1513_v36 = vmul.f32 %v1505_v61, %v1449_v13 }
 0x589   : > { %v1475_v60 = vmul.f32 %v1467_v29, %v1443_v47  ;;  %v1434_v44 = vadd.f32 %v1433_v63, %v1404_v8 }
 0x58a   : > { %v1524_v21 = vsel %vm894_vm3, %v1513_v36, 0.0 }
 0x58b   : > { %v1483_v37 = vadd.f32 %v1475_v60, %v1443_v47  ;;  %v1444_v5 = vadd.f32 %v5432_v26, %v1434_v44  ;;  %v1525_v63 = vadd.f32 %v1524_v21, %v1523_v20 }
 0x58d   : > { %v1491_v54 = vmul.f32 0.7978846, %v1483_v37  ;;  %v1460_v38 = vmul.f32 0.044715, %v1444_v5  ;;  %v4392_v42 = vpop.eup %4391  ;;  %v1452_v60 = vmul.f32 0.5, %v1444_v5 }
 0x58e   : > { %v1506_v27 = vadd.f32 1.0, %v4392_v42 }
 0x58f   : > { %4393 = vtanh.f32 %v1491_v54  ;;  %v1468_v45 = vmul.f32 %v1460_v38, %v1444_v5 }
 0x590   : > { %v1514_v35 = vmul.f32 %v1506_v27, %v1450_v18 }
 0x591   : > { %v1476_v26 = vmul.f32 %v1468_v45, %v1444_v5 }
 0x592   : > { %v1526_v29 = vsel %vm894_vm3, %v1514_v35, 0.0 }
 0x593   : > { %v1484_v10 = vadd.f32 %v1476_v26, %v1444_v5  ;;  %v1527_v44 = vadd.f32 %v1526_v29, %v1525_v63 }
 0x595   : > { %v4394_v34 = vpop.eup %4393  ;;  %v1492_v58 = vmul.f32 0.7978846, %v1484_v10 }
 0x596   : > { %v1507_v24 = vadd.f32 1.0, %v4394_v34 }
 0x597   : > { %4395 = vtanh.f32 %v1492_v58 }
 0x598   : > { %v1515_v7 = vmul.f32 %v1507_v24, %v1451_v25 }
 0x59a   : > { %v1528_v53 = vsel %vm894_vm3, %v1515_v7, 0.0 }
 0x59b   : > { %v1529_v28 = vadd.f32 %v1528_v53, %v1527_v44  ;;  %v1856_v53 = vld [vmem:[%s6406_s5 + $0x40] sm:$0xf]  ;;  %v1855_v44 = vld [vmem:[%s6406_s5 + $0x38] sm:$0xff] }
 0x59d   : > { %v4396_v8 = vpop.eup %4395 }
 0x59e   : > { %v1508_v12 = vadd.f32 1.0, %v4396_v8 }
 0x5a0   : > { %v1516_v49 = vmul.f32 %v1508_v12, %v1452_v60  ;;  %v1862_v60 = vpack.c.bf16 %v1856_v53, %v1856_v53  ;;  %v1854_v12 = vld [vmem:[%s6406_s5 + $0x30] sm:$0xff] }
 0x5a2   : > { %v1530_v37 = vsel %vm894_vm3, %v1516_v49, 0.0 }
 0x5a3   : > { %v1531_v48 = vadd.f32 %v1530_v37, %v1529_v28  ;;  %v1876_v28 = vsel %vm1025_vm4, %v1862_v60, 0 }
 0x5a4   : > { %1884 = vmatpush.bf16.msrb.mxu3 %v1876_v28 }
 0x5a5   : > { %v1532_v47 = vrot.slane %v1531_v48, 4 }
 0x5a7   : > { %v1533_v39 = vadd.f32 %v1532_v47, %v1531_v48  ;;  %v1861_v48 = vpack.c.bf16 %v1855_v44, %v1854_v12 }
 0x5a9   : > { %v1534_v4 = vrot.slane %v1533_v39, 2  ;;  %1885 = vmatpush.bf16.msrb.mxu3 %v1861_v48 }
 0x5ab   : > { %v1535_v54 = vadd.f32 %v1534_v4, %v1533_v39 }
 0x5ad   : > { %v1536_v38 = vrot.slane %v1535_v54, 1 }
 0x5af   : > { %v1537_v50 = vadd.f32 %v1536_v38, %v1535_v54 }
 0x5b1   : > { %v1538_v22 = vmul.f32 %v1537_v50, %v5117_v0 }
 0x5b3   : > { %v1539_v5 = vmul.f32 %v5496_v23, %v1538_v22 }
 0x5b5   : > { %v1540_v52 = vperm.slane %v1539_v5, 3  ;;  %v1579_v5 = vperm.slane %v5343_v31, 5 }
 0x5b7   : > { %v1541_v45 = vsub.f32 %v1509_v1, %v1540_v52  ;;  %v1542_v14 = vsub.f32 %v1510_v56, %v1540_v52  ;;  %v1543_v40 = vsub.f32 %v1511_v6, %v1540_v52  ;;  %v1544_v42 = vsub.f32 %v1512_v11, %v1540_v52 }
 0x5b8   : > { %v1545_v26 = vsub.f32 %v1513_v36, %v1540_v52  ;;  %v1546_v51 = vsub.f32 %v1514_v35, %v1540_v52  ;;  %v1547_v58 = vsub.f32 %v1515_v7, %v1540_v52  ;;  %v1548_v1 = vsub.f32 %v1516_v49, %v1540_v52 }
 0x5b9   : > { %v1549_v43 = vmul.f32 %v1541_v45, %v1541_v45  ;;  %v1550_v61 = vmul.f32 %v1542_v14, %v1542_v14  ;;  %v1551_v10 = vmul.f32 %v1543_v40, %v1543_v40  ;;  %v1552_v13 = vmul.f32 %v1544_v42, %v1544_v42 }
 0x5ba   : > { %v1553_v32 = vmul.f32 %v1545_v26, %v1545_v26  ;;  %v1554_v56 = vmul.f32 %v1546_v51, %v1546_v51  ;;  %v1555_v36 = vmul.f32 %v1547_v58, %v1547_v58  ;;  %v1556_v35 = vmul.f32 %v1548_v1, %v1548_v1 }
 0x5bb   : > { %v1557_v27 = vsel %vm894_vm3, %v1549_v43, 0.0  ;;  %v1558_v34 = vsel %vm894_vm3, %v1550_v61, 0.0  ;;  %v1560_v18 = vsel %vm894_vm3, %v1551_v10, 0.0  ;;  %v1562_v6 = vsel %vm894_vm3, %v1552_v13, 0.0 }
 0x5bc   : > { %v1559_v55 = vadd.f32 %v1558_v34, %v1557_v27  ;;  %v1564_v62 = vsel %vm894_vm3, %v1553_v32, 0.0  ;;  %v1566_v25 = vsel %vm894_vm3, %v1554_v56, 0.0  ;;  %v1568_v21 = vsel %vm894_vm3, %v1555_v36, 0.0 }
 0x5bd   : > { %v1570_v20 = vsel %vm894_vm3, %v1556_v35, 0.0  ;;  %v1607_v61 = vperm.slane %v5496_v23, 0  ;;  %v1587_v10 = vmul.f32 %v1579_v5, %v1548_v1  ;;  %v1580_v27 = vmul.f32 %v1579_v5, %v1541_v45 }
 0x5be   : > { %v1561_v24 = vadd.f32 %v1560_v18, %v1559_v55  ;;  %v1581_v34 = vmul.f32 %v1579_v5, %v1542_v14  ;;  %v1582_v55 = vmul.f32 %v1579_v5, %v1543_v40  ;;  %v1584_v18 = vmul.f32 %v1579_v5, %v1545_v26 }
 0x5bf   : > { %v1586_v56 = vmul.f32 %v1579_v5, %v1547_v58 }
 0x5c0   : > { %v1563_v11 = vadd.f32 %v1562_v6, %v1561_v24  ;;  %v1585_v24 = vmul.f32 %v1579_v5, %v1546_v51 }
 0x5c2   : > { %v1565_v41 = vadd.f32 %v1564_v62, %v1563_v11 }
 0x5c4   : > { %v1567_v30 = vadd.f32 %v1566_v25, %v1565_v41 }
 0x5c6   : > { %v1569_v7 = vadd.f32 %v1568_v21, %v1567_v30 }
 0x5c8   : > { %v1571_v29 = vadd.f32 %v1570_v20, %v1569_v7 }
 0x5ca   : > { %v1572_v8 = vrot.slane %v1571_v29, 4 }
 0x5cc   : > { %v1573_v63 = vadd.f32 %v1572_v8, %v1571_v29 }
 0x5ce   : > { %v1574_v49 = vrot.slane %v1573_v63, 2 }
 0x5d0   : > { %v1575_v37 = vadd.f32 %v1574_v49, %v1573_v63 }
 0x5d2   : > { %v1576_v47 = vrot.slane %v1575_v37, 1 }
 0x5d4   : > { %v1577_v39 = vadd.f32 %v1576_v47, %v1575_v37 }
 0x5d6   : > { %v1578_v4 = vmul.f32 %v1577_v39, %v5117_v0  ;;  %v1583_v0 = vmul.f32 %v1579_v5, %v1544_v42 }
 0x5d8   : > { %v1588_v54 = vadd.f32 1e-05, %v1578_v4 }
 0x5da   : > { %4397 = vrsqrt.f32 %v1588_v54  ;;  %vm1595_vm13 = vweird.f32 %v1588_v54 }
 0x5e0   : > { %v4398_v38 = vpop.eup %4397 }
 0x5e1   : > { %v1590_v50 = vmul.f32 %v4398_v38, %v1588_v54  ;;  %vm1596_vm12 = vweird.f32 %v4398_v38 }
 0x5e2   : > { %vm1597_vm14 = vmor %vm1595_vm13, %vm1596_vm12 }
 0x5e3   : > { %v1591_v22 = vmul.f32 %v4398_v38, %v1590_v50 }
 0x5e5   : > { %v1592_v52 = vmul.f32 0.5, %v1591_v22 }
 0x5e7   : > { %v1593_v43 = vsub.f32 1.5, %v1592_v52 }
 0x5e9   : > { %v1594_v13 = vmul.f32 %v4398_v38, %v1593_v43 }
 0x5eb   : > { %v1598_v32 = vsel %vm1597_vm14, %v4398_v38, %v1594_v13 }
 0x5ec   : > { %v1606_v6 = vmul.f32 %v1598_v32, %v1587_v10  ;;  %v1599_v11 = vmul.f32 %v1598_v32, %v1580_v27  ;;  %v1600_v31 = vmul.f32 %v1598_v32, %v1581_v34  ;;  %v1601_v36 = vmul.f32 %v1598_v32, %v1582_v55 }
 0x5ed   : > { %v1602_v62 = vmul.f32 %v1598_v32, %v1583_v0  ;;  %v1603_v41 = vmul.f32 %v1598_v32, %v1584_v18  ;;  %v1604_v35 = vmul.f32 %v1598_v32, %v1585_v24  ;;  %v1605_v25 = vmul.f32 %v1598_v32, %v1586_v56 }
 0x5ee   : > { %v1608_v1 = vadd.f32 %v1607_v61, %v1599_v11  ;;  %v1609_v30 = vadd.f32 %v1607_v61, %v1600_v31  ;;  %v1610_v21 = vadd.f32 %v1607_v61, %v1601_v36  ;;  %v1615_v7 = vadd.f32 %v1607_v61, %v1606_v6  ;;  %v1696_v11 = vpop.f32.mrf.mxu0  ;;  %v1792_v31 = vpop.f32.mrf.mxu1  ;;  %v5549_v36 = vld [vmem:[%s6406_s5 + $0x68] sm:$0x3] }
 0x5ef   : > { %v1611_v45 = vadd.f32 %v1607_v61, %v1602_v62  ;;  %v1612_v14 = vadd.f32 %v1607_v61, %v1603_v41  ;;  %v1613_v40 = vadd.f32 %v1607_v61, %v1604_v35  ;;  %v1614_v42 = vadd.f32 %v1607_v61, %v1605_v25 }
 0x5f0   : > { %v1616_v26 = vadd.f32 %v1608_v1, %v5348_v9  ;;  %v1617_v51 = vadd.f32 %v1609_v30, %v5351_v46  ;;  %v1618_v58 = vadd.f32 %v1610_v21, %v5358_v2  ;;  %v1623_v46 = vadd.f32 %v1615_v7, %v5399_v17  ;;  %v1989_v1 = vld [vmem:[%s6406_s5 + $0x58] sm:$0xff]  ;;  %v1987_v21 = vld [vmem:[%s6406_s5 + $0x48] sm:$0xff]  ;;  %v1988_v7 = vld [vmem:[%s6406_s5 + $0x50] sm:$0xff] }
 0x5f1   : > { %v1619_v20 = vadd.f32 %v1611_v45, %v5361_v16  ;;  %v1620_v29 = vadd.f32 %v1612_v14, %v5380_v19  ;;  %v1621_v8 = vadd.f32 %v1613_v40, %v5383_v57  ;;  %v1622_v12 = vadd.f32 %v1614_v42, %v5396_v3  ;;  %v4661_v3 = vld [vmem:[%s6405_s4 + $0x290] sm:$0x7] }
 0x5f2   : > { %v1820_v63 = vmul.f32 %v5202_v59, %v1616_v26  ;;  %v1821_v53 = vmul.f32 %v5202_v59, %v1617_v51  ;;  %v1822_v60 = vmul.f32 %v5202_v59, %v1618_v58  ;;  %v1836_v57 = vperm.slane %v5496_v23, 6 }
 0x5f3   : > { %v1823_v9 = vmul.f32 %v5202_v59, %v1619_v20  ;;  %v1824_v2 = vmul.f32 %v5202_v59, %v1620_v29  ;;  %v1825_v16 = vmul.f32 %v5202_v59, %v1621_v8  ;;  %v1826_v19 = vmul.f32 %v5202_v59, %v1622_v12 }
 0x5f4   : > { %4399 = vtanh.f32 %v1820_v63  ;;  %v1827_v44 = vmul.f32 %v5202_v59, %v1623_v46  ;;  %v1845_v17 = vperm.slane %v4661_v3, 1  ;;  %v5552_v35 = vperm.slane %v5549_v36, 0 }
 0x5f5   : > { %4401 = vtanh.f32 %v1821_v53  ;;  %v1996_v33 = vpack.c.bf16 %v1990_v15, %v1989_v1  ;;  %v1995_v26 = vpack.c.bf16 %v1988_v7, %v1987_v21 }
 0x5f6   : > { %4403 = vtanh.f32 %v1822_v60  ;;  %v1698_v62 = vpop.f32.mrf.mxu0  ;;  %v1794_v41 = vpop.f32.mrf.mxu1  ;;  %v1717_v25 = vadd.f32 %v5552_v35, %v1696_v11 }
 0x5f7   : > { %4405 = vtanh.f32 %v1823_v9  ;;  %v2013_v40 = vsel %vm2011_vm15, %v1996_v33, 0  ;;  %v1718_v20 = vadd.f32 %v5552_v35, %v1698_v62 }
 0x5f8   : > { %4407 = vtanh.f32 %v1824_v2  ;;  %v1812_v30 = vadd.f32 %v1792_v31, %v1717_v25  ;;  %2021 = vmatpush.bf16.msra.mxu2 %v2013_v40 }
 0x5f9   : > { %4409 = vtanh.f32 %v1825_v16  ;;  %v1813_v8 = vadd.f32 %v1794_v41, %v1718_v20 }
 0x5fa   : > { %v4400_v49 = vpop.eup %4399  ;;  %4411 = vtanh.f32 %v1826_v19 }
 0x5fb   : > { %v4402_v28 = vpop.eup %4401  ;;  %v1837_v37 = vmul.f32 %v4400_v49, %v1836_v57  ;;  %4413 = vtanh.f32 %v1827_v44 }
 0x5fc   : > { %v4404_v48 = vpop.eup %4403  ;;  %v1838_v47 = vmul.f32 %v4402_v28, %v1836_v57  ;;  %2022 = vmatpush.bf16.msra.mxu2 %v1995_v26 }
 0x5fd   : > { %v4406_v39 = vpop.eup %4405  ;;  %v1846_v4 = vadd.f32 %v1845_v17, %v1837_v37  ;;  %v1839_v23 = vmul.f32 %v4404_v48, %v1836_v57 }
 0x5fe   : > { %v4408_v54 = vpop.eup %4407  ;;  %v1847_v38 = vadd.f32 %v1845_v17, %v1838_v47  ;;  %v1840_v59 = vmul.f32 %v4406_v39, %v1836_v57  ;;  %v1701_v45 = vpop.f32.mrf.mxu0 }
 0x5ff   : > { %v4410_v50 = vpop.eup %4409  ;;  %v1848_v22 = vadd.f32 %v1845_v17, %v1839_v23  ;;  %v1841_v5 = vmul.f32 %v4408_v54, %v1836_v57  ;;  %v1797_v51 = vpop.f32.mrf.mxu1  ;;  %v1719_v16 = vadd.f32 %v5552_v35, %v1701_v45 }
 0x600   : > { %v4412_v52 = vpop.eup %4411  ;;  %v1857_v43 = vpack.c.bf16 %v1847_v38, %v1846_v4  ;;  %v1849_v61 = vadd.f32 %v1845_v17, %v1840_v59  ;;  %v1842_v10 = vmul.f32 %v4410_v50, %v1836_v57 }
 0x601   : > { %v4414_v13 = vpop.eup %4413  ;;  %v1850_v27 = vadd.f32 %v1845_v17, %v1841_v5  ;;  %v1843_v34 = vmul.f32 %v4412_v52, %v1836_v57  ;;  %v1814_v44 = vadd.f32 %v1797_v51, %v1719_v16 }
 0x602   : > { %4145 = vmatmul.msk.bf16.vlgmr.msrb.gmra.mxu3 %vm894_vm3, %v1857_v43  ;;  %v1858_v55 = vpack.c.bf16 %v1849_v61, %v1848_v22  ;;  %v1851_v0 = vadd.f32 %v1845_v17, %v1842_v10  ;;  %v1844_v32 = vmul.f32 %v4414_v13, %v1836_v57 }
 0x603   : > { %v1852_v18 = vadd.f32 %v1845_v17, %v1843_v34 }
 0x604   : > { %v1859_v24 = vpack.c.bf16 %v1851_v0, %v1850_v27  ;;  %v1853_v56 = vadd.f32 %v1845_v17, %v1844_v32 }
 0x606   : > { %v1860_v6 = vpack.c.bf16 %v1853_v56, %v1852_v18  ;;  %v1703_v9 = vpop.f32.mrf.mxu0 }
 0x607   : > { %v1799_v2 = vpop.f32.mrf.mxu1  ;;  %v1720_v39 = vadd.f32 %v5552_v35, %v1703_v9 }
 0x609   : > { %v1815_v38 = vadd.f32 %v1799_v2, %v1720_v39 }
 0x60e   : > { %v1706_v47 = vpop.f32.mrf.mxu0 }
 0x60f   : > { %v1802_v23 = vpop.f32.mrf.mxu1  ;;  %v1721_v34 = vadd.f32 %v5552_v35, %v1706_v47 }
 0x611   : > { %v1816_v56 = vadd.f32 %v1802_v23, %v1721_v34 }
 0x612   : > { %4146 = vmatmul.msk.bf16.gmra.mxu3 %vm894_vm3, %v1858_v55 }
 0x616   : > { %v1708_v32 = vpop.f32.mrf.mxu0 }
 0x617   : > { %v1804_v11 = vpop.f32.mrf.mxu1  ;;  %v1722_v33 = vadd.f32 %v5552_v35, %v1708_v32 }
 0x619   : > { %v1817_v7 = vadd.f32 %v1804_v11, %v1722_v33  ;;  %v2124_v33 = vld [vmem:[%s6407_s6 + $0x40] sm:$0xff] }
 0x61f   : > { %v1807_v51 = vpop.f32.mrf.mxu1 }
 0x622   : > { %4147 = vmatmul.msk.bf16.gmra.mxu3 %vm894_vm3, %v1859_v24 }
 0x632   : > { %4148 = vmatmul.msk.bf16.gmra.mxu3 %vm894_vm3, %v1860_v6  ;;  %vm1998_vm3 = vcmask 244736  }
 0x685   : > { %v1887_v14 = vpop.f32.mrf.mxu3 }
 0x686   : > { %v1907_v42 = vadd.f32 %v1887_v14, %v1812_v30  ;;  %v1711_v14 = vpop.f32.mrf.mxu0 }
 0x688   : > { %v1923_v58 = vmul.f32 0.044715, %v1907_v42  ;;  %v1915_v10 = vmul.f32 0.5, %v1907_v42 }
 0x68a   : > { %v1931_v29 = vmul.f32 %v1923_v58, %v1907_v42 }
 0x68c   : > { %v1939_v63 = vmul.f32 %v1931_v29, %v1907_v42 }
 0x68d   : > { %v1889_v53 = vpop.f32.mrf.mxu3 }
 0x68e   : > { %v1947_v60 = vadd.f32 %v1939_v63, %v1907_v42  ;;  %v1908_v12 = vadd.f32 %v1889_v53, %v1813_v8 }
 0x690   : > { %v1924_v46 = vmul.f32 0.044715, %v1908_v12  ;;  %v1955_v19 = vmul.f32 0.7978846, %v1947_v60  ;;  %v1916_v13 = vmul.f32 0.5, %v1908_v12  ;;  %v1723_v60 = vadd.f32 %v5552_v35, %v1711_v14 }
 0x691   : > { %v2126_v14 = vld [vmem:[%s6407_s6 + $0x50] sm:$0x3f] }
 0x692   : > { %v1932_v57 = vmul.f32 %v1924_v46, %v1908_v12  ;;  %4415 = vtanh.f32 %v1955_v19  ;;  %v1818_v16 = vadd.f32 %v1807_v51, %v1723_v60  ;;  %v2119_v51 = vld [vmem:[%s6407_s6 + $0x18] sm:$0xff] }
 0x694   : > { %v1940_v3 = vmul.f32 %v1932_v57, %v1908_v12 }
 0x695   : > { %v1892_v17 = vpop.f32.mrf.mxu3 }
 0x696   : > { %v1948_v49 = vadd.f32 %v1940_v3, %v1908_v12  ;;  %v1909_v28 = vadd.f32 %v1892_v17, %v1814_v44 }
 0x698   : > { %v1956_v37 = vmul.f32 0.7978846, %v1948_v49  ;;  %v1925_v48 = vmul.f32 0.044715, %v1909_v28  ;;  %v4416_v54 = vpop.eup %4415  ;;  %v1917_v8 = vmul.f32 0.5, %v1909_v28  ;;  %v1713_v49 = vpop.f32.mrf.mxu0 }
 0x699   : > { %v1971_v52 = vadd.f32 1.0, %v4416_v54  ;;  %v1724_v47 = vadd.f32 %v5552_v35, %v1713_v49 }
 0x69a   : > { %4417 = vtanh.f32 %v1956_v37  ;;  %v1933_v4 = vmul.f32 %v1925_v48, %v1909_v28  ;;  %v1809_v48 = vpop.f32.mrf.mxu1 }
 0x69b   : > { %v1979_v18 = vmul.f32 %v1971_v52, %v1915_v10  ;;  %v1819_v23 = vadd.f32 %v1809_v48, %v1724_v47 }
 0x69c   : > { %v1941_v59 = vmul.f32 %v1933_v4, %v1909_v28 }
 0x69d   : > { %v1894_v50 = vpop.f32.mrf.mxu3 }
 0x69e   : > { %v1949_v22 = vadd.f32 %v1941_v59, %v1909_v28  ;;  %v1910_v5 = vadd.f32 %v1894_v50, %v1815_v38 }
 0x6a0   : > { %v4418_v43 = vpop.eup %4417  ;;  %v1926_v61 = vmul.f32 0.044715, %v1910_v5  ;;  %v1957_v55 = vmul.f32 0.7978846, %v1949_v22  ;;  %v1918_v63 = vmul.f32 0.5, %v1910_v5 }
 0x6a1   : > { %v1972_v27 = vadd.f32 1.0, %v4418_v43 }
 0x6a2   : > { %v1934_v0 = vmul.f32 %v1926_v61, %v1910_v5  ;;  %4419 = vtanh.f32 %v1957_v55 }
 0x6a3   : > { %v1980_v24 = vmul.f32 %v1972_v27, %v1916_v13 }
 0x6a4   : > { %v1942_v6 = vmul.f32 %v1934_v0, %v1910_v5 }
 0x6a5   : > { %v1897_v31 = vpop.f32.mrf.mxu3  ;;  %v1991_v62 = vpack.c.bf16 %v1980_v24, %v1979_v18 }
 0x6a6   : > { %v1911_v41 = vadd.f32 %v1897_v31, %v1816_v56  ;;  %v1950_v25 = vadd.f32 %v1942_v6, %v1910_v5 }
 0x6a7   : > { %4149 = vmatmul.msk.bf16.vlgmr.msra.gmra.mxu2 %vm1998_vm3, %v1991_v62 }
 0x6a8   : > { %v1927_v1 = vmul.f32 0.044715, %v1911_v41  ;;  %v1958_v15 = vmul.f32 0.7978846, %v1950_v25  ;;  %v4420_v21 = vpop.eup %4419  ;;  %v1919_v43 = vmul.f32 0.5, %v1911_v41 }
 0x6a9   : > { %v1973_v58 = vadd.f32 1.0, %v4420_v21  ;;  %v2122_v21 = vld [vmem:[%s6407_s6 + $0x30] sm:$0xff] }
 0x6aa   : > { %v1935_v30 = vmul.f32 %v1927_v1, %v1911_v41  ;;  %4421 = vtanh.f32 %v1958_v15  ;;  %v5580_v15 = vperm.slane %v5549_v36, 1  ;;  %v2123_v36 = vld [vmem:[%s6407_s6 + $0x38] sm:$0xff] }
 0x6ab   : > { %v1981_v46 = vmul.f32 %v1973_v58, %v1917_v8  ;;  %v2117_v58 = vld [vmem:[%s6407_s6 + $0x8] sm:$0xff]  ;;  %v2120_v8 = vld [vmem:[%s6407_s6 + $0x20] sm:$0xff] }
 0x6ac   : > { %v1943_v45 = vmul.f32 %v1935_v30, %v1911_v41  ;;  %v2127_v30 = vld [vmem:[%s6407_s6 + $0x58] sm:$0x3f] }
 0x6ad   : > { %v1899_v40 = vpop.f32.mrf.mxu3 }
 0x6ae   : > { %v1951_v42 = vadd.f32 %v1943_v45, %v1911_v41  ;;  %v1912_v26 = vadd.f32 %v1899_v40, %v1817_v7  ;;  %v2137_v7 = vpack.c.bf16 %v2127_v30, %v2124_v33  ;;  %v2125_v45 = vld [vmem:[%s6407_s6 + $0x48] sm:$0x3f] }
 0x6af   : > { %v2135_v40 = vpack.c.bf16 %v2125_v45, %v2122_v21 }
 0x6b0   : > { %v4422_v20 = vpop.eup %4421  ;;  %v1928_v29 = vmul.f32 0.044715, %v1912_v26  ;;  %v1959_v12 = vmul.f32 0.7978846, %v1951_v42  ;;  %v1920_v61 = vmul.f32 0.5, %v1912_v26  ;;  %v2136_v42 = vpack.c.bf16 %v2126_v14, %v2123_v36 }
 0x6b1   : > { %v1974_v53 = vadd.f32 1.0, %v4422_v20 }
 0x6b2   : > { %v1936_v9 = vmul.f32 %v1928_v29, %v1912_v26  ;;  %4423 = vtanh.f32 %v1959_v12  ;;  %v2160_v29 = vsel %vm2011_vm15, %v2137_v7, 0  ;;  %v2154_v12 = vsel %vm2011_vm15, %v2135_v40, 0 }
 0x6b3   : > { %v1982_v2 = vmul.f32 %v1974_v53, %v1918_v63  ;;  %v2118_v63 = vld [vmem:[%s6407_s6 + $0x10] sm:$0xff]  ;;  %v2121_v53 = vld [vmem:[%s6407_s6 + $0x28] sm:$0xff]  ;;  %2226 = vmatpush.bf16.msra.mxu3 %v2160_v29  ;;  %2168 = vmatpush.bf16.msrb.mxu0 %v2154_v12 }
 0x6b4   : > { %v1944_v19 = vmul.f32 %v1936_v9, %v1912_v26  ;;  %v2157_v9 = vsel %vm2011_vm15, %v2136_v42, 0 }
 0x6b5   : > { %v1902_v57 = vpop.f32.mrf.mxu3  ;;  %v1992_v44 = vpack.c.bf16 %v1982_v2, %v1981_v46  ;;  %2197 = vmatpush.bf16.msra.mxu1 %v2157_v9  ;;  %v2133_v2 = vpack.c.bf16 %v2120_v8, %v2117_v58 }
 0x6b6   : > { %v1913_v3 = vadd.f32 %v1902_v57, %v1818_v16  ;;  %v1952_v17 = vadd.f32 %v1944_v19, %v1912_v26  ;;  %v2116_v26 = vld [vmem:[%s6407_s6] sm:$0xff]  ;;  %v2134_v16 = vpack.c.bf16 %v2121_v53, %v2118_v63 }
 0x6b7   : > { %4150 = vmatmul.msk.bf16.gmra.mxu2 %vm1998_vm3, %v1992_v44  ;;  %v2132_v46 = vpack.c.bf16 %v2119_v51, %v2116_v26 }
 0x6b8   : > { %v1929_v37 = vmul.f32 0.044715, %v1913_v3  ;;  %v1960_v28 = vmul.f32 0.7978846, %v1952_v17  ;;  %v4424_v4 = vpop.eup %4423  ;;  %v1921_v11 = vmul.f32 0.5, %v1913_v3  ;;  %2227 = vmatpush.bf16.msra.mxu3 %v2134_v16 }
 0x6b9   : > { %v1975_v22 = vadd.f32 1.0, %v4424_v4  ;;  %2169 = vmatpush.bf16.msrb.mxu0 %v2132_v46  ;;  %2198 = vmatpush.bf16.msra.mxu1 %v2133_v2  ;;  %v2250_v2 = vpop.permute.xlu0 %2249 }
 0x6ba   : > { %v1937_v39 = vmul.f32 %v1929_v37, %v1913_v3  ;;  %4425 = vtanh.f32 %v1960_v28  ;;  %4298 = vpush %v2250_v2 }
 0x6bb   : > { %v1983_v34 = vmul.f32 %v1975_v22, %v1919_v43 }
 0x6bc   : > { %v1945_v54 = vmul.f32 %v1937_v39, %v1913_v3 }
 0x6bd   : > { %v1904_v38 = vpop.f32.mrf.mxu3 }
 0x6be   : > { %v1953_v59 = vadd.f32 %v1945_v54, %v1913_v3  ;;  %v1914_v50 = vadd.f32 %v1904_v38, %v1819_v23 }
 0x6c0   : > { %v4426_v5 = vpop.eup %4425  ;;  %v1930_v52 = vmul.f32 0.044715, %v1914_v50  ;;  %v1961_v13 = vmul.f32 0.7978846, %v1953_v59  ;;  %v1922_v31 = vmul.f32 0.5, %v1914_v50 }
 0x6c1   : > { %v1976_v10 = vadd.f32 1.0, %v4426_v5 }
 0x6c2   : > { %v1938_v27 = vmul.f32 %v1930_v52, %v1914_v50  ;;  %4427 = vtanh.f32 %v1961_v13 }
 0x6c3   : > { %v1984_v55 = vmul.f32 %v1976_v10, %v1920_v61 }
 0x6c4   : > { %v1946_v0 = vmul.f32 %v1938_v27, %v1914_v50 }
 0x6c5   : > { %v1993_v35 = vpack.c.bf16 %v1984_v55, %v1983_v34 }
 0x6c6   : > { %v1954_v32 = vadd.f32 %v1946_v0, %v1914_v50 }
 0x6c7   : > { %4151 = vmatmul.msk.bf16.gmra.mxu2 %vm1998_vm3, %v1993_v35 }
 0x6c8   : > { %v1962_v18 = vmul.f32 0.7978846, %v1954_v32  ;;  %v4428_v24 = vpop.eup %4427 }
 0x6c9   : > { %v1977_v56 = vadd.f32 1.0, %v4428_v24 }
 0x6ca   : > { %4429 = vtanh.f32 %v1962_v18 }
 0x6cb   : > { %v1985_v41 = vmul.f32 %v1977_v56, %v1921_v11 }
 0x6d0   : > { %v4430_v6 = vpop.eup %4429 }
 0x6d1   : > { %v1978_v62 = vadd.f32 1.0, %v4430_v6 }
 0x6d3   : > { %v1986_v25 = vmul.f32 %v1978_v62, %v1922_v31 }
 0x6d5   : > { %v1994_v1 = vpack.c.bf16 %v1986_v25, %v1985_v41 }
 0x6d7   : > { %4152 = vmatmul.msk.bf16.gmra.mxu2 %vm1998_vm3, %v1994_v1 }
 0x6eb   : > { %s4299_s18 = spop %4298 }
 0x72a   : > { %v2024_v20 = vpop.f32.mrf.mxu2 }
 0x72b   : > { %v2025_v60 = vadd.f32 %v2024_v20, %v5580_v15 }
 0x72d   : > { %v2052_v19 = vmul.f32 0.044715, %v2025_v60  ;;  %v2044_v27 = vmul.f32 0.5, %v2025_v60 }
 0x72f   : > { %v2060_v57 = vmul.f32 %v2052_v19, %v2025_v60 }
 0x731   : > { %v2068_v44 = vmul.f32 %v2060_v57, %v2025_v60 }
 0x732   : > { %v2026_v3 = vpop.f32.mrf.mxu2 }
 0x733   : > { %v2076_v17 = vadd.f32 %v2068_v44, %v2025_v60  ;;  %v2027_v49 = vadd.f32 %v2026_v3, %v5580_v15 }
 0x735   : > { %v2053_v37 = vmul.f32 0.044715, %v2027_v49  ;;  %v2084_v28 = vmul.f32 0.7978846, %v2076_v17  ;;  %v2045_v34 = vmul.f32 0.5, %v2027_v49 }
 0x737   : > { %v2061_v48 = vmul.f32 %v2053_v37, %v2027_v49  ;;  %4431 = vtanh.f32 %v2084_v28 }
 0x739   : > { %v2069_v47 = vmul.f32 %v2061_v48, %v2027_v49 }
 0x73a   : > { %v2029_v39 = vpop.f32.mrf.mxu2 }
 0x73b   : > { %v2077_v4 = vadd.f32 %v2069_v47, %v2027_v49  ;;  %v2030_v23 = vadd.f32 %v2029_v39, %v5580_v15 }
 0x73d   : > { %v2085_v54 = vmul.f32 0.7978846, %v2077_v4  ;;  %v2054_v38 = vmul.f32 0.044715, %v2030_v23  ;;  %v4432_v50 = vpop.eup %4431  ;;  %v2046_v40 = vmul.f32 0.5, %v2030_v23 }
 0x73e   : > { %v2100_v61 = vadd.f32 1.0, %v4432_v50 }
 0x73f   : > { %4433 = vtanh.f32 %v2085_v54  ;;  %v2062_v59 = vmul.f32 %v2054_v38, %v2030_v23 }
 0x740   : > { %v2108_v32 = vmul.f32 %v2100_v61, %v2044_v27 }
 0x741   : > { %v2070_v22 = vmul.f32 %v2062_v59, %v2030_v23 }
 0x742   : > { %v2031_v5 = vpop.f32.mrf.mxu2 }
 0x743   : > { %v2078_v52 = vadd.f32 %v2070_v22, %v2030_v23  ;;  %v2032_v43 = vadd.f32 %v2031_v5, %v5580_v15 }
 0x745   : > { %v4434_v10 = vpop.eup %4433  ;;  %v2055_v13 = vmul.f32 0.044715, %v2032_v43  ;;  %v2086_v0 = vmul.f32 0.7978846, %v2078_v52  ;;  %v2047_v42 = vmul.f32 0.5, %v2032_v43 }
 0x746   : > { %v2101_v55 = vadd.f32 1.0, %v4434_v10 }
 0x747   : > { %v2063_v35 = vmul.f32 %v2055_v13, %v2032_v43  ;;  %4435 = vtanh.f32 %v2086_v0  ;;  %v435_v0 = vld [vmem:[%s6407_s6 + $0x60] sm:$0x7] }
 0x748   : > { %v2109_v18 = vmul.f32 %v2101_v55, %v2045_v34 }
 0x749   : > { %v2071_v24 = vmul.f32 %v2063_v35, %v2032_v43  ;;  %v436_v35 = vld [vmem:[%s6407_s6 + $0x68] sm:$0x7] }
 0x74a   : > { %v2034_v56 = vpop.f32.mrf.mxu2  ;;  %v2128_v6 = vpack.c.bf16 %v2109_v18, %v2108_v32  ;;  %v5647_v32 = vperm.slane %v435_v0, 0  ;;  %v5649_v18 = vperm.slane %v436_v35, 0 }
 0x74b   : > { %v2035_v11 = vadd.f32 %v2034_v56, %v5580_v15  ;;  %v2079_v31 = vadd.f32 %v2071_v24, %v2032_v43 }
 0x74c   : > { %4153 = vmatmul.msk.bf16.vlgmr.msrb.gmra.mxu0 %vm1998_vm3, %v2128_v6  ;;  %4157 = vmatmul.msk.bf16.vlgmr.msra.gmra.mxu1 %vm1998_vm3, %v2128_v6 }
 0x74d   : > { %v2056_v62 = vmul.f32 0.044715, %v2035_v11  ;;  %4161 = vmatmul.msk.bf16.vlgmr.msra.gmra.mxu3 %vm1998_vm3, %v2128_v6  ;;  %v2087_v41 = vmul.f32 0.7978846, %v2079_v31  ;;  %v4436_v1 = vpop.eup %4435  ;;  %v2048_v48 = vmul.f32 0.5, %v2035_v11  ;;  %v5651_v6 = vstv %s4299_s18 }
 0x74e   : > { %v2102_v45 = vadd.f32 1.0, %v4436_v1 }
 0x74f   : > { %v2064_v25 = vmul.f32 %v2056_v62, %v2035_v11  ;;  %4437 = vtanh.f32 %v2087_v41  ;;  %v437_v62 = vld [vmem:[%s6407_s6 + $0x70] sm:$0x7] }
 0x750   : > { %v2110_v20 = vmul.f32 %v2102_v45, %v2046_v40  ;;  %v5660_v1 = vperm.slane %v437_v62, 0 }
 0x751   : > { %v2072_v33 = vmul.f32 %v2064_v25, %v2035_v11 }
 0x752   : > { %v2036_v30 = vpop.f32.mrf.mxu2 }
 0x753   : > { %v2080_v21 = vadd.f32 %v2072_v33, %v2035_v11  ;;  %v2037_v7 = vadd.f32 %v2036_v30, %v5580_v15  ;;  %v5662_v30 = vperm.slane %v435_v0, 1 }
 0x755   : > { %v4438_v36 = vpop.eup %4437  ;;  %v2057_v14 = vmul.f32 0.044715, %v2037_v7  ;;  %v2088_v51 = vmul.f32 0.7978846, %v2080_v21  ;;  %v2049_v47 = vmul.f32 0.5, %v2037_v7 }
 0x756   : > { %v2103_v26 = vadd.f32 1.0, %v4438_v36  ;;  %v5665_v36 = vperm.slane %v436_v35, 1 }
 0x757   : > { %v2065_v58 = vmul.f32 %v2057_v14, %v2037_v7  ;;  %4439 = vtanh.f32 %v2088_v51 }
 0x758   : > { %v2111_v29 = vmul.f32 %v2103_v26, %v2047_v42  ;;  %v5669_v42 = vperm.slane %v435_v0, 2 }
 0x759   : > { %v2073_v8 = vmul.f32 %v2065_v58, %v2037_v7  ;;  %v5672_v58 = vperm.slane %v436_v35, 2 }
 0x75a   : > { %v2039_v63 = vpop.f32.mrf.mxu2  ;;  %v2129_v53 = vpack.c.bf16 %v2111_v29, %v2110_v20 }
 0x75b   : > { %v2040_v60 = vadd.f32 %v2039_v63, %v5580_v15  ;;  %v2081_v12 = vadd.f32 %v2073_v8, %v2037_v7 }
 0x75c   : > { %4154 = vmatmul.msk.bf16.gmra.mxu0 %vm1998_vm3, %v2129_v53  ;;  %4158 = vmatmul.msk.bf16.gmra.mxu1 %vm1998_vm3, %v2129_v53 }
 0x75d   : > { %v2058_v9 = vmul.f32 0.044715, %v2040_v60  ;;  %4162 = vmatmul.msk.bf16.gmra.mxu3 %vm1998_vm3, %v2129_v53  ;;  %v2089_v46 = vmul.f32 0.7978846, %v2081_v12  ;;  %v4440_v19 = vpop.eup %4439  ;;  %v2050_v61 = vmul.f32 0.5, %v2040_v60  ;;  %v5679_v12 = vperm.slane %v437_v62, 1 }
 0x75e   : > { %v2104_v49 = vadd.f32 1.0, %v4440_v19 }
 0x75f   : > { %v2066_v16 = vmul.f32 %v2058_v9, %v2040_v60  ;;  %4441 = vtanh.f32 %v2089_v46 }
 0x760   : > { %v2112_v54 = vmul.f32 %v2104_v49, %v2048_v48  ;;  %v4663_v48 = vld [vmem:[%s4796_s16 + $0x8] sm:$0xff] }
 0x761   : > { %v2074_v57 = vmul.f32 %v2066_v16, %v2040_v60 }
 0x762   : > { %v2041_v44 = vpop.f32.mrf.mxu2 }
 0x763   : > { %v2082_v3 = vadd.f32 %v2074_v57, %v2040_v60  ;;  %v2042_v17 = vadd.f32 %v2041_v44, %v5580_v15  ;;  %v5683_v57 = vperm.slane %v437_v62, 2  ;;  %v4665_v62 = vld [vmem:[%s4796_s16 + $0x18] sm:$0xff] }
 0x765   : > { %v4442_v37 = vpop.eup %4441  ;;  %v2059_v28 = vmul.f32 0.044715, %v2042_v17  ;;  %v2090_v4 = vmul.f32 0.7978846, %v2082_v3  ;;  %v2051_v10 = vmul.f32 0.5, %v2042_v17 }
 0x766   : > { %v2105_v39 = vadd.f32 1.0, %v4442_v37  ;;  %v4662_v37 = vld [vmem:[%s4796_s16] sm:$0xff] }
 0x767   : > { %v2067_v23 = vmul.f32 %v2059_v28, %v2042_v17  ;;  %4443 = vtanh.f32 %v2090_v4 }
 0x768   : > { %v2113_v38 = vmul.f32 %v2105_v39, %v2049_v47 }
 0x769   : > { %v2075_v59 = vmul.f32 %v2067_v23, %v2042_v17 }
 0x76a   : > { %v2130_v50 = vpack.c.bf16 %v2113_v38, %v2112_v54 }
 0x76b   : > { %v2083_v22 = vadd.f32 %v2075_v59, %v2042_v17 }
 0x76c   : > { %4155 = vmatmul.msk.bf16.gmra.mxu0 %vm1998_vm3, %v2130_v50  ;;  %4159 = vmatmul.msk.bf16.gmra.mxu1 %vm1998_vm3, %v2130_v50 }
 0x76d   : > { %4163 = vmatmul.msk.bf16.gmra.mxu3 %vm1998_vm3, %v2130_v50  ;;  %v2091_v15 = vmul.f32 0.7978846, %v2083_v22  ;;  %v4444_v5 = vpop.eup %4443 }
 0x76e   : > { %v2106_v52 = vadd.f32 1.0, %v4444_v5 }
 0x76f   : > { %4445 = vtanh.f32 %v2091_v15 }
 0x770   : > { %v2114_v27 = vmul.f32 %v2106_v52, %v2050_v61  ;;  %v4664_v61 = vld [vmem:[%s4796_s16 + $0x10] sm:$0xff] }
 0x775   : > { %v4446_v43 = vpop.eup %4445 }
 0x776   : > { %v2107_v13 = vadd.f32 1.0, %v4446_v43 }
 0x778   : > { %v2115_v34 = vmul.f32 %v2107_v13, %v2051_v10 }
 0x77a   : > { %v2131_v55 = vpack.c.bf16 %v2115_v34, %v2114_v27 }
 0x77c   : > { %4156 = vmatmul.msk.bf16.gmra.mxu0 %vm1998_vm3, %v2131_v55  ;;  %4160 = vmatmul.msk.bf16.gmra.mxu1 %vm1998_vm3, %v2131_v55 }
 0x77d   : > { %4164 = vmatmul.msk.bf16.gmra.mxu3 %vm1998_vm3, %v2131_v55 }
 0x7c9   : > { %v2171_v24 = vpop.f32.mrf.mxu0  ;;  %v2200_v56 = vpop.f32.mrf.mxu1 }
 0x7ca   : > { %v2172_v11 = vadd.f32 %v2171_v24, %v5647_v32  ;;  %v2201_v31 = vadd.f32 %v2200_v56, %v5649_v18 }
 0x7cc   : > { %v2254_v41 = vmul.f32 %v5651_v6, %v2172_v11  ;;  %v2255_v25 = vmul.f32 %v5651_v6, %v2201_v31 }
 0x7ce   : > { %4447 = vtanh.f32 %v2254_v41 }
 0x7cf   : > { %4449 = vtanh.f32 %v2255_v25  ;;  %v4666_v25 = vld [vmem:[%s4796_s16 + $0x20] sm:$0xff] }
 0x7d0   : > { %v2229_v33 = vpop.f32.mrf.mxu3 }
 0x7d1   : > { %v2230_v21 = vadd.f32 %v2229_v33, %v5660_v1  ;;  %v2173_v7 = vpop.f32.mrf.mxu0  ;;  %v2202_v45 = vpop.f32.mrf.mxu1 }
 0x7d2   : > { %v2174_v14 = vadd.f32 %v2173_v7, %v5647_v32  ;;  %v2203_v40 = vadd.f32 %v2202_v45, %v5649_v18 }
 0x7d3   : > { %v2256_v26 = vmul.f32 %v5651_v6, %v2230_v21 }
 0x7d4   : > { %v4448_v51 = vpop.eup %4447  ;;  %v2257_v20 = vmul.f32 %v5651_v6, %v2174_v14  ;;  %v2258_v29 = vmul.f32 %v5651_v6, %v2203_v40 }
 0x7d5   : > { %v4450_v8 = vpop.eup %4449  ;;  %4451 = vtanh.f32 %v2256_v26  ;;  %v2305_v63 = vmul.f32 %v4448_v51, %v5662_v30 }
 0x7d6   : > { %4453 = vtanh.f32 %v2257_v20  ;;  %v2306_v53 = vmul.f32 %v4450_v8, %v5665_v36 }
 0x7d7   : > { %4455 = vtanh.f32 %v2258_v29  ;;  %v2332_v60 = vadd.f32 %v5669_v42, %v2305_v63 }
 0x7d8   : > { %v2231_v9 = vpop.f32.mrf.mxu3  ;;  %v2333_v46 = vadd.f32 %v5672_v58, %v2306_v53 }
 0x7d9   : > { %v2232_v2 = vadd.f32 %v2231_v9, %v5660_v1  ;;  %v2176_v16 = vpop.f32.mrf.mxu0  ;;  %v2205_v19 = vpop.f32.mrf.mxu1  ;;  %v5689_v28 = vadd.f32 %v4662_v37, %v2332_v60 }
 0x7da   : > { %v2177_v44 = vadd.f32 %v2176_v16, %v5647_v32  ;;  %v2206_v3 = vadd.f32 %v2205_v19, %v5649_v18  ;;  %v5692_v47 = vadd.f32 %v4663_v48, %v2333_v46  ;;  %v4667_v46 = vld [vmem:[%s4796_s16 + $0x28] sm:$0xff] }
 0x7db   : > { %v4452_v17 = vpop.eup %4451  ;;  %v2259_v49 = vmul.f32 %v5651_v6, %v2232_v2  ;;  %v2380_v15 = vmul.f32 %v5689_v28, %v5689_v28 }
 0x7dc   : > { %v4454_v39 = vpop.eup %4453  ;;  %v2307_v4 = vmul.f32 %v4452_v17, %v5679_v12  ;;  %v2260_v23 = vmul.f32 %v5651_v6, %v2177_v44  ;;  %v2261_v54 = vmul.f32 %v5651_v6, %v2206_v3  ;;  %v2381_v5 = vmul.f32 %v5692_v47, %v5692_v47 }
 0x7dd   : > { %v4456_v38 = vpop.eup %4455  ;;  %4457 = vtanh.f32 %v2259_v49  ;;  %v2308_v59 = vmul.f32 %v4454_v39, %v5662_v30 }
 0x7de   : > { %4459 = vtanh.f32 %v2260_v23  ;;  %v2334_v50 = vadd.f32 %v5683_v57, %v2307_v4  ;;  %v2309_v22 = vmul.f32 %v4456_v38, %v5665_v36  ;;  %v2404_v31 = vadd.f32 %v2381_v5, %v2380_v15  ;;  %v4668_v23 = vld [vmem:[%s4796_s16 + $0x30] sm:$0xff]  ;;  %v4669_v38 = vld [vmem:[%s4796_s16 + $0x38] sm:$0xff] }
 0x7df   : > { %4461 = vtanh.f32 %v2261_v54  ;;  %v2335_v52 = vadd.f32 %v5669_v42, %v2308_v59 }
 0x7e0   : > { %v2234_v43 = vpop.f32.mrf.mxu3  ;;  %v5706_v10 = vadd.f32 %v4664_v61, %v2334_v50  ;;  %v2336_v13 = vadd.f32 %v5672_v58, %v2309_v22 }
 0x7e1   : > { %v2235_v27 = vadd.f32 %v2234_v43, %v5660_v1  ;;  %v2178_v34 = vpop.f32.mrf.mxu0  ;;  %v2207_v55 = vpop.f32.mrf.mxu1  ;;  %v5716_v41 = vadd.f32 %v4665_v62, %v2335_v52 }
 0x7e2   : > { %v2179_v0 = vadd.f32 %v2178_v34, %v5647_v32  ;;  %v2208_v35 = vadd.f32 %v2207_v55, %v5649_v18  ;;  %v2382_v24 = vmul.f32 %v5706_v10, %v5706_v10  ;;  %v5719_v33 = vadd.f32 %v4666_v25, %v2336_v13 }
 0x7e3   : > { %v4458_v56 = vpop.eup %4457  ;;  %v2262_v11 = vmul.f32 %v5651_v6, %v2235_v27  ;;  %v2383_v63 = vmul.f32 %v5716_v41, %v5716_v41 }
 0x7e4   : > { %v4460_v21 = vpop.eup %4459  ;;  %v2263_v7 = vmul.f32 %v5651_v6, %v2179_v0  ;;  %v2264_v45 = vmul.f32 %v5651_v6, %v2208_v35  ;;  %v2405_v14 = vsel %vm536_vm1, %v2382_v24, 0.0  ;;  %v2310_v40 = vmul.f32 %v4458_v56, %v5679_v12  ;;  %v4670_v56 = vld [vmem:[%s4796_s16 + $0x40] sm:$0xff] }
 0x7e5   : > { %v4462_v26 = vpop.eup %4461  ;;  %v2311_v51 = vmul.f32 %v4460_v21, %v5662_v30  ;;  %4463 = vtanh.f32 %v2262_v11  ;;  %v2406_v20 = vadd.f32 %v2405_v14, %v2404_v31  ;;  %v2384_v53 = vmul.f32 %v5719_v33, %v5719_v33 }
 0x7e6   : > { %v2312_v29 = vmul.f32 %v4462_v26, %v5665_v36  ;;  %4465 = vtanh.f32 %v2263_v7  ;;  %v2337_v8 = vadd.f32 %v5683_v57, %v2310_v40 }
 0x7e7   : > { %4467 = vtanh.f32 %v2264_v45  ;;  %2407 = vadd.xlane.f32.xlu0 %v2406_v20  ;;  %v2338_v60 = vadd.f32 %v5669_v42, %v2311_v51  ;;  %v2409_v4 = vadd.f32 %v2384_v53, %v2383_v63  ;;  %v4671_v20 = vld [vmem:[%s4796_s16 + $0x48] sm:$0xff] }
 0x7e8   : > { %v2236_v9 = vpop.f32.mrf.mxu3  ;;  %v5734_v2 = vadd.f32 %v4667_v46, %v2337_v8  ;;  %v2339_v16 = vadd.f32 %v5672_v58, %v2312_v29  ;;  %v4672_v8 = vld [vmem:[%s4796_s16 + $0x50] sm:$0xff] }
 0x7e9   : > { %v2237_v19 = vadd.f32 %v2236_v9, %v5660_v1  ;;  %v2181_v44 = vpop.f32.mrf.mxu0  ;;  %v2210_v3 = vpop.f32.mrf.mxu1  ;;  %v5744_v54 = vadd.f32 %v4668_v23, %v2338_v60  ;;  %v4673_v23 = vld [vmem:[%s4796_s16 + $0x58] sm:$0xff] }
 0x7ea   : > { %v2182_v17 = vadd.f32 %v2181_v44, %v5647_v32  ;;  %v2211_v49 = vadd.f32 %v2210_v3, %v5649_v18  ;;  %v2385_v37 = vmul.f32 %v5734_v2, %v5734_v2  ;;  %v5747_v59 = vadd.f32 %v4669_v38, %v2339_v16 }
 0x7eb   : > { %v4464_v48 = vpop.eup %4463  ;;  %v2265_v39 = vmul.f32 %v5651_v6, %v2237_v19  ;;  %v2386_v55 = vmul.f32 %v5744_v54, %v5744_v54 }
 0x7ec   : > { %v4466_v50 = vpop.eup %4465  ;;  %v2313_v22 = vmul.f32 %v4464_v48, %v5679_v12  ;;  %v2266_v15 = vmul.f32 %v5651_v6, %v2182_v17  ;;  %v2267_v5 = vmul.f32 %v5651_v6, %v2211_v49  ;;  %v2410_v52 = vsel %vm536_vm1, %v2385_v37, 0.0 }
 0x7ed   : > { %v4468_v43 = vpop.eup %4467  ;;  %4469 = vtanh.f32 %v2265_v39  ;;  %v2411_v61 = vadd.f32 %v2410_v52, %v2409_v4  ;;  %v2314_v13 = vmul.f32 %v4466_v50, %v5662_v30  ;;  %v2387_v0 = vmul.f32 %v5747_v59, %v5747_v59 }
 0x7ee   : > { %4471 = vtanh.f32 %v2266_v15  ;;  %v2340_v27 = vadd.f32 %v5683_v57, %v2313_v22  ;;  %v2315_v34 = vmul.f32 %v4468_v43, %v5665_v36 }
 0x7ef   : > { %4473 = vtanh.f32 %v2267_v5  ;;  %2412 = vadd.xlane.f32.xlu1 %v2411_v61  ;;  %v2341_v35 = vadd.f32 %v5669_v42, %v2314_v13  ;;  %v2414_v51 = vadd.f32 %v2387_v0, %v2386_v55  ;;  %v4674_v55 = vld [vmem:[%s4796_s16 + $0x60] sm:$0xff] }
 0x7f0   : > { %v2239_v24 = vpop.f32.mrf.mxu3  ;;  %v5762_v11 = vadd.f32 %v4670_v56, %v2340_v27  ;;  %v2342_v31 = vadd.f32 %v5672_v58, %v2315_v34 }
 0x7f1   : > { %v2240_v62 = vadd.f32 %v2239_v24, %v5660_v1  ;;  %v2183_v25 = vpop.f32.mrf.mxu0  ;;  %v2212_v21 = vpop.f32.mrf.mxu1  ;;  %v5772_v29 = vadd.f32 %v4671_v20, %v2341_v35  ;;  %v4675_v35 = vld [vmem:[%s4796_s16 + $0x68] sm:$0xff] }
 0x7f2   : > { %v2184_v7 = vadd.f32 %v2183_v25, %v5647_v32  ;;  %v2213_v45 = vadd.f32 %v2212_v21, %v5649_v18  ;;  %v2388_v14 = vmul.f32 %v5762_v11, %v5762_v11  ;;  %v5775_v63 = vadd.f32 %v4672_v8, %v2342_v31 }
 0x7f3   : > { %v4470_v40 = vpop.eup %4469  ;;  %v2268_v26 = vmul.f32 %v5651_v6, %v2240_v62  ;;  %v2389_v37 = vmul.f32 %v5772_v29, %v5772_v29 }
 0x7f4   : > { %v4472_v53 = vpop.eup %4471  ;;  %v2269_v60 = vmul.f32 %v5651_v6, %v2184_v7  ;;  %v2270_v9 = vmul.f32 %v5651_v6, %v2213_v45  ;;  %v2415_v46 = vsel %vm536_vm1, %v2388_v14, 0.0  ;;  %v2316_v16 = vmul.f32 %v4470_v40, %v5679_v12 }
 0x7f5   : > { %v4474_v19 = vpop.eup %4473  ;;  %v2317_v44 = vmul.f32 %v4472_v53, %v5662_v30  ;;  %4475 = vtanh.f32 %v2268_v26  ;;  %v2416_v3 = vadd.f32 %v2415_v46, %v2414_v51  ;;  %v2390_v48 = vmul.f32 %v5775_v63, %v5775_v63 }
 0x7f6   : > { %v2318_v17 = vmul.f32 %v4474_v19, %v5665_v36  ;;  %4477 = vtanh.f32 %v2269_v60  ;;  %v2343_v49 = vadd.f32 %v5683_v57, %v2316_v16  ;;  %v4676_v60 = vld [vmem:[%s4796_s16 + $0x70] sm:$0xff] }
 0x7f7   : > { %4479 = vtanh.f32 %v2270_v9  ;;  %2417 = vadd.xlane.f32.xlu1 %v2416_v3  ;;  %v2344_v39 = vadd.f32 %v5669_v42, %v2317_v44  ;;  %v2419_v34 = vadd.f32 %v2390_v48, %v2389_v37 }
 0x7f8   : > { %v2241_v4 = vpop.f32.mrf.mxu3  ;;  %v5790_v38 = vadd.f32 %v4673_v23, %v2343_v49  ;;  %v2345_v50 = vadd.f32 %v5672_v58, %v2318_v17 }
 0x7f9   : > { %v2242_v22 = vadd.f32 %v2241_v4, %v5660_v1  ;;  %v2186_v15 = vpop.f32.mrf.mxu0  ;;  %v2215_v5 = vpop.f32.mrf.mxu1  ;;  %v5800_v0 = vadd.f32 %v4674_v55, %v2344_v39  ;;  %v4677_v4 = vld [vmem:[%s4796_s16 + $0x78] sm:$0xff] }
 0x7fa   : > { %v2187_v52 = vadd.f32 %v2186_v15, %v5647_v32  ;;  %v2216_v43 = vadd.f32 %v2215_v5, %v5649_v18  ;;  %v2391_v61 = vmul.f32 %v5790_v38, %v5790_v38  ;;  %v5803_v24 = vadd.f32 %v4675_v35, %v2345_v50  ;;  %v4678_v50 = vld [vmem:[%s4796_s16 + $0x80] sm:$0xff] }
 0x7fb   : > { %v4476_v13 = vpop.eup %4475  ;;  %v2271_v27 = vmul.f32 %v5651_v6, %v2242_v22  ;;  %v2392_v51 = vmul.f32 %v5800_v0, %v5800_v0 }
 0x7fc   : > { %v4478_v56 = vpop.eup %4477  ;;  %v2319_v31 = vmul.f32 %v4476_v13, %v5679_v12  ;;  %v2272_v62 = vmul.f32 %v5651_v6, %v2187_v52  ;;  %v2273_v25 = vmul.f32 %v5651_v6, %v2216_v43  ;;  %v2420_v21 = vsel %vm536_vm1, %v2391_v61, 0.0 }
 0x7fd   : > { %v4480_v7 = vpop.eup %4479  ;;  %v2320_v45 = vmul.f32 %v4478_v56, %v5662_v30  ;;  %4481 = vtanh.f32 %v2271_v27  ;;  %v2421_v14 = vadd.f32 %v2420_v21, %v2419_v34  ;;  %v2393_v20 = vmul.f32 %v5803_v24, %v5803_v24 }
 0x7fe   : > { %v2321_v40 = vmul.f32 %v4480_v7, %v5665_v36  ;;  %4483 = vtanh.f32 %v2272_v62  ;;  %v2346_v26 = vadd.f32 %v5683_v57, %v2319_v31  ;;  %v4679_v62 = vld [vmem:[%s4796_s16 + $0x88] sm:$0xff] }
 0x7ff   : > { %4485 = vtanh.f32 %v2273_v25  ;;  %2422 = vadd.xlane.f32.xlu2 %v2421_v14  ;;  %v2347_v8 = vadd.f32 %v5669_v42, %v2320_v45  ;;  %v2424_v39 = vadd.f32 %v2393_v20, %v2392_v51  ;;  %v4680_v51 = vld [vmem:[%s4796_s16 + $0x90] sm:$0xff] }
 0x800   : > { %v2244_v53 = vpop.f32.mrf.mxu3  ;;  %v5818_v9 = vadd.f32 %v4676_v60, %v2346_v26  ;;  %v2348_v46 = vadd.f32 %v5672_v58, %v2321_v40 }
 0x801   : > { %v2245_v16 = vadd.f32 %v2244_v53, %v5660_v1  ;;  %v2188_v19 = vpop.f32.mrf.mxu0  ;;  %v2217_v44 = vpop.f32.mrf.mxu1  ;;  %v5828_v23 = vadd.f32 %v4677_v4, %v2347_v8  ;;  %v4681_v8 = vld [vmem:[%s4796_s16 + $0x98] sm:$0xff] }
 0x802   : > { %v2189_v3 = vadd.f32 %v2188_v19, %v5647_v32  ;;  %v2218_v17 = vadd.f32 %v2217_v44, %v5649_v18  ;;  %v2394_v49 = vmul.f32 %v5818_v9, %v5818_v9  ;;  %v5831_v22 = vadd.f32 %v4678_v50, %v2348_v46 }
 0x803   : > { %v4482_v37 = vpop.eup %4481  ;;  %v2274_v48 = vmul.f32 %v5651_v6, %v2245_v16  ;;  %v2395_v55 = vmul.f32 %v5828_v23, %v5828_v23 }
 0x804   : > { %v4484_v15 = vpop.eup %4483  ;;  %v2275_v5 = vmul.f32 %v5651_v6, %v2189_v3  ;;  %v2276_v32 = vmul.f32 %v5651_v6, %v2218_v17  ;;  %v2425_v18 = vsel %vm536_vm1, %v2394_v49, 0.0  ;;  %v2322_v52 = vmul.f32 %v4482_v37, %v5679_v12 }
 0x805   : > { %v4486_v43 = vpop.eup %4485  ;;  %v2323_v61 = vmul.f32 %v4484_v15, %v5662_v30  ;;  %4487 = vtanh.f32 %v2274_v48  ;;  %v2426_v13 = vadd.f32 %v2425_v18, %v2424_v39  ;;  %v2396_v35 = vmul.f32 %v5831_v22, %v5831_v22  ;;  %v4682_v48 = vld [vmem:[%s4796_s16 + $0xa0] sm:$0xff]  ;;  %v4683_v15 = vld [vmem:[%s4796_s16 + $0xa8] sm:$0xff] }
 0x806   : > { %v2324_v27 = vmul.f32 %v4486_v43, %v5665_v36  ;;  %4489 = vtanh.f32 %v2275_v5  ;;  %v2349_v34 = vadd.f32 %v5683_v57, %v2322_v52 }
 0x807   : > { %4491 = vtanh.f32 %v2276_v32  ;;  %2427 = vadd.xlane.f32.xlu2 %v2426_v13  ;;  %v2350_v56 = vadd.f32 %v5669_v42, %v2323_v61  ;;  %v2429_v26 = vadd.f32 %v2396_v35, %v2395_v55  ;;  %v4684_v32 = vld [vmem:[%s4796_s16 + $0xb0] sm:$0xff] }
 0x808   : > { %v2246_v31 = vpop.f32.mrf.mxu3  ;;  %v5846_v25 = vadd.f32 %v4679_v62, %v2349_v34  ;;  %v2351_v21 = vadd.f32 %v5672_v58, %v2324_v27  ;;  %v4685_v27 = vld [vmem:[%s4796_s16 + $0xb8] sm:$0xff]  ;;  %v2610_v62 = vld [vmem:[%s6408_s7 + $0xf0] sm:$0xff] }
 0x809   : > { %v2247_v7 = vadd.f32 %v2246_v31, %v5660_v1  ;;  %v5854_v20 = vadd.f32 %v4680_v51, %v2350_v56  ;;  %v2595_v31 = vld [vmem:[%s6408_s7 + $0x78] sm:$0xff]  ;;  %v2592_v51 = vld [vmem:[%s6408_s7 + $0x60] sm:$0xff] }
 0x80a   : > { %v2397_v45 = vmul.f32 %v5846_v25, %v5846_v25  ;;  %v5857_v53 = vadd.f32 %v4681_v8, %v2351_v21  ;;  %v2593_v8 = vld [vmem:[%s6408_s7 + $0x68] sm:$0xff] }
 0x80b   : > { %v4488_v14 = vpop.eup %4487  ;;  %v2277_v40 = vmul.f32 %v5651_v6, %v2247_v7  ;;  %v2398_v17 = vmul.f32 %v5854_v20, %v5854_v20  ;;  %v2611_v7 = vld [vmem:[%s6408_s7 + $0xf8] sm:$0xff] }
 0x80c   : > { %v4490_v60 = vpop.eup %4489  ;;  %v2325_v46 = vmul.f32 %v4488_v14, %v5679_v12  ;;  %v2430_v16 = vsel %vm536_vm1, %v2397_v45, 0.0  ;;  %v2399_v49 = vmul.f32 %v5857_v53, %v5857_v53  ;;  %v2759_v45 = vld [vmem:[%s6408_s7 + $0x180] sm:$0xff]  ;;  %v2760_v14 = vld [vmem:[%s6408_s7 + $0x188] sm:$0xff] }
 0x80d   : > { %v4492_v1 = vpop.eup %4491  ;;  %v2326_v19 = vmul.f32 %v4490_v60, %v5662_v30  ;;  %4493 = vtanh.f32 %v2277_v40  ;;  %v2431_v6 = vadd.f32 %v2430_v16, %v2429_v26  ;;  %v2641_v40 = vpack.c.bf16 %v2611_v7, %v2610_v62  ;;  %v2608_v60 = vld [vmem:[%s6408_s7 + $0xe0] sm:$0xff]  ;;  %v2609_v16 = vld [vmem:[%s6408_s7 + $0xe8] sm:$0xff] }
 0x80e   : > { %v2327_v44 = vmul.f32 %v4492_v1, %v5665_v36  ;;  %v2352_v3 = vadd.f32 %v5683_v57, %v2325_v46  ;;  %v2434_v50 = vadd.f32 %v2399_v49, %v2398_v17  ;;  %v2786_v26 = vpack.c.bf16 %v2760_v14, %v2759_v45  ;;  %v2757_v1 = vld [vmem:[%s6408_s7 + $0x170] sm:$0xff]  ;;  %v2591_v17 = vld [vmem:[%s6408_s7 + $0x58] sm:$0xff]  ;;  %v2752_v62 = vld [vmem:[%s6408_s7 + $0x148] sm:$0xff] }
 0x80f   : > { %2432 = vadd.xlane.f32.xlu1 %v2431_v6  ;;  %v2353_v37 = vadd.f32 %v5669_v42, %v2326_v19  ;;  %2687 = vmatpush.bf16.msra.mxu0 %v2641_v40  ;;  %v2632_v46 = vpack.c.bf16 %v2593_v8, %v2592_v51  ;;  %v2758_v19 = vld [vmem:[%s6408_s7 + $0x178] sm:$0xff]  ;;  %v2640_v6 = vpack.c.bf16 %v2609_v16, %v2608_v60  ;;  %v2606_v49 = vld [vmem:[%s6408_s7 + $0xd0] sm:$0xff]  ;;  %v2584_v14 = vld [vmem:[%s6408_s7 + $0x20] sm:$0xff] }
 0x810   : > { %v5870_v39 = vadd.f32 %v4682_v48, %v2352_v3  ;;  %v2354_v30 = vadd.f32 %v5672_v58, %v2327_v44  ;;  %2799 = vmatpush.bf16.msrb.mxu3 %v2786_v26  ;;  %v2785_v44 = vpack.c.bf16 %v2758_v19, %v2757_v1  ;;  %v2590_v3 = vld [vmem:[%s6408_s7 + $0x50] sm:$0xff]  ;;  %v2607_v48 = vld [vmem:[%s6408_s7 + $0xd8] sm:$0xff]  ;;  %v2585_v40 = vld [vmem:[%s6408_s7 + $0x28] sm:$0xff] }
 0x811   : > { %v5876_v5 = vadd.f32 %v4683_v15, %v2353_v37  ;;  %v2631_v37 = vpack.c.bf16 %v2591_v17, %v2590_v3  ;;  %v2588_v15 = vld [vmem:[%s6408_s7 + $0x40] sm:$0xff]  ;;  %v2628_v51 = vpack.c.bf16 %v2585_v40, %v2584_v14  ;;  %v2601_v8 = vld [vmem:[%s6408_s7 + $0xa8] sm:$0xff]  ;;  %v2749_v60 = vld [vmem:[%s6408_s7 + $0x130] sm:$0xff] }
 0x812   : > { %v2400_v36 = vmul.f32 %v5870_v39, %v5870_v39  ;;  %v5879_v18 = vadd.f32 %v4684_v32, %v2354_v30  ;;  %v2755_v30 = vld [vmem:[%s6408_s7 + $0x160] sm:$0xff]  ;;  %v2589_v32 = vld [vmem:[%s6408_s7 + $0x48] sm:$0xff]  ;;  %v2582_v19 = vld [vmem:[%s6408_s7 + $0x10] sm:$0xff] }
 0x813   : > { %v4494_v4 = vpop.eup %4493  ;;  %v2401_v58 = vmul.f32 %v5876_v5, %v5876_v5  ;;  %2688 = vmatpush.bf16.msra.mxu0 %v2640_v6  ;;  %v2600_v26 = vld [vmem:[%s6408_s7 + $0xa0] sm:$0xff]  ;;  %v2583_v6 = vld [vmem:[%s6408_s7 + $0x18] sm:$0xff] }
 0x814   : > { %v2435_v52 = vsel %vm536_vm1, %v2400_v36, 0.0  ;;  %v2328_v42 = vmul.f32 %v4494_v4, %v5679_v12  ;;  %v2402_v13 = vmul.f32 %v5879_v18, %v5879_v18  ;;  %2800 = vmatpush.bf16.msrb.mxu3 %v2785_v44  ;;  %v2756_v36 = vld [vmem:[%s6408_s7 + $0x168] sm:$0xff]  ;;  %v2639_v4 = vpack.c.bf16 %v2607_v48, %v2606_v49  ;;  %v2598_v44 = vld [vmem:[%s6408_s7 + $0x90] sm:$0xff]  ;;  %v2599_v49 = vld [vmem:[%s6408_s7 + $0x98] sm:$0xff] }
 0x815   : > { %v2436_v43 = vadd.f32 %v2435_v52, %v2434_v50  ;;  %v2784_v50 = vpack.c.bf16 %v2756_v36, %v2755_v30  ;;  %v2604_v52 = vld [vmem:[%s6408_s7 + $0xc0] sm:$0xff]  ;;  %v2636_v16 = vpack.c.bf16 %v2601_v8, %v2600_v26  ;;  %v2627_v17 = vpack.c.bf16 %v2583_v6, %v2582_v19  ;;  %v2748_v48 = vld [vmem:[%s6408_s7 + $0x128] sm:$0xff] }
 0x816   : > { %v2355_v61 = vadd.f32 %v5683_v57, %v2328_v42  ;;  %v2439_v35 = vadd.f32 %v2402_v13, %v2401_v58  ;;  %v2594_v57 = vld [vmem:[%s6408_s7 + $0x70] sm:$0xff]  ;;  %v2630_v42 = vpack.c.bf16 %v2589_v32, %v2588_v15  ;;  %v2754_v58 = vld [vmem:[%s6408_s7 + $0x158] sm:$0xff]  ;;  %v2612_v15 = vld [vmem:[%s6408_s7 + $0x100] sm:$0xff] }
 0x817   : > { %2437 = vadd.xlane.f32.xlu2 %v2436_v43  ;;  %v2633_v21 = vpack.c.bf16 %v2595_v31, %v2594_v57  ;;  %2689 = vmatpush.bf16.msra.mxu0 %v2639_v4  ;;  %v2605_v43 = vld [vmem:[%s6408_s7 + $0xc8] sm:$0xff]  ;;  %v2603_v57 = vld [vmem:[%s6408_s7 + $0xb8] sm:$0xff]  ;;  %v2751_v31 = vld [vmem:[%s6408_s7 + $0x140] sm:$0xff]  ;;  %v2635_v4 = vpack.c.bf16 %v2599_v49, %v2598_v44 }
 0x818   : > { %v5889_v34 = vadd.f32 %v4685_v27, %v2355_v61  ;;  %2801 = vmatpush.bf16.msrb.mxu3 %v2784_v50  ;;  %v2753_v61 = vld [vmem:[%s6408_s7 + $0x150] sm:$0xff]  ;;  %v2638_v13 = vpack.c.bf16 %v2605_v43, %v2604_v52  ;;  %v2782_v45 = vpack.c.bf16 %v2752_v62, %v2751_v31  ;;  %v2613_v32 = vld [vmem:[%s6408_s7 + $0x108] sm:$0x3] }
 0x819   : > { %2658 = vmatpush.bf16.msrb.mxu2 %v2633_v21  ;;  %v2783_v27 = vpack.c.bf16 %v2754_v58, %v2753_v61  ;;  %v2581_v43 = vld [vmem:[%s6408_s7 + $0x8] sm:$0xff]  ;;  %v2596_v61 = vld [vmem:[%s6408_s7 + $0x80] sm:$0xff]  ;;  %v2642_v58 = vpack.c.bf16 %v2613_v32, %v2612_v15 }
 0x81a   : > { %v2403_v55 = vmul.f32 %v5889_v34, %v5889_v34 }
 0x81b   : > { %2690 = vmatpush.bf16.msra.mxu0 %v2638_v13 }
 0x81c   : > { %v2440_v56 = vsel %vm536_vm1, %v2403_v55, 0.0  ;;  %2802 = vmatpush.bf16.msrb.mxu3 %v2783_v27  ;;  %v2586_v55 = vld [vmem:[%s6408_s7 + $0x30] sm:$0xff]  ;;  %v2597_v27 = vld [vmem:[%s6408_s7 + $0x88] sm:$0xff] }
 0x81d   : > { %v2441_v12 = vadd.f32 %v2440_v56, %v2439_v35  ;;  %2659 = vmatpush.bf16.msrb.mxu2 %v2632_v46  ;;  %v2587_v35 = vld [vmem:[%s6408_s7 + $0x38] sm:$0xff]  ;;  %v2602_v56 = vld [vmem:[%s6408_s7 + $0xb0] sm:$0xff] }
 0x81e   : > { %v2637_v7 = vpack.c.bf16 %v2603_v57, %v2602_v56  ;;  %v2750_v46 = vld [vmem:[%s6408_s7 + $0x138] sm:$0xff]  ;;  %v2656_v57 = vsel %vm549_vm0, %v2642_v58, 0 }
 0x81f   : > { %2442 = vadd.xlane.f32.xlu1 %v2441_v12  ;;  %v2629_v12 = vpack.c.bf16 %v2587_v35, %v2586_v55  ;;  %v2781_v1 = vpack.c.bf16 %v2750_v46, %v2749_v60  ;;  %v2745_v55 = vld [vmem:[%s6408_s7 + $0x110] sm:$0xff]  ;;  %v2746_v35 = vld [vmem:[%s6408_s7 + $0x118] sm:$0xff]  ;;  %2723 = vmatpush.bf16.msrb.mxu1 %v2656_v57 }
 0x820   : > { %2691 = vmatpush.bf16.msra.mxu0 %v2637_v7  ;;  %2803 = vmatpush.bf16.msrb.mxu3 %v2782_v45  ;;  %v2779_v31 = vpack.c.bf16 %v2746_v35, %v2745_v55 }
 0x821   : > { %2660 = vmatpush.bf16.msrb.mxu2 %v2631_v37  ;;  %v2747_v37 = vld [vmem:[%s6408_s7 + $0x120] sm:$0xff] }
 0x822   : > { %v2780_v50 = vpack.c.bf16 %v2748_v48, %v2747_v37 }
 0x824   : > { %2692 = vmatpush.bf16.msra.mxu0 %v2636_v16  ;;  %2804 = vmatpush.bf16.msrb.mxu3 %v2781_v1 }
 0x825   : > { %2661 = vmatpush.bf16.msrb.mxu2 %v2630_v42  ;;  %v2580_v42 = vld [vmem:[%s6408_s7] sm:$0xff] }
 0x826   : > { %v2626_v13 = vpack.c.bf16 %v2581_v43, %v2580_v42 }
 0x828   : > { %2693 = vmatpush.bf16.msra.mxu0 %v2635_v4  ;;  %2805 = vmatpush.bf16.msrb.mxu3 %v2780_v50 }
 0x829   : > { %2662 = vmatpush.bf16.msrb.mxu2 %v2629_v12  ;;  %v2634_v12 = vpack.c.bf16 %v2597_v27, %v2596_v61 }
 0x82c   : > { %2694 = vmatpush.bf16.msra.mxu0 %v2634_v12  ;;  %2806 = vmatpush.bf16.msrb.mxu3 %v2779_v31 }
 0x82d   : > { %2663 = vmatpush.bf16.msrb.mxu2 %v2628_v51 }
 0x831   : > { %2664 = vmatpush.bf16.msrb.mxu2 %v2627_v17 }
 0x835   : > { %2665 = vmatpush.bf16.msrb.mxu2 %v2626_v13 }
 0x85a   : > { %v5984_v21 = vpop.xlane.xlu0 %2407 }
 0x85b   : > { %4495 = vrsqrt.f32 %v5984_v21  ;;  %vm2451_vm4 = vcmp.eq.f32.partialorder %v5984_v21, inf  ;;  %v2454_v46 = vand.u32 2147483648, %v5984_v21  ;;  %vm2453_vm5 = vcmp.eq.f32.partialorder %v5984_v21, 0.0 }
 0x861   : > { %v4496_v3 = vpop.eup %4495 }
 0x862   : > { %v2445_v30 = vmul.f32 %v4496_v3, %v5984_v21  ;;  %v2413_v36 = vpop.xlane.xlu1 %2412 }
 0x863   : > { %4497 = vrsqrt.f32 %v2413_v36  ;;  %vm2463_vm6 = vcmp.eq.f32.partialorder %v2413_v36, inf  ;;  %v2466_v48 = vand.u32 2147483648, %v2413_v36  ;;  %vm2465_vm7 = vcmp.eq.f32.partialorder %v2413_v36, 0.0 }
 0x864   : > { %v2446_v52 = vmul.f32 %v4496_v3, %v2445_v30 }
 0x866   : > { %v2447_v56 = vmul.f32 0.5, %v2446_v52 }
 0x868   : > { %v2448_v62 = vsub.f32 1.5, %v2447_v56 }
 0x869   : > { %v4498_v7 = vpop.eup %4497 }
 0x86a   : > { %v2449_v45 = vmul.f32 %v4496_v3, %v2448_v62  ;;  %v2457_v14 = vmul.f32 %v4498_v7, %v2413_v36  ;;  %v2418_v40 = vpop.xlane.xlu1 %2417 }
 0x86b   : > { %4499 = vrsqrt.f32 %v2418_v40  ;;  %vm2475_vm8 = vcmp.eq.f32.partialorder %v2418_v40, inf  ;;  %v2478_v27 = vand.u32 2147483648, %v2418_v40  ;;  %vm2477_vm9 = vcmp.eq.f32.partialorder %v2418_v40, 0.0 }
 0x86c   : > { %v2450_v26 = vmul.f32 %v2449_v45, %v5984_v21  ;;  %v2458_v51 = vmul.f32 %v4498_v7, %v2457_v14 }
 0x86e   : > { %v2459_v8 = vmul.f32 0.5, %v2458_v51  ;;  %v2452_v60 = vsel %vm2451_vm4, %v5984_v21, %v2450_v26 }
 0x86f   : > { %v2455_v19 = vsel %vm2453_vm5, %v2454_v46, %v2452_v60 }
 0x870   : > { %v2460_v16 = vsub.f32 1.5, %v2459_v8  ;;  %v2540_v37 = vadd.f32 1e-10, %v2455_v19 }
 0x871   : > { %v4500_v1 = vpop.eup %4499 }
 0x872   : > { %v2461_v6 = vmul.f32 %v4498_v7, %v2460_v16  ;;  %v2469_v44 = vmul.f32 %v4500_v1, %v2418_v40  ;;  %v2423_v3 = vpop.xlane.xlu2 %2422 }
 0x873   : > { %4501 = vrsqrt.f32 %v2423_v3  ;;  %vm2487_vm10 = vcmp.eq.f32.partialorder %v2423_v3, inf  ;;  %vm2489_vm11 = vcmp.eq.f32.partialorder %v2423_v3, 0.0 }
 0x874   : > { %v2462_v17 = vmul.f32 %v2461_v6, %v2413_v36  ;;  %v2470_v49 = vmul.f32 %v4500_v1, %v2469_v44  ;;  %4503 = vrcp.f32 %v2540_v37  ;;  %v2775_v44 = vld [vmem:[%s6408_s7 + $0x200] sm:$0xff] }
 0x876   : > { %v2464_v30 = vsel %vm2463_vm6, %v2413_v36, %v2462_v17  ;;  %v2471_v4 = vmul.f32 0.5, %v2470_v49 }
 0x877   : > { %v2467_v50 = vsel %vm2465_vm7, %v2466_v48, %v2464_v30 }
 0x878   : > { %v2541_v15 = vadd.f32 1e-10, %v2467_v50  ;;  %v2472_v32 = vsub.f32 1.5, %v2471_v4  ;;  %v2773_v4 = vld [vmem:[%s6408_s7 + $0x1f0] sm:$0xff]  ;;  %v2774_v50 = vld [vmem:[%s6408_s7 + $0x1f8] sm:$0xff] }
 0x879   : > { %v4502_v52 = vpop.eup %4501 }
 0x87a   : > { %4505 = vrcp.f32 %v2541_v15  ;;  %v2473_v21 = vmul.f32 %v4500_v1, %v2472_v32  ;;  %v2481_v42 = vmul.f32 %v4502_v52, %v2423_v3  ;;  %v6054_v43 = vpop.xlane.xlu2 %2427  ;;  %v4504_v36 = vpop.eup %4503 }
 0x87b   : > { %4507 = vrsqrt.f32 %v6054_v43  ;;  %v2556_v51 = vmul.f32 %v4504_v36, %v5689_v28  ;;  %v2557_v8 = vmul.f32 %v4504_v36, %v5692_v47  ;;  %v2558_v60 = vmul.f32 %v4504_v36, %v5706_v10 }
 0x87c   : > { %v2474_v61 = vmul.f32 %v2473_v21, %v2418_v40  ;;  %v2482_v58 = vmul.f32 %v4502_v52, %v2481_v42  ;;  %v2771_v21 = vld [vmem:[%s6408_s7 + $0x1e0] sm:$0xff]  ;;  %v2772_v42 = vld [vmem:[%s6408_s7 + $0x1e8] sm:$0xff]  ;;  %vm2499_vm12 = vcmp.eq.f32.partialorder %v6054_v43, inf  ;;  %vm2501_vm13 = vcmp.eq.f32.partialorder %v6054_v43, 0.0 }
 0x87d   : > { %v2792_v36 = vpack.c.bf16 %v2772_v42, %v2771_v21  ;;  %v2763_v42 = vld [vmem:[%s6408_s7 + $0x1a0] sm:$0xff] }
 0x87e   : > { %v2476_v13 = vsel %vm2475_vm8, %v2418_v40, %v2474_v61  ;;  %v2483_v55 = vmul.f32 0.5, %v2482_v58  ;;  %v2502_v61 = vand.u32 2147483648, %v6054_v43 }
 0x87f   : > { %v2479_v56 = vsel %vm2477_vm9, %v2478_v27, %v2476_v13 }
 0x880   : > { %v4506_v35 = vpop.eup %4505  ;;  %v2484_v12 = vsub.f32 1.5, %v2483_v55  ;;  %v2542_v40 = vadd.f32 1e-10, %v2479_v56 }
 0x881   : > { %v4508_v57 = vpop.eup %4507  ;;  %v2559_v31 = vmul.f32 %v4506_v35, %v5716_v41  ;;  %v2560_v62 = vmul.f32 %v4506_v35, %v5719_v33  ;;  %v2561_v7 = vmul.f32 %v4506_v35, %v5734_v2  ;;  %v2490_v2 = vand.u32 2147483648, %v2423_v3 }
 0x882   : > { %v2485_v45 = vmul.f32 %v4502_v52, %v2484_v12  ;;  %v2493_v14 = vmul.f32 %v4508_v57, %v6054_v43  ;;  %v6061_v26 = vpop.xlane.xlu1 %2432  ;;  %v2793_v52 = vpack.c.bf16 %v2774_v50, %v2773_v4  ;;  %v2769_v12 = vld [vmem:[%s6408_s7 + $0x1d0] sm:$0xff] }
 0x883   : > { %4509 = vrsqrt.f32 %v6061_v26  ;;  %v2614_v16 = vpack.c.bf16 %v2559_v31, %v2556_v51  ;;  %v6067_v33 = vpack.c.bf16 %v2560_v62, %v2557_v8  ;;  %v6069_v1 = vpack.c.bf16 %v2561_v7, %v2558_v60 }
 0x884   : > { %v2486_v46 = vmul.f32 %v2485_v45, %v2423_v3  ;;  %v2494_v41 = vmul.f32 %v4508_v57, %v2493_v14  ;;  %4511 = vrcp.f32 %v2542_v40  ;;  %vm2511_vm14 = vcmp.eq.f32.partialorder %v6061_v26, inf }
 0x885   : > { %2666 = vmatmul.bf16.vlgmr.msrb.gmra.mxu2 %v2614_v16  ;;  %2695 = vmatmul.bf16.vlgmr.msra.gmra.mxu0 %v6067_v33  ;;  %vm2513_vm15 = vcmp.eq.f32.partialorder %v6061_v26, 0.0 }
 0x886   : > { %v2488_v19 = vsel %vm2487_vm10, %v2423_v3, %v2486_v46  ;;  %v2495_v6 = vmul.f32 0.5, %v2494_v41  ;;  %4165 = vmatmul.msk.bf16.vlgmr.msrb.gmra.mxu1 %vm536_vm1, %v6069_v1  ;;  %2807 = vmatmul.bf16.vlgmr.msrb.gmra.mxu3 %v2614_v16  ;;  %v2776_v3 = vld [vmem:[%s6408_s7 + $0x208] sm:$0xff] }
 0x887   : > { %v2491_v28 = vsel %vm2489_vm11, %v2490_v2, %v2488_v19  ;;  %v2794_v49 = vpack.c.bf16 %v2776_v3, %v2775_v44  ;;  %v2765_v44 = vld [vmem:[%s6408_s7 + $0x1b0] sm:$0xff] }
 0x888   : > { %v2543_v47 = vadd.f32 1e-10, %v2491_v28  ;;  %v2496_v10 = vsub.f32 1.5, %v2495_v6  ;;  %v2767_v6 = vld [vmem:[%s6408_s7 + $0x1c0] sm:$0xff]  ;;  %v2768_v28 = vld [vmem:[%s6408_s7 + $0x1c8] sm:$0xff] }
 0x889   : > { %v4510_v17 = vpop.eup %4509  ;;  %2828 = vmatpush.bf16.msra.mxu2 %v2794_v49  ;;  %v2777_v49 = vld [vmem:[%s6408_s7 + $0x210] sm:$0xff] }
 0x88a   : > { %4513 = vrcp.f32 %v2543_v47  ;;  %v2497_v37 = vmul.f32 %v4508_v57, %v2496_v10  ;;  %v2505_v48 = vmul.f32 %v4510_v17, %v6061_v26  ;;  %v6081_v30 = vpop.xlane.xlu2 %2437  ;;  %v4512_v58 = vpop.eup %4511  ;;  %v2770_v57 = vld [vmem:[%s6408_s7 + $0x1d8] sm:$0xff] }
 0x88b   : > { %4515 = vrsqrt.f32 %v6081_v30  ;;  %v2562_v62 = vmul.f32 %v4512_v58, %v5744_v54  ;;  %v2563_v60 = vmul.f32 %v4512_v58, %v5747_v59  ;;  %v2564_v46 = vmul.f32 %v4512_v58, %v5762_v11 }
 0x88c   : > { %v2498_v15 = vmul.f32 %v2497_v37, %v6054_v43  ;;  %v2506_v32 = vmul.f32 %v4510_v17, %v2505_v48  ;;  %v2791_v54 = vpack.c.bf16 %v2770_v57, %v2769_v12  ;;  %v2778_v37 = vld [vmem:[%s6408_s7 + $0x218] sm:$0x3]  ;;  %vm2523_vm3 = vcmp.eq.f32.partialorder %v6081_v30, inf }
 0x88d   : > { %2829 = vmatpush.bf16.msra.mxu2 %v2793_v52  ;;  %v2795_v50 = vpack.c.bf16 %v2778_v37, %v2777_v49  ;;  %vm2525_vm4 = vcmp.eq.f32.partialorder %v6081_v30, 0.0 }
 0x88e   : > { %v2500_v13 = vsel %vm2499_vm12, %v6054_v43, %v2498_v15  ;;  %v2507_v27 = vmul.f32 0.5, %v2506_v32 }
 0x88f   : > { %v2503_v55 = vsel %vm2501_vm13, %v2502_v61, %v2500_v13  ;;  %v2764_v61 = vld [vmem:[%s6408_s7 + $0x1a8] sm:$0xff]  ;;  %v2797_v58 = vsel %vm549_vm0, %v2795_v50, 0 }
 0x890   : > { %v4514_v35 = vpop.eup %4513  ;;  %v2508_v56 = vsub.f32 1.5, %v2507_v27  ;;  %v2544_v14 = vadd.f32 1e-10, %v2503_v55  ;;  %v2526_v27 = vand.u32 2147483648, %v6081_v30  ;;  %2864 = vmatpush.bf16.msrb.mxu0 %v2797_v58 }
 0x891   : > { %v4516_v31 = vpop.eup %4515  ;;  %v2565_v7 = vmul.f32 %v4514_v35, %v5772_v29  ;;  %v2566_v43 = vmul.f32 %v4514_v35, %v5775_v63  ;;  %v2567_v45 = vmul.f32 %v4514_v35, %v5790_v38  ;;  %2830 = vmatpush.bf16.msra.mxu2 %v2792_v36  ;;  %v2514_v38 = vand.u32 2147483648, %v6061_v26 }
 0x892   : > { %v2509_v51 = vmul.f32 %v4510_v17, %v2508_v56  ;;  %v2517_v8 = vmul.f32 %v4516_v31, %v6081_v30  ;;  %v6112_v40 = vpop.xlane.xlu1 %2442  ;;  %v2766_v17 = vld [vmem:[%s6408_s7 + $0x1b8] sm:$0xff] }
 0x893   : > { %4517 = vrsqrt.f32 %v6112_v40  ;;  %v2617_v63 = vpack.c.bf16 %v2565_v7, %v2562_v62  ;;  %v6118_v16 = vpack.c.bf16 %v2566_v43, %v2563_v60  ;;  %v6122_v2 = vpack.c.bf16 %v2567_v45, %v2564_v46 }
 0x894   : > { %v2510_v29 = vmul.f32 %v2509_v51, %v6061_v26  ;;  %v2518_v41 = vmul.f32 %v4516_v31, %v2517_v8  ;;  %4519 = vrcp.f32 %v2544_v14  ;;  %v2789_v21 = vpack.c.bf16 %v2766_v17, %v2765_v44 }
 0x895   : > { %2671 = vmatmul.bf16.gmra.mxu2 %v2617_v63  ;;  %2700 = vmatmul.bf16.gmra.mxu0 %v6118_v16  ;;  %vm2535_vm5 = vcmp.eq.f32.partialorder %v6112_v40, inf  ;;  %vm2537_vm6 = vcmp.eq.f32.partialorder %v6112_v40, 0.0 }
 0x896   : > { %v2512_v59 = vsel %vm2511_vm14, %v6061_v26, %v2510_v29  ;;  %v2519_v11 = vmul.f32 0.5, %v2518_v41  ;;  %4166 = vmatmul.msk.bf16.gmra.mxu1 %vm536_vm1, %v6122_v2  ;;  %2812 = vmatmul.bf16.gmra.mxu3 %v2617_v63  ;;  %v2790_v26 = vpack.c.bf16 %v2768_v28, %v2767_v6 }
 0x897   : > { %v2515_v19 = vsel %vm2513_vm15, %v2514_v38, %v2512_v59  ;;  %2831 = vmatpush.bf16.msra.mxu2 %v2791_v54 }
 0x898   : > { %v2545_v47 = vadd.f32 1e-10, %v2515_v19  ;;  %v2520_v10 = vsub.f32 1.5, %v2519_v11 }
 0x899   : > { %v4518_v3 = vpop.eup %4517 }
 0x89a   : > { %4521 = vrcp.f32 %v2545_v47  ;;  %v2521_v48 = vmul.f32 %v4516_v31, %v2520_v10  ;;  %v2529_v4 = vmul.f32 %v4518_v3, %v6112_v40  ;;  %v4520_v15 = vpop.eup %4519  ;;  %v2788_v31 = vpack.c.bf16 %v2764_v61, %v2763_v42 }
 0x89b   : > { %2832 = vmatpush.bf16.msra.mxu2 %v2790_v26  ;;  %v2568_v36 = vmul.f32 %v4520_v15, %v5800_v0  ;;  %v2569_v57 = vmul.f32 %v4520_v15, %v5803_v24  ;;  %v2570_v43 = vmul.f32 %v4520_v15, %v5818_v9  ;;  %v2762_v0 = vld [vmem:[%s6408_s7 + $0x198] sm:$0xff]  ;;  %v2538_v9 = vand.u32 2147483648, %v6112_v40 }
 0x89c   : > { %v2522_v32 = vmul.f32 %v2521_v48, %v6081_v30  ;;  %v2530_v52 = vmul.f32 %v4518_v3, %v2529_v4 }
 0x89e   : > { %v2524_v13 = vsel %vm2523_vm3, %v6081_v30, %v2522_v32  ;;  %v2531_v55 = vmul.f32 0.5, %v2530_v52  ;;  %v2761_v30 = vld [vmem:[%s6408_s7 + $0x190] sm:$0xff] }
 0x89f   : > { %v2527_v56 = vsel %vm2525_vm4, %v2526_v27, %v2524_v13  ;;  %2833 = vmatpush.bf16.msra.mxu2 %v2789_v21 }
 0x8a0   : > { %v4522_v35 = vpop.eup %4521  ;;  %v2532_v12 = vsub.f32 1.5, %v2531_v55  ;;  %v2546_v24 = vadd.f32 1e-10, %v2527_v56 }
 0x8a1   : > { %v2571_v62 = vmul.f32 %v4522_v35, %v5828_v23  ;;  %v2572_v7 = vmul.f32 %v4522_v35, %v5831_v22  ;;  %v2573_v45 = vmul.f32 %v4522_v35, %v5846_v25  ;;  %v2787_v22 = vpack.c.bf16 %v2762_v0, %v2761_v30 }
 0x8a2   : > { %v2533_v14 = vmul.f32 %v4518_v3, %v2532_v12  ;;  %4523 = vrcp.f32 %v2546_v24 }
 0x8a3   : > { %v2620_v51 = vpack.c.bf16 %v2571_v62, %v2568_v36  ;;  %v2621_v8 = vpack.c.bf16 %v2572_v7, %v2569_v57  ;;  %v2622_v60 = vpack.c.bf16 %v2573_v45, %v2570_v43  ;;  %2834 = vmatpush.bf16.msra.mxu2 %v2788_v31 }
 0x8a4   : > { %v2534_v23 = vmul.f32 %v2533_v14, %v6112_v40 }
 0x8a5   : > { %2676 = vmatmul.bf16.gmra.mxu2 %v2620_v51  ;;  %2705 = vmatmul.bf16.gmra.mxu0 %v2621_v8 }
 0x8a6   : > { %v2536_v25 = vsel %vm2535_vm5, %v6112_v40, %v2534_v23  ;;  %4167 = vmatmul.msk.bf16.gmra.mxu1 %vm536_vm1, %v2622_v60  ;;  %2817 = vmatmul.bf16.gmra.mxu3 %v2620_v51 }
 0x8a7   : > { %v2539_v46 = vsel %vm2537_vm6, %v2538_v9, %v2536_v25  ;;  %2835 = vmatpush.bf16.msra.mxu2 %v2787_v22 }
 0x8a8   : > { %v2547_v54 = vadd.f32 1e-10, %v2539_v46  ;;  %v4524_v29 = vpop.eup %4523 }
 0x8a9   : > { %v2574_v63 = vmul.f32 %v4524_v29, %v5854_v20  ;;  %v2575_v38 = vmul.f32 %v4524_v29, %v5857_v53  ;;  %v2576_v11 = vmul.f32 %v4524_v29, %v5870_v39 }
 0x8aa   : > { %4525 = vrcp.f32 %v2547_v54 }
 0x8b0   : > { %v4526_v41 = vpop.eup %4525 }
 0x8b1   : > { %v2577_v59 = vmul.f32 %v4526_v41, %v5876_v5  ;;  %v2578_v40 = vmul.f32 %v4526_v41, %v5879_v18  ;;  %v2579_v19 = vmul.f32 %v4526_v41, %v5889_v34 }
 0x8b3   : > { %v2623_v6 = vpack.c.bf16 %v2577_v59, %v2574_v63  ;;  %v2624_v28 = vpack.c.bf16 %v2578_v40, %v2575_v38  ;;  %v2625_v47 = vpack.c.bf16 %v2579_v19, %v2576_v11 }
 0x8b5   : > { %2681 = vmatmul.bf16.gmra.mxu2 %v2623_v6  ;;  %2710 = vmatmul.bf16.gmra.mxu0 %v2624_v28 }
 0x8b6   : > { %4168 = vmatmul.msk.bf16.gmra.mxu1 %vm536_vm1, %v2625_v47  ;;  %2822 = vmatmul.bf16.gmra.mxu3 %v2623_v6  ;;  %v4271_v6 = vld [vmem:[%s6199_s20] sm:$0xff] }
 0x8c5   : > { %2836 = vmatmul.bf16.vlgmr.msra.gmra.mxu2 %v6067_v33  ;;  %4169 = vmatmul.msk.bf16.vlgmr.msrb.gmra.mxu0 %vm536_vm1, %v6069_v1 }
 0x8d5   : > { %2841 = vmatmul.bf16.gmra.mxu2 %v6118_v16  ;;  %4170 = vmatmul.msk.bf16.gmra.mxu0 %vm536_vm1, %v6122_v2 }
 0x8e5   : > { %2846 = vmatmul.bf16.gmra.mxu2 %v2621_v8  ;;  %4171 = vmatmul.msk.bf16.gmra.mxu0 %vm536_vm1, %v2622_v60 }
 0x8f5   : > { %2851 = vmatmul.bf16.gmra.mxu2 %v2624_v28  ;;  %4172 = vmatmul.msk.bf16.gmra.mxu0 %vm536_vm1, %v2625_v47 }
 0x902   : > { %v2696_v20 = vpop.f32.mrf.mxu0 }
 0x903   : > { %v2725_v53 = vpop.f32.mrf.mxu1 }
 0x908   : > { %v2667_v39 = vpop.f32.mrf.mxu2 }
 0x909   : > { %v2697_v5 = vadd.f32 %v2696_v20, %v2667_v39  ;;  %v2808_v21 = vpop.f32.mrf.mxu3 }
 0x90a   : > { %v2698_v18 = vpop.f32.mrf.mxu0 }
 0x90b   : > { %v2726_v34 = vadd.f32 %v2725_v53, %v2697_v5  ;;  %v2727_v33 = vpop.f32.mrf.mxu1 }
 0x910   : > { %v2669_v10 = vpop.f32.mrf.mxu2 }
 0x911   : > { %v2810_v57 = vpop.f32.mrf.mxu3  ;;  %v2699_v0 = vadd.f32 %v2698_v18, %v2669_v10  ;;  %v4272_v18 = vld [vmem:[%s6199_s20 + $0x8] sm:$0xff] }
 0x912   : > { %v2701_v1 = vpop.f32.mrf.mxu0 }
 0x913   : > { %v2730_v26 = vpop.f32.mrf.mxu1  ;;  %v2728_v22 = vadd.f32 %v2727_v33, %v2699_v0  ;;  %v4286_v0 = vld [vmem:[%s360_s23 + $0x38] sm:$0xff] }
 0x915   : > { %v2886_v54 = vpack.c.bf16 %v2728_v22, %v2726_v34 }
 0x918   : > { %v2672_v16 = vpop.f32.mrf.mxu2 }
 0x919   : > { %v2702_v43 = vadd.f32 %v2701_v1, %v2672_v16  ;;  %v2813_v25 = vpop.f32.mrf.mxu3 }
 0x91a   : > { %v2703_v44 = vpop.f32.mrf.mxu0 }
 0x91b   : > { %v2732_v3 = vpop.f32.mrf.mxu1  ;;  %v2731_v60 = vadd.f32 %v2730_v26, %v2702_v43  ;;  %v4285_v43 = vld [vmem:[%s360_s23 + $0x30] sm:$0xff] }
 0x920   : > { %v2674_v2 = vpop.f32.mrf.mxu2 }
 0x921   : > { %v2704_v31 = vadd.f32 %v2703_v44, %v2674_v2  ;;  %v2815_v41 = vpop.f32.mrf.mxu3 }
 0x922   : > { %v2706_v17 = vpop.f32.mrf.mxu0 }
 0x923   : > { %v2735_v49 = vpop.f32.mrf.mxu1  ;;  %v2733_v14 = vadd.f32 %v2732_v3, %v2704_v31  ;;  %v4283_v31 = vld [vmem:[%s360_s23 + $0x20] sm:$0xff] }
 0x925   : > { %v2887_v9 = vpack.c.bf16 %v2733_v14, %v2731_v60  ;;  %v3281_v60 = vld [vmem:[%s6408_s7 + $0x220] sm:$0xff] }
 0x928   : > { %v2677_v37 = vpop.f32.mrf.mxu2 }
 0x929   : > { %v2707_v35 = vadd.f32 %v2706_v17, %v2677_v37  ;;  %v2818_v40 = vpop.f32.mrf.mxu3 }
 0x92a   : > { %v2708_v48 = vpop.f32.mrf.mxu0 }
 0x92b   : > { %v2737_v4 = vpop.f32.mrf.mxu1  ;;  %v2736_v45 = vadd.f32 %v2735_v49, %v2707_v35  ;;  %v4281_v35 = vld [vmem:[%s360_s23 + $0x10] sm:$0xff] }
 0x930   : > { %v2679_v50 = vpop.f32.mrf.mxu2 }
 0x931   : > { %v2709_v13 = vadd.f32 %v2708_v48, %v2679_v50  ;;  %v2820_v28 = vpop.f32.mrf.mxu3  ;;  %v4273_v50 = vld [vmem:[%s6199_s20 + $0x10] sm:$0xff] }
 0x932   : > { %v2711_v15 = vpop.f32.mrf.mxu0 }
 0x933   : > { %v2740_v32 = vpop.f32.mrf.mxu1  ;;  %v2738_v62 = vadd.f32 %v2737_v4, %v2709_v13  ;;  %v4279_v13 = vld [vmem:[%s360_s23] sm:$0xff] }
 0x935   : > { %v2888_v51 = vpack.c.bf16 %v2738_v62, %v2736_v45  ;;  %v4278_v62 = vld [vmem:[%s6199_s20 + $0x38] sm:$0xff] }
 0x938   : > { %v2682_v52 = vpop.f32.mrf.mxu2 }
 0x939   : > { %v2712_v61 = vadd.f32 %v2711_v15, %v2682_v52  ;;  %v2823_v53 = vpop.f32.mrf.mxu3 }
 0x93a   : > { %v2713_v42 = vpop.f32.mrf.mxu0 }
 0x93b   : > { %v2742_v55 = vpop.f32.mrf.mxu1  ;;  %v2741_v56 = vadd.f32 %v2740_v32, %v2712_v61 }
 0x940   : > { %v2684_v58 = vpop.f32.mrf.mxu2 }
 0x941   : > { %v2714_v27 = vadd.f32 %v2713_v42, %v2684_v58  ;;  %v2825_v33 = vpop.f32.mrf.mxu3 }
 0x942   : > { %v2866_v36 = vpop.f32.mrf.mxu0 }
 0x943   : > { %v2743_v12 = vadd.f32 %v2742_v55, %v2714_v27  ;;  %v4274_v27 = vld [vmem:[%s6199_s20 + $0x18] sm:$0xff]  ;;  %v4280_v55 = vld [vmem:[%s360_s23 + $0x8] sm:$0xff] }
 0x945   : > { %v2889_v7 = vpack.c.bf16 %v2743_v12, %v2741_v56  ;;  %v4276_v56 = vld [vmem:[%s6199_s20 + $0x28] sm:$0xff]  ;;  %v4282_v12 = vld [vmem:[%s360_s23 + $0x18] sm:$0xff] }
 0x947   : > { %3075 = vmatpush.bf16.msra.mxu3 %v2889_v7  ;;  %v4284_v7 = vld [vmem:[%s360_s23 + $0x28] sm:$0xff] }
 0x948   : > { %v2837_v30 = vpop.f32.mrf.mxu2 }
 0x949   : > { %v2838_v24 = vadd.f32 %v2837_v30, %v2808_v21 }
 0x94a   : > { %v2868_v8 = vpop.f32.mrf.mxu0 }
 0x94b   : > { %v2867_v23 = vadd.f32 %v2866_v36, %v2838_v24  ;;  %3076 = vmatpush.bf16.msra.mxu3 %v2888_v51  ;;  %v4275_v36 = vld [vmem:[%s6199_s20 + $0x20] sm:$0xff]  ;;  %v6233_v24 = vld [vmem:[%s6408_s7 + $0x230] sm:$0x7] }
 0x94c   : > { %v6236_v51 = vperm.slane %v6233_v24, 0 }
 0x94f   : > { %3077 = vmatpush.bf16.msra.mxu3 %v2887_v9 }
 0x950   : > { %v2839_v46 = vpop.f32.mrf.mxu2 }
 0x951   : > { %v2840_v15 = vadd.f32 %v2839_v46, %v2810_v57  ;;  %v4277_v57 = vld [vmem:[%s6199_s20 + $0x30] sm:$0xff] }
 0x952   : > { %v2871_v29 = vpop.f32.mrf.mxu0 }
 0x953   : > { %3078 = vmatpush.bf16.msra.mxu3 %v2886_v54  ;;  %v2869_v42 = vadd.f32 %v2868_v8, %v2840_v15 }
 0x955   : > { %v2890_v58 = vpack.c.bf16 %v2869_v42, %v2867_v23  ;;  %v3282_v23 = vld [vmem:[%s6408_s7 + $0x228] sm:$0x3] }
 0x956   : > { %4245 = vmatmul.msk.bf16.vlgmr.msra.gmra.mxu3 %vm771_vm2, %v4271_v6 }
 0x958   : > { %v2842_v63 = vpop.f32.mrf.mxu2 }
 0x959   : > { %v2843_v48 = vadd.f32 %v2842_v63, %v2813_v25  ;;  %v3291_v25 = vpack.c.bf16 %v3282_v23, %v3281_v60 }
 0x95a   : > { %v2873_v38 = vpop.f32.mrf.mxu0 }
 0x95b   : > { %v2872_v21 = vadd.f32 %v2871_v29, %v2843_v48  ;;  %v3318_v54 = vsel %vm549_vm0, %v3291_v25, 0 }
 0x95c   : > { %3327 = vmatpush.bf16.msrb.mxu2 %v3318_v54 }
 0x960   : > { %v2844_v59 = vpop.f32.mrf.mxu2 }
 0x961   : > { %v2845_v17 = vadd.f32 %v2844_v59, %v2815_v41 }
 0x962   : > { %v2876_v11 = vpop.f32.mrf.mxu0 }
 0x963   : > { %v2874_v32 = vadd.f32 %v2873_v38, %v2845_v17 }
 0x965   : > { %v2891_v61 = vpack.c.bf16 %v2874_v32, %v2872_v21 }
 0x966   : > { %4246 = vmatmul.msk.bf16.gmra.mxu3 %vm771_vm2, %v4272_v18 }
 0x968   : > { %v2847_v19 = vpop.f32.mrf.mxu2 }
 0x969   : > { %v2848_v44 = vadd.f32 %v2847_v19, %v2818_v40 }
 0x96a   : > { %v2878_v47 = vpop.f32.mrf.mxu0 }
 0x96b   : > { %v2877_v4 = vadd.f32 %v2876_v11, %v2848_v44 }
 0x970   : > { %v2849_v20 = vpop.f32.mrf.mxu2 }
 0x971   : > { %v2850_v1 = vadd.f32 %v2849_v20, %v2820_v28 }
 0x972   : > { %v2881_v39 = vpop.f32.mrf.mxu0 }
 0x973   : > { %v2879_v49 = vadd.f32 %v2878_v47, %v2850_v1 }
 0x975   : > { %v2892_v52 = vpack.c.bf16 %v2879_v49, %v2877_v4 }
 0x976   : > { %4247 = vmatmul.msk.bf16.gmra.mxu3 %vm771_vm2, %v4273_v50 }
 0x978   : > { %v2852_v5 = vpop.f32.mrf.mxu2 }
 0x979   : > { %v2853_v34 = vadd.f32 %v2852_v5, %v2823_v53 }
 0x97a   : > { %v2883_v16 = vpop.f32.mrf.mxu0 }
 0x97b   : > { %v2882_v3 = vadd.f32 %v2881_v39, %v2853_v34 }
 0x980   : > { %v2854_v10 = vpop.f32.mrf.mxu2 }
 0x981   : > { %v2855_v26 = vadd.f32 %v2854_v10, %v2825_v33 }
 0x983   : > { %v2884_v2 = vadd.f32 %v2883_v16, %v2855_v26 }
 0x985   : > { %v2893_v37 = vpack.c.bf16 %v2884_v2, %v2882_v3 }
 0x986   : > { %4248 = vmatmul.msk.bf16.gmra.mxu3 %vm771_vm2, %v4274_v27 }
 0x987   : > { %2962 = vmatpush.bf16.msra.mxu1 %v2893_v37 }
 0x98b   : > { %2963 = vmatpush.bf16.msra.mxu1 %v2892_v52 }
 0x98f   : > { %2964 = vmatpush.bf16.msra.mxu1 %v2891_v61 }
 0x993   : > { %2965 = vmatpush.bf16.msra.mxu1 %v2890_v58 }
 0x996   : > { %4205 = vmatmul.msk.bf16.vlgmr.msra.gmra.mxu1 %vm771_vm2, %v4279_v13  ;;  %4249 = vmatmul.msk.bf16.gmra.mxu3 %vm771_vm2, %v4275_v36 }
 0x9a6   : > { %4206 = vmatmul.msk.bf16.gmra.mxu1 %vm771_vm2, %v4280_v55  ;;  %4250 = vmatmul.msk.bf16.gmra.mxu3 %vm771_vm2, %v4276_v56 }
 0x9b6   : > { %4207 = vmatmul.msk.bf16.gmra.mxu1 %vm771_vm2, %v4281_v35  ;;  %4251 = vmatmul.msk.bf16.gmra.mxu3 %vm771_vm2, %v4277_v57 }
 0x9c6   : > { %4208 = vmatmul.msk.bf16.gmra.mxu1 %vm771_vm2, %v4282_v12  ;;  %4252 = vmatmul.msk.bf16.gmra.mxu3 %vm771_vm2, %v4278_v62 }
 0x9d6   : > { %4209 = vmatmul.msk.bf16.gmra.mxu1 %vm771_vm2, %v4283_v31 }
 0x9d9   : > { %v3080_v45 = vpop.f32.mrf.mxu3 }
 0x9e1   : > { %v3082_v30 = vpop.f32.mrf.mxu3 }
 0x9e6   : > { %4210 = vmatmul.msk.bf16.gmra.mxu1 %vm771_vm2, %v4284_v7 }
 0x9e9   : > { %v3085_v14 = vpop.f32.mrf.mxu3 }
 0x9f1   : > { %v3087_v22 = vpop.f32.mrf.mxu3 }
 0x9f6   : > { %4211 = vmatmul.msk.bf16.gmra.mxu1 %vm771_vm2, %v4285_v43 }
 0x9f9   : > { %v3090_v40 = vpop.f32.mrf.mxu3 }
 0xa01   : > { %v3092_v34 = vpop.f32.mrf.mxu3 }
 0xa06   : > { %4212 = vmatmul.msk.bf16.gmra.mxu1 %vm771_vm2, %v4286_v0 }
 0xa09   : > { %v3095_v32 = vpop.f32.mrf.mxu3 }
 0xa11   : > { %v3097_v62 = vpop.f32.mrf.mxu3 }
 0xa13   : > { %v2967_v8 = vpop.f32.mrf.mxu1 }
 0xa14   : > { %v3081_v9 = vadd.f32 %v3080_v45, %v2967_v8 }
 0xa16   : > { %v3121_v46 = vadd.f32 %v6236_v51, %v3081_v9 }
 0xa18   : > { %v3153_v29 = vmul.f32 0.044715, %v3121_v46  ;;  %v3137_v4 = vmul.f32 0.5, %v3121_v46 }
 0xa1a   : > { %v3169_v41 = vmul.f32 %v3153_v29, %v3121_v46 }
 0xa1b   : > { %v2969_v63 = vpop.f32.mrf.mxu1 }
 0xa1c   : > { %v3185_v38 = vmul.f32 %v3169_v41, %v3121_v46  ;;  %v3083_v59 = vadd.f32 %v3082_v30, %v2969_v63 }
 0xa1e   : > { %v3201_v11 = vadd.f32 %v3185_v38, %v3121_v46  ;;  %v3122_v19 = vadd.f32 %v6236_v51, %v3083_v59 }
 0xa20   : > { %v3154_v6 = vmul.f32 0.044715, %v3122_v19  ;;  %v3217_v28 = vmul.f32 0.7978846, %v3201_v11  ;;  %v3138_v50 = vmul.f32 0.5, %v3122_v19 }
 0xa22   : > { %v3170_v47 = vmul.f32 %v3154_v6, %v3122_v19  ;;  %4527 = vtanh.f32 %v3217_v28 }
 0xa23   : > { %v2972_v20 = vpop.f32.mrf.mxu1 }
 0xa24   : > { %v3186_v53 = vmul.f32 %v3170_v47, %v3122_v19  ;;  %v3086_v39 = vadd.f32 %v3085_v14, %v2972_v20 }
 0xa26   : > { %v3202_v5 = vadd.f32 %v3186_v53, %v3122_v19  ;;  %v3123_v18 = vadd.f32 %v6236_v51, %v3086_v39 }
 0xa28   : > { %v3218_v33 = vmul.f32 0.7978846, %v3202_v5  ;;  %v3155_v10 = vmul.f32 0.044715, %v3123_v18  ;;  %v4528_v16 = vpop.eup %4527  ;;  %v3139_v23 = vmul.f32 0.5, %v3123_v18 }
 0xa29   : > { %v3249_v49 = vadd.f32 1.0, %v4528_v16 }
 0xa2a   : > { %4529 = vtanh.f32 %v3218_v33  ;;  %v3171_v1 = vmul.f32 %v3155_v10, %v3123_v18 }
 0xa2b   : > { %v2974_v26 = vpop.f32.mrf.mxu1  ;;  %v3265_v42 = vmul.f32 %v3249_v49, %v3137_v4 }
 0xa2c   : > { %v3187_v44 = vmul.f32 %v3171_v1, %v3123_v18  ;;  %v3088_v3 = vadd.f32 %v3087_v22, %v2974_v26 }
 0xa2e   : > { %v3124_v2 = vadd.f32 %v6236_v51, %v3088_v3  ;;  %v3203_v17 = vadd.f32 %v3187_v44, %v3123_v18 }
 0xa30   : > { %v4530_v37 = vpop.eup %4529  ;;  %v3156_v48 = vmul.f32 0.044715, %v3124_v2  ;;  %v3219_v21 = vmul.f32 0.7978846, %v3203_v17  ;;  %v3140_v22 = vmul.f32 0.5, %v3124_v2 }
 0xa31   : > { %v3250_v15 = vadd.f32 1.0, %v4530_v37 }
 0xa32   : > { %v3172_v52 = vmul.f32 %v3156_v48, %v3124_v2  ;;  %4531 = vtanh.f32 %v3219_v21 }
 0xa33   : > { %v3266_v61 = vmul.f32 %v3250_v15, %v3138_v50  ;;  %v2977_v58 = vpop.f32.mrf.mxu1 }
 0xa34   : > { %v3188_v13 = vmul.f32 %v3172_v52, %v3124_v2  ;;  %v3091_v27 = vadd.f32 %v3090_v40, %v2977_v58  ;;  %v3100_v40 = vpop.f32.mrf.mxu3 }
 0xa35   : > { %v3283_v55 = vpack.c.bf16 %v3266_v61, %v3265_v42 }
 0xa36   : > { %v3125_v36 = vadd.f32 %v6236_v51, %v3091_v27  ;;  %v3204_v35 = vadd.f32 %v3188_v13, %v3124_v2 }
 0xa37   : > { %4253 = vmatmul.msk.bf16.vlgmr.msrb.gmra.mxu2 %vm536_vm1, %v3283_v55 }
 0xa38   : > { %v3157_v56 = vmul.f32 0.044715, %v3125_v36  ;;  %v3220_v12 = vmul.f32 0.7978846, %v3204_v35  ;;  %v4532_v7 = vpop.eup %4531  ;;  %v3141_v16 = vmul.f32 0.5, %v3125_v36 }
 0xa39   : > { %v3251_v14 = vadd.f32 1.0, %v4532_v7 }
 0xa3a   : > { %v3173_v57 = vmul.f32 %v3157_v56, %v3125_v36  ;;  %4533 = vtanh.f32 %v3220_v12 }
 0xa3b   : > { %v2979_v31 = vpop.f32.mrf.mxu1  ;;  %v3267_v29 = vmul.f32 %v3251_v14, %v3139_v23 }
 0xa3c   : > { %v3189_v43 = vmul.f32 %v3173_v57, %v3125_v36  ;;  %v3093_v45 = vadd.f32 %v3092_v34, %v2979_v31  ;;  %v3102_v10 = vpop.f32.mrf.mxu3 }
 0xa3e   : > { %v3126_v30 = vadd.f32 %v6236_v51, %v3093_v45  ;;  %v3205_v0 = vadd.f32 %v3189_v43, %v3125_v36 }
 0xa40   : > { %v4534_v8 = vpop.eup %4533  ;;  %v3158_v60 = vmul.f32 0.044715, %v3126_v30  ;;  %v3221_v46 = vmul.f32 0.7978846, %v3205_v0  ;;  %v3142_v44 = vmul.f32 0.5, %v3126_v30 }
 0xa41   : > { %v3252_v9 = vadd.f32 1.0, %v4534_v8 }
 0xa42   : > { %v3174_v25 = vmul.f32 %v3158_v60, %v3126_v30  ;;  %4535 = vtanh.f32 %v3221_v46 }
 0xa43   : > { %v2982_v54 = vpop.f32.mrf.mxu1  ;;  %v3268_v41 = vmul.f32 %v3252_v9, %v3140_v22 }
 0xa44   : > { %v3190_v63 = vmul.f32 %v3174_v25, %v3126_v30  ;;  %v3096_v38 = vadd.f32 %v3095_v32, %v2982_v54  ;;  %v3105_v61 = vpop.f32.mrf.mxu3 }
 0xa45   : > { %v3284_v59 = vpack.c.bf16 %v3268_v41, %v3267_v29 }
 0xa46   : > { %v3127_v11 = vadd.f32 %v6236_v51, %v3096_v38  ;;  %v3206_v19 = vadd.f32 %v3190_v63, %v3126_v30 }
 0xa47   : > { %4254 = vmatmul.msk.bf16.gmra.mxu2 %vm536_vm1, %v3284_v59 }
 0xa48   : > { %v3159_v6 = vmul.f32 0.044715, %v3127_v11  ;;  %v3222_v28 = vmul.f32 0.7978846, %v3206_v19  ;;  %v4536_v53 = vpop.eup %4535 }
 0xa49   : > { %v3253_v33 = vadd.f32 1.0, %v4536_v53 }
 0xa4a   : > { %v3175_v47 = vmul.f32 %v3159_v6, %v3127_v11  ;;  %4537 = vtanh.f32 %v3222_v28 }
 0xa4b   : > { %v2984_v20 = vpop.f32.mrf.mxu1  ;;  %v3269_v37 = vmul.f32 %v3253_v33, %v3141_v16 }
 0xa4c   : > { %v3191_v39 = vmul.f32 %v3175_v47, %v3127_v11  ;;  %v3098_v5 = vadd.f32 %v3097_v62, %v2984_v20  ;;  %v3143_v62 = vmul.f32 0.5, %v3127_v11  ;;  %v3107_v60 = vpop.f32.mrf.mxu3 }
 0xa4e   : > { %v3128_v18 = vadd.f32 %v6236_v51, %v3098_v5  ;;  %v3207_v34 = vadd.f32 %v3191_v39, %v3127_v11 }
 0xa50   : > { %v4538_v1 = vpop.eup %4537  ;;  %v3160_v26 = vmul.f32 0.044715, %v3128_v18  ;;  %v3223_v17 = vmul.f32 0.7978846, %v3207_v34  ;;  %v3144_v7 = vmul.f32 0.5, %v3128_v18 }
 0xa51   : > { %v3254_v3 = vadd.f32 1.0, %v4538_v1 }
 0xa52   : > { %v3176_v2 = vmul.f32 %v3160_v26, %v3128_v18  ;;  %4539 = vtanh.f32 %v3223_v17 }
 0xa53   : > { %v2987_v49 = vpop.f32.mrf.mxu1  ;;  %v3270_v48 = vmul.f32 %v3254_v3, %v3142_v44 }
 0xa54   : > { %v3192_v4 = vmul.f32 %v3176_v2, %v3128_v18  ;;  %v3101_v50 = vadd.f32 %v3100_v40, %v2987_v49  ;;  %v3110_v11 = vpop.f32.mrf.mxu3 }
 0xa55   : > { %v3285_v15 = vpack.c.bf16 %v3270_v48, %v3269_v37 }
 0xa56   : > { %v3129_v32 = vadd.f32 %v6236_v51, %v3101_v50  ;;  %v3208_v52 = vadd.f32 %v3192_v4, %v3128_v18 }
 0xa57   : > { %4255 = vmatmul.msk.bf16.gmra.mxu2 %vm536_vm1, %v3285_v15 }
 0xa58   : > { %v3161_v21 = vmul.f32 0.044715, %v3129_v32  ;;  %v3224_v42 = vmul.f32 0.7978846, %v3208_v52  ;;  %v4540_v27 = vpop.eup %4539  ;;  %v3145_v53 = vmul.f32 0.5, %v3129_v32 }
 0xa59   : > { %v3255_v12 = vadd.f32 1.0, %v4540_v27 }
 0xa5a   : > { %v3177_v58 = vmul.f32 %v3161_v21, %v3129_v32  ;;  %4541 = vtanh.f32 %v3224_v42 }
 0xa5b   : > { %v2989_v13 = vpop.f32.mrf.mxu1  ;;  %v3271_v14 = vmul.f32 %v3255_v12, %v3143_v62 }
 0xa5c   : > { %v3193_v55 = vmul.f32 %v3177_v58, %v3129_v32  ;;  %v3103_v36 = vadd.f32 %v3102_v10, %v2989_v13  ;;  %v3112_v17 = vpop.f32.mrf.mxu3 }
 0xa5e   : > { %v3130_v35 = vadd.f32 %v6236_v51, %v3103_v36  ;;  %v3209_v56 = vadd.f32 %v3193_v55, %v3129_v32 }
 0xa60   : > { %v4542_v57 = vpop.eup %4541  ;;  %v3162_v31 = vmul.f32 0.044715, %v3130_v35  ;;  %v3225_v30 = vmul.f32 0.7978846, %v3209_v56  ;;  %v3146_v39 = vmul.f32 0.5, %v3130_v35 }
 0xa61   : > { %v3256_v43 = vadd.f32 1.0, %v4542_v57 }
 0xa62   : > { %v3178_v45 = vmul.f32 %v3162_v31, %v3130_v35  ;;  %4543 = vtanh.f32 %v3225_v30 }
 0xa63   : > { %v2992_v0 = vpop.f32.mrf.mxu1  ;;  %v3272_v8 = vmul.f32 %v3256_v43, %v3144_v7 }
 0xa64   : > { %v3194_v23 = vmul.f32 %v3178_v45, %v3130_v35  ;;  %v3106_v22 = vadd.f32 %v3105_v61, %v2992_v0  ;;  %v3115_v13 = vpop.f32.mrf.mxu3 }
 0xa65   : > { %v3286_v9 = vpack.c.bf16 %v3272_v8, %v3271_v14 }
 0xa66   : > { %v3131_v25 = vadd.f32 %v6236_v51, %v3106_v22  ;;  %v3210_v46 = vadd.f32 %v3194_v23, %v3130_v35 }
 0xa67   : > { %4256 = vmatmul.msk.bf16.gmra.mxu2 %vm536_vm1, %v3286_v9 }
 0xa68   : > { %v3163_v54 = vmul.f32 0.044715, %v3131_v25  ;;  %v3226_v29 = vmul.f32 0.7978846, %v3210_v46  ;;  %v4544_v38 = vpop.eup %4543  ;;  %v3147_v27 = vmul.f32 0.5, %v3131_v25 }
 0xa69   : > { %v3257_v28 = vadd.f32 1.0, %v4544_v38 }
 0xa6a   : > { %v3179_v41 = vmul.f32 %v3163_v54, %v3131_v25  ;;  %4545 = vtanh.f32 %v3226_v29 }
 0xa6b   : > { %v2994_v63 = vpop.f32.mrf.mxu1  ;;  %v3273_v10 = vmul.f32 %v3257_v28, %v3145_v53 }
 0xa6c   : > { %v3195_v59 = vmul.f32 %v3179_v41, %v3131_v25  ;;  %v3108_v40 = vadd.f32 %v3107_v60, %v2994_v63  ;;  %v3117_v23 = vpop.f32.mrf.mxu3 }
 0xa6e   : > { %v3132_v19 = vadd.f32 %v6236_v51, %v3108_v40  ;;  %v3211_v6 = vadd.f32 %v3195_v59, %v3131_v25 }
 0xa70   : > { %v4546_v47 = vpop.eup %4545  ;;  %v3164_v20 = vmul.f32 0.044715, %v3132_v19  ;;  %v3227_v34 = vmul.f32 0.7978846, %v3211_v6  ;;  %v3148_v55 = vmul.f32 0.5, %v3132_v19 }
 0xa71   : > { %v3258_v5 = vadd.f32 1.0, %v4546_v47 }
 0xa72   : > { %v3180_v18 = vmul.f32 %v3164_v20, %v3132_v19  ;;  %4547 = vtanh.f32 %v3227_v34 }
 0xa73   : > { %v2997_v33 = vpop.f32.mrf.mxu1  ;;  %v3274_v1 = vmul.f32 %v3258_v5, %v3146_v39 }
 0xa74   : > { %v3196_v26 = vmul.f32 %v3180_v18, %v3132_v19  ;;  %v3111_v16 = vadd.f32 %v3110_v11, %v2997_v33 }
 0xa75   : > { %v3287_v44 = vpack.c.bf16 %v3274_v1, %v3273_v10 }
 0xa76   : > { %v3133_v3 = vadd.f32 %v6236_v51, %v3111_v16  ;;  %v3212_v2 = vadd.f32 %v3196_v26, %v3132_v19 }
 0xa77   : > { %4257 = vmatmul.msk.bf16.gmra.mxu2 %vm536_vm1, %v3287_v44  ;;  %v6270_v44 = vperm.slane %v6233_v24, 1 }
 0xa78   : > { %v3165_v49 = vmul.f32 0.044715, %v3133_v3  ;;  %v3228_v37 = vmul.f32 0.7978846, %v3212_v2  ;;  %v4548_v50 = vpop.eup %4547  ;;  %v3149_v38 = vmul.f32 0.5, %v3133_v3 }
 0xa79   : > { %v3259_v42 = vadd.f32 1.0, %v4548_v50 }
 0xa7a   : > { %v3181_v48 = vmul.f32 %v3165_v49, %v3133_v3  ;;  %4549 = vtanh.f32 %v3228_v37 }
 0xa7b   : > { %v2999_v4 = vpop.f32.mrf.mxu1  ;;  %v3275_v57 = vmul.f32 %v3259_v42, %v3147_v27 }
 0xa7c   : > { %v3197_v15 = vmul.f32 %v3181_v48, %v3133_v3  ;;  %v3113_v32 = vadd.f32 %v3112_v17, %v2999_v4 }
 0xa7e   : > { %v3134_v52 = vadd.f32 %v6236_v51, %v3113_v32  ;;  %v3213_v21 = vadd.f32 %v3197_v15, %v3133_v3 }
 0xa80   : > { %v4550_v61 = vpop.eup %4549  ;;  %v3166_v58 = vmul.f32 0.044715, %v3134_v52  ;;  %v3229_v56 = vmul.f32 0.7978846, %v3213_v21  ;;  %v3150_v59 = vmul.f32 0.5, %v3134_v52 }
 0xa81   : > { %v3260_v36 = vadd.f32 1.0, %v4550_v61 }
 0xa82   : > { %v3182_v35 = vmul.f32 %v3166_v58, %v3134_v52  ;;  %4551 = vtanh.f32 %v3229_v56  ;;  %v6276_v56 = vperm.slane %v6233_v24, 2 }
 0xa83   : > { %v3002_v12 = vpop.f32.mrf.mxu1  ;;  %v3276_v31 = vmul.f32 %v3260_v36, %v3148_v55 }
 0xa84   : > { %v3198_v62 = vmul.f32 %v3182_v35, %v3134_v52  ;;  %v3116_v7 = vadd.f32 %v3115_v13, %v3002_v12 }
 0xa85   : > { %v3288_v43 = vpack.c.bf16 %v3276_v31, %v3275_v57 }
 0xa86   : > { %v3135_v45 = vadd.f32 %v6236_v51, %v3116_v7  ;;  %v3214_v30 = vadd.f32 %v3198_v62, %v3134_v52 }
 0xa87   : > { %4258 = vmatmul.msk.bf16.gmra.mxu2 %vm536_vm1, %v3288_v43 }
 0xa88   : > { %v3167_v0 = vmul.f32 0.044715, %v3135_v45  ;;  %v3230_v14 = vmul.f32 0.7978846, %v3214_v30  ;;  %v4552_v22 = vpop.eup %4551  ;;  %v3151_v34 = vmul.f32 0.5, %v3135_v45 }
 0xa89   : > { %v3261_v29 = vadd.f32 1.0, %v4552_v22 }
 0xa8a   : > { %v3183_v8 = vmul.f32 %v3167_v0, %v3135_v45  ;;  %4553 = vtanh.f32 %v3230_v14 }
 0xa8b   : > { %v3004_v60 = vpop.f32.mrf.mxu1  ;;  %v3277_v6 = vmul.f32 %v3261_v29, %v3149_v38 }
 0xa8c   : > { %v3199_v9 = vmul.f32 %v3183_v8, %v3135_v45  ;;  %v3118_v25 = vadd.f32 %v3117_v23, %v3004_v60 }
 0xa8e   : > { %v3136_v46 = vadd.f32 %v6236_v51, %v3118_v25  ;;  %v3215_v54 = vadd.f32 %v3199_v9, %v3135_v45 }
 0xa90   : > { %v4554_v41 = vpop.eup %4553  ;;  %v3168_v63 = vmul.f32 0.044715, %v3136_v46  ;;  %v3231_v19 = vmul.f32 0.7978846, %v3215_v54  ;;  %v3152_v33 = vmul.f32 0.5, %v3136_v46 }
 0xa91   : > { %v3262_v40 = vadd.f32 1.0, %v4554_v41 }
 0xa92   : > { %v3184_v11 = vmul.f32 %v3168_v63, %v3136_v46  ;;  %4555 = vtanh.f32 %v3231_v19 }
 0xa93   : > { %v3278_v28 = vmul.f32 %v3262_v40, %v3150_v59 }
 0xa94   : > { %v3200_v47 = vmul.f32 %v3184_v11, %v3136_v46 }
 0xa95   : > { %v3289_v20 = vpack.c.bf16 %v3278_v28, %v3277_v6 }
 0xa96   : > { %v3216_v53 = vadd.f32 %v3200_v47, %v3136_v46 }
 0xa97   : > { %4259 = vmatmul.msk.bf16.gmra.mxu2 %vm536_vm1, %v3289_v20 }
 0xa98   : > { %v3232_v39 = vmul.f32 0.7978846, %v3216_v53  ;;  %v4556_v51 = vpop.eup %4555 }
 0xa99   : > { %v3263_v5 = vadd.f32 1.0, %v4556_v51 }
 0xa9a   : > { %4557 = vtanh.f32 %v3232_v39 }
 0xa9b   : > { %v3279_v1 = vmul.f32 %v3263_v5, %v3151_v34 }
 0xaa0   : > { %v4558_v18 = vpop.eup %4557 }
 0xaa1   : > { %v3264_v10 = vadd.f32 1.0, %v4558_v18 }
 0xaa3   : > { %v3280_v26 = vmul.f32 %v3264_v10, %v3152_v33 }
 0xaa5   : > { %v3290_v16 = vpack.c.bf16 %v3280_v26, %v3279_v1 }
 0xaa7   : > { %4260 = vmatmul.msk.bf16.gmra.mxu2 %vm536_vm1, %v3290_v16 }
 0xaba   : > { %v3329_v3 = vpop.f32.mrf.mxu2 }
 0xabb   : > { %v3330_v2 = vadd.f32 %v3329_v3, %v6270_v44 }
 0xabd   : > { %v3385_v17 = vmul.f32 0.044715, %v3330_v2  ;;  %v3369_v36 = vmul.f32 0.5, %v3330_v2 }
 0xabf   : > { %v3401_v49 = vmul.f32 %v3385_v17, %v3330_v2 }
 0xac1   : > { %v3417_v37 = vmul.f32 %v3401_v49, %v3330_v2 }
 0xac2   : > { %v3331_v48 = vpop.f32.mrf.mxu2 }
 0xac3   : > { %v3332_v4 = vadd.f32 %v3331_v48, %v6270_v44  ;;  %v3433_v50 = vadd.f32 %v3417_v37, %v3330_v2 }
 0xac5   : > { %v3386_v15 = vmul.f32 0.044715, %v3332_v4  ;;  %v3449_v32 = vmul.f32 0.7978846, %v3433_v50  ;;  %v3370_v60 = vmul.f32 0.5, %v3332_v4 }
 0xac7   : > { %v3402_v52 = vmul.f32 %v3386_v15, %v3332_v4  ;;  %4559 = vtanh.f32 %v3449_v32 }
 0xac9   : > { %v3418_v21 = vmul.f32 %v3402_v52, %v3332_v4 }
 0xaca   : > { %v3334_v42 = vpop.f32.mrf.mxu2 }
 0xacb   : > { %v3335_v61 = vadd.f32 %v3334_v42, %v6270_v44  ;;  %v3434_v58 = vadd.f32 %v3418_v21, %v3332_v4 }
 0xacd   : > { %v4560_v13 = vpop.eup %4559  ;;  %v3387_v27 = vmul.f32 0.044715, %v3335_v61  ;;  %v3450_v55 = vmul.f32 0.7978846, %v3434_v58  ;;  %v3371_v40 = vmul.f32 0.5, %v3335_v61 }
 0xace   : > { %v3481_v35 = vadd.f32 1.0, %v4560_v13 }
 0xacf   : > { %v3403_v12 = vmul.f32 %v3387_v27, %v3335_v61  ;;  %4561 = vtanh.f32 %v3450_v55 }
 0xad0   : > { %v3497_v57 = vmul.f32 %v3481_v35, %v3369_v36 }
 0xad1   : > { %v3419_v31 = vmul.f32 %v3403_v12, %v3335_v61 }
 0xad2   : > { %v3336_v62 = vpop.f32.mrf.mxu2  ;;  %v3514_v7 = vmul.f32 %v6276_v56, %v3497_v57 }
 0xad3   : > { %v3337_v43 = vadd.f32 %v3336_v62, %v6270_v44  ;;  %v3435_v45 = vadd.f32 %v3419_v31, %v3335_v61 }
 0xad4   : > { %v3530_v30 = vsel %vm536_vm1, %v3514_v7, 0.0 }
 0xad5   : > { %v4562_v0 = vpop.eup %4561  ;;  %v3388_v14 = vmul.f32 0.044715, %v3337_v43  ;;  %3531 = vadd.xlane.f32.xlu2 %v3530_v30  ;;  %v3451_v8 = vmul.f32 0.7978846, %v3435_v45  ;;  %v3372_v33 = vmul.f32 0.5, %v3337_v43 }
 0xad6   : > { %v3482_v23 = vadd.f32 1.0, %v4562_v0 }
 0xad7   : > { %v3404_v24 = vmul.f32 %v3388_v14, %v3337_v43  ;;  %4563 = vtanh.f32 %v3451_v8 }
 0xad8   : > { %v3498_v22 = vmul.f32 %v3482_v23, %v3370_v60 }
 0xad9   : > { %v3420_v9 = vmul.f32 %v3404_v24, %v3337_v43 }
 0xada   : > { %v3339_v25 = vpop.f32.mrf.mxu2  ;;  %v3515_v46 = vmul.f32 %v6276_v56, %v3498_v22 }
 0xadb   : > { %v3340_v54 = vadd.f32 %v3339_v25, %v6270_v44  ;;  %v3436_v29 = vadd.f32 %v3420_v9, %v3337_v43 }
 0xadc   : > { %v3533_v41 = vsel %vm536_vm1, %v3515_v46, 0.0 }
 0xadd   : > { %v4564_v63 = vpop.eup %4563  ;;  %v3389_v38 = vmul.f32 0.044715, %v3340_v54  ;;  %3534 = vadd.xlane.f32.xlu1 %v3533_v41  ;;  %v3452_v59 = vmul.f32 0.7978846, %v3436_v29  ;;  %v3373_v15 = vmul.f32 0.5, %v3340_v54 }
 0xade   : > { %v3483_v11 = vadd.f32 1.0, %v4564_v63 }
 0xadf   : > { %v3405_v19 = vmul.f32 %v3389_v38, %v3340_v54  ;;  %4565 = vtanh.f32 %v3452_v59 }
 0xae0   : > { %v3499_v6 = vmul.f32 %v3483_v11, %v3371_v40 }
 0xae1   : > { %v3421_v28 = vmul.f32 %v3405_v19, %v3340_v54 }
 0xae2   : > { %v3341_v47 = vpop.f32.mrf.mxu2  ;;  %v3516_v20 = vmul.f32 %v6276_v56, %v3499_v6 }
 0xae3   : > { %v3342_v53 = vadd.f32 %v3341_v47, %v6270_v44  ;;  %v3437_v39 = vadd.f32 %v3421_v28, %v3340_v54 }
 0xae4   : > { %v3536_v51 = vsel %vm536_vm1, %v3516_v20, 0.0 }
 0xae5   : > { %v4566_v5 = vpop.eup %4565  ;;  %v3390_v18 = vmul.f32 0.044715, %v3342_v53  ;;  %3537 = vadd.xlane.f32.xlu2 %v3536_v51  ;;  %v3453_v34 = vmul.f32 0.7978846, %v3437_v39  ;;  %v3374_v57 = vmul.f32 0.5, %v3342_v53 }
 0xae6   : > { %v3484_v10 = vadd.f32 1.0, %v4566_v5 }
 0xae7   : > { %v3406_v1 = vmul.f32 %v3390_v18, %v3342_v53  ;;  %4567 = vtanh.f32 %v3453_v34 }
 0xae8   : > { %v3500_v26 = vmul.f32 %v3484_v10, %v3372_v33 }
 0xae9   : > { %v3422_v16 = vmul.f32 %v3406_v1, %v3342_v53 }
 0xaea   : > { %v3344_v3 = vpop.f32.mrf.mxu2  ;;  %v3517_v2 = vmul.f32 %v6276_v56, %v3500_v26 }
 0xaeb   : > { %v3345_v17 = vadd.f32 %v3344_v3, %v6270_v44  ;;  %v3438_v49 = vadd.f32 %v3422_v16, %v3342_v53 }
 0xaec   : > { %v3539_v37 = vsel %vm536_vm1, %v3517_v2, 0.0 }
 0xaed   : > { %v4568_v48 = vpop.eup %4567  ;;  %v3391_v4 = vmul.f32 0.044715, %v3345_v17  ;;  %3540 = vadd.xlane.f32.xlu1 %v3539_v37  ;;  %v3454_v50 = vmul.f32 0.7978846, %v3438_v49  ;;  %v3375_v22 = vmul.f32 0.5, %v3345_v17 }
 0xaee   : > { %v3485_v32 = vadd.f32 1.0, %v4568_v48 }
 0xaef   : > { %v3407_v52 = vmul.f32 %v3391_v4, %v3345_v17  ;;  %4569 = vtanh.f32 %v3454_v50 }
 0xaf0   : > { %v3501_v21 = vmul.f32 %v3485_v32, %v3373_v15 }
 0xaf1   : > { %v3423_v42 = vmul.f32 %v3407_v52, %v3345_v17 }
 0xaf2   : > { %v3346_v61 = vpop.f32.mrf.mxu2  ;;  %v3518_v58 = vmul.f32 %v6276_v56, %v3501_v21 }
 0xaf3   : > { %v3347_v13 = vadd.f32 %v3346_v61, %v6270_v44  ;;  %v3439_v27 = vadd.f32 %v3423_v42, %v3345_v17 }
 0xaf4   : > { %v3542_v55 = vsel %vm536_vm1, %v3518_v58, 0.0 }
 0xaf5   : > { %v4570_v36 = vpop.eup %4569  ;;  %v3392_v35 = vmul.f32 0.044715, %v3347_v13  ;;  %3543 = vadd.xlane.f32.xlu2 %v3542_v55  ;;  %v3455_v12 = vmul.f32 0.7978846, %v3439_v27  ;;  %v3376_v6 = vmul.f32 0.5, %v3347_v13 }
 0xaf6   : > { %v3486_v31 = vadd.f32 1.0, %v4570_v36 }
 0xaf7   : > { %v3408_v62 = vmul.f32 %v3392_v35, %v3347_v13  ;;  %4571 = vtanh.f32 %v3455_v12 }
 0xaf8   : > { %v3502_v7 = vmul.f32 %v3486_v31, %v3374_v57 }
 0xaf9   : > { %v3424_v43 = vmul.f32 %v3408_v62, %v3347_v13 }
 0xafa   : > { %v3349_v45 = vpop.f32.mrf.mxu2  ;;  %v3519_v30 = vmul.f32 %v6276_v56, %v3502_v7 }
 0xafb   : > { %v3350_v0 = vadd.f32 %v3349_v45, %v6270_v44  ;;  %v3440_v14 = vadd.f32 %v3424_v43, %v3347_v13 }
 0xafc   : > { %v3545_v8 = vsel %vm536_vm1, %v3519_v30, 0.0 }
 0xafd   : > { %v4572_v60 = vpop.eup %4571  ;;  %v3393_v23 = vmul.f32 0.044715, %v3350_v0  ;;  %3546 = vadd.xlane.f32.xlu1 %v3545_v8  ;;  %v3456_v24 = vmul.f32 0.7978846, %v3440_v14  ;;  %v3377_v26 = vmul.f32 0.5, %v3350_v0 }
 0xafe   : > { %v3487_v9 = vadd.f32 1.0, %v4572_v60 }
 0xaff   : > { %v3409_v25 = vmul.f32 %v3393_v23, %v3350_v0  ;;  %4573 = vtanh.f32 %v3456_v24 }
 0xb00   : > { %v3503_v46 = vmul.f32 %v3487_v9, %v3375_v22 }
 0xb01   : > { %v3425_v54 = vmul.f32 %v3409_v25, %v3350_v0 }
 0xb02   : > { %v3351_v29 = vpop.f32.mrf.mxu2  ;;  %v3520_v41 = vmul.f32 %v6276_v56, %v3503_v46 }
 0xb03   : > { %v3352_v63 = vadd.f32 %v3351_v29, %v6270_v44  ;;  %v3441_v38 = vadd.f32 %v3425_v54, %v3350_v0 }
 0xb04   : > { %v3548_v59 = vsel %vm536_vm1, %v3520_v41, 0.0 }
 0xb05   : > { %v4574_v40 = vpop.eup %4573  ;;  %v3394_v11 = vmul.f32 0.044715, %v3352_v63  ;;  %3549 = vadd.xlane.f32.xlu2 %v3548_v59  ;;  %v3457_v19 = vmul.f32 0.7978846, %v3441_v38  ;;  %v3378_v21 = vmul.f32 0.5, %v3352_v63 }
 0xb06   : > { %v3488_v28 = vadd.f32 1.0, %v4574_v40 }
 0xb07   : > { %v3410_v47 = vmul.f32 %v3394_v11, %v3352_v63  ;;  %4575 = vtanh.f32 %v3457_v19 }
 0xb08   : > { %v3504_v20 = vmul.f32 %v3488_v28, %v3376_v6 }
 0xb09   : > { %v3426_v53 = vmul.f32 %v3410_v47, %v3352_v63 }
 0xb0a   : > { %v3354_v39 = vpop.f32.mrf.mxu2  ;;  %v3521_v51 = vmul.f32 %v6276_v56, %v3504_v20 }
 0xb0b   : > { %v3355_v5 = vadd.f32 %v3354_v39, %v6270_v44  ;;  %v3442_v18 = vadd.f32 %v3426_v53, %v3352_v63 }
 0xb0c   : > { %v3551_v34 = vsel %vm536_vm1, %v3521_v51, 0.0 }
 0xb0d   : > { %v4576_v33 = vpop.eup %4575  ;;  %v3395_v10 = vmul.f32 0.044715, %v3355_v5  ;;  %3552 = vadd.xlane.f32.xlu0 %v3551_v34  ;;  %v3458_v1 = vmul.f32 0.7978846, %v3442_v18  ;;  %v3379_v7 = vmul.f32 0.5, %v3355_v5 }
 0xb0e   : > { %v3489_v16 = vadd.f32 1.0, %v4576_v33 }
 0xb0f   : > { %v3411_v3 = vmul.f32 %v3395_v10, %v3355_v5  ;;  %4577 = vtanh.f32 %v3458_v1 }
 0xb10   : > { %v3505_v2 = vmul.f32 %v3489_v16, %v3377_v26 }
 0xb11   : > { %v3427_v17 = vmul.f32 %v3411_v3, %v3355_v5 }
 0xb12   : > { %v3356_v49 = vpop.f32.mrf.mxu2  ;;  %v3522_v37 = vmul.f32 %v6276_v56, %v3505_v2 }
 0xb13   : > { %v3357_v48 = vadd.f32 %v3356_v49, %v6270_v44  ;;  %v3443_v4 = vadd.f32 %v3427_v17, %v3355_v5 }
 0xb14   : > { %v3554_v50 = vsel %vm536_vm1, %v3522_v37, 0.0 }
 0xb15   : > { %v4578_v15 = vpop.eup %4577  ;;  %v3396_v32 = vmul.f32 0.044715, %v3357_v48  ;;  %3555 = vadd.xlane.f32.xlu1 %v3554_v50  ;;  %v3459_v52 = vmul.f32 0.7978846, %v3443_v4  ;;  %v3380_v46 = vmul.f32 0.5, %v3357_v48 }
 0xb16   : > { %v3490_v42 = vadd.f32 1.0, %v4578_v15 }
 0xb17   : > { %v3412_v61 = vmul.f32 %v3396_v32, %v3357_v48  ;;  %4579 = vtanh.f32 %v3459_v52 }
 0xb18   : > { %v3506_v58 = vmul.f32 %v3490_v42, %v3378_v21 }
 0xb19   : > { %v3428_v13 = vmul.f32 %v3412_v61, %v3357_v48 }
 0xb1a   : > { %v3359_v27 = vpop.f32.mrf.mxu2  ;;  %v3523_v55 = vmul.f32 %v6276_v56, %v3506_v58 }
 0xb1b   : > { %v3360_v36 = vadd.f32 %v3359_v27, %v6270_v44  ;;  %v3444_v35 = vadd.f32 %v3428_v13, %v3357_v48  ;;  %v4686_v27 = vld [vmem:[%s6405_s4 + $0x290] sm:$0x7] }
 0xb1c   : > { %v3557_v12 = vsel %vm536_vm1, %v3523_v55, 0.0  ;;  %v6324_v55 = vperm.slane %v4686_v27, 2 }
 0xb1d   : > { %v4580_v57 = vpop.eup %4579  ;;  %v3397_v31 = vmul.f32 0.044715, %v3360_v36  ;;  %3558 = vadd.xlane.f32.xlu2 %v3557_v12  ;;  %v3460_v62 = vmul.f32 0.7978846, %v3444_v35  ;;  %v3381_v20 = vmul.f32 0.5, %v3360_v36 }
 0xb1e   : > { %v3491_v43 = vadd.f32 1.0, %v4580_v57 }
 0xb1f   : > { %v3413_v45 = vmul.f32 %v3397_v31, %v3360_v36  ;;  %4581 = vtanh.f32 %v3460_v62 }
 0xb20   : > { %v3507_v30 = vmul.f32 %v3491_v43, %v3379_v7 }
 0xb21   : > { %v3429_v0 = vmul.f32 %v3413_v45, %v3360_v36 }
 0xb22   : > { %v3361_v14 = vpop.f32.mrf.mxu2  ;;  %v3524_v8 = vmul.f32 %v6276_v56, %v3507_v30 }
 0xb23   : > { %v3362_v60 = vadd.f32 %v3361_v14, %v6270_v44  ;;  %v3445_v23 = vadd.f32 %v3429_v0, %v3360_v36 }
 0xb24   : > { %v3560_v24 = vsel %vm536_vm1, %v3524_v8, 0.0 }
 0xb25   : > { %v4582_v22 = vpop.eup %4581  ;;  %v3398_v9 = vmul.f32 0.044715, %v3362_v60  ;;  %3561 = vadd.xlane.f32.xlu0 %v3560_v24  ;;  %v3461_v25 = vmul.f32 0.7978846, %v3445_v23  ;;  %v3382_v2 = vmul.f32 0.5, %v3362_v60 }
 0xb26   : > { %v3492_v54 = vadd.f32 1.0, %v4582_v22 }
 0xb27   : > { %v3414_v29 = vmul.f32 %v3398_v9, %v3362_v60  ;;  %4583 = vtanh.f32 %v3461_v25 }
 0xb28   : > { %v3508_v41 = vmul.f32 %v3492_v54, %v3380_v46 }
 0xb29   : > { %v3430_v63 = vmul.f32 %v3414_v29, %v3362_v60 }
 0xb2a   : > { %v3364_v38 = vpop.f32.mrf.mxu2  ;;  %v3525_v59 = vmul.f32 %v6276_v56, %v3508_v41 }
 0xb2b   : > { %v3365_v40 = vadd.f32 %v3364_v38, %v6270_v44  ;;  %v3446_v11 = vadd.f32 %v3430_v63, %v3362_v60 }
 0xb2c   : > { %v3563_v19 = vsel %vm536_vm1, %v3525_v59, 0.0 }
 0xb2d   : > { %v4584_v6 = vpop.eup %4583  ;;  %v3399_v28 = vmul.f32 0.044715, %v3365_v40  ;;  %3564 = vadd.xlane.f32.xlu1 %v3563_v19  ;;  %v3462_v47 = vmul.f32 0.7978846, %v3446_v11  ;;  %v3383_v52 = vmul.f32 0.5, %v3365_v40 }
 0xb2e   : > { %v3493_v53 = vadd.f32 1.0, %v4584_v6 }
 0xb2f   : > { %v3415_v39 = vmul.f32 %v3399_v28, %v3365_v40  ;;  %4585 = vtanh.f32 %v3462_v47 }
 0xb30   : > { %v3509_v51 = vmul.f32 %v3493_v53, %v3381_v20 }
 0xb31   : > { %v3431_v5 = vmul.f32 %v3415_v39, %v3365_v40 }
 0xb32   : > { %v3366_v18 = vpop.f32.mrf.mxu2  ;;  %v3526_v34 = vmul.f32 %v6276_v56, %v3509_v51 }
 0xb33   : > { %v3367_v33 = vadd.f32 %v3366_v18, %v6270_v44  ;;  %v3447_v10 = vadd.f32 %v3431_v5, %v3365_v40 }
 0xb34   : > { %v3566_v1 = vsel %vm536_vm1, %v3526_v34, 0.0 }
 0xb35   : > { %v4586_v26 = vpop.eup %4585  ;;  %v3400_v16 = vmul.f32 0.044715, %v3367_v33  ;;  %3567 = vadd.xlane.f32.xlu2 %v3566_v1  ;;  %v3463_v3 = vmul.f32 0.7978846, %v3447_v10  ;;  %v3384_v36 = vmul.f32 0.5, %v3367_v33 }
 0xb36   : > { %v3494_v17 = vadd.f32 1.0, %v4586_v26 }
 0xb37   : > { %v3416_v49 = vmul.f32 %v3400_v16, %v3367_v33  ;;  %4587 = vtanh.f32 %v3463_v3 }
 0xb38   : > { %v3510_v37 = vmul.f32 %v3494_v17, %v3382_v2 }
 0xb39   : > { %v3432_v48 = vmul.f32 %v3416_v49, %v3367_v33 }
 0xb3a   : > { %v3527_v4 = vmul.f32 %v6276_v56, %v3510_v37 }
 0xb3b   : > { %v3448_v50 = vadd.f32 %v3432_v48, %v3367_v33 }
 0xb3c   : > { %v3569_v15 = vsel %vm536_vm1, %v3527_v4, 0.0 }
 0xb3d   : > { %v4588_v32 = vpop.eup %4587  ;;  %3570 = vadd.xlane.f32.xlu0 %v3569_v15  ;;  %v3464_v44 = vmul.f32 0.7978846, %v3448_v50 }
 0xb3e   : > { %v3495_v21 = vadd.f32 1.0, %v4588_v32 }
 0xb3f   : > { %4589 = vtanh.f32 %v3464_v44 }
 0xb40   : > { %v3511_v42 = vmul.f32 %v3495_v21, %v3383_v52 }
 0xb42   : > { %v3528_v61 = vmul.f32 %v6276_v56, %v3511_v42 }
 0xb44   : > { %v3572_v58 = vsel %vm536_vm1, %v3528_v61, 0.0 }
 0xb45   : > { %v4590_v13 = vpop.eup %4589  ;;  %3573 = vadd.xlane.f32.xlu1 %v3572_v58 }
 0xb46   : > { %v3496_v35 = vadd.f32 1.0, %v4590_v13 }
 0xb48   : > { %v3532_v12 = vpop.xlane.xlu2 %3531  ;;  %v3512_v57 = vmul.f32 %v3496_v35, %v3384_v36 }
 0xb49   : > { %v3579_v31 = vadd.f32 %v6324_v55, %v3532_v12 }
 0xb4a   : > { %v3529_v62 = vmul.f32 %v6276_v56, %v3512_v57 }
 0xb4b   : > { %v3595_v7 = vsub.f32 0.0, %v3579_v31 }
 0xb4c   : > { %v3575_v43 = vsel %vm536_vm1, %v3529_v62, 0.0 }
 0xb4d   : > { %v3611_v45 = vmul.f32 1.442695, %v3595_v7  ;;  %3576 = vadd.xlane.f32.xlu2 %v3575_v43 }
 0xb4f   : > { %4591 = vpow2.f32 %v3611_v45 }
 0xb50   : > { %v3535_v30 = vpop.xlane.xlu1 %3534 }
 0xb51   : > { %v3580_v0 = vadd.f32 %v6324_v55, %v3535_v30 }
 0xb53   : > { %v3596_v14 = vsub.f32 0.0, %v3580_v0 }
 0xb55   : > { %v4592_v8 = vpop.eup %4591  ;;  %v3613_v60 = vmul.f32 1.442695, %v3596_v14 }
 0xb56   : > { %v3643_v23 = vadd.f32 1.0, %v4592_v8 }
 0xb57   : > { %4593 = vpow2.f32 %v3613_v60 }
 0xb58   : > { %4595 = vrcp.f32 %v3643_v23  ;;  %v3538_v24 = vpop.xlane.xlu2 %3537  ;;  %v3670_v59 = vand.u32 2147483648, %v3643_v23  ;;  %v3668_v19 = vand.u32 2147483647, %v3643_v23  ;;  %vm3664_vm1 = vweird.f32 %v3643_v23 }
 0xb59   : > { %v3581_v22 = vadd.f32 %v6324_v55, %v3538_v24 }
 0xb5a   : > { %v3671_v39 = vor.u32 1.1754944e-38, %v3670_v59  ;;  %vm3669_vm7 = vcmp.eq.f32.partialorder %v3668_v19, 8.507059e+37 }
 0xb5b   : > { %v3597_v9 = vsub.f32 0.0, %v3581_v22 }
 0xb5d   : > { %v4594_v56 = vpop.eup %4593  ;;  %v3615_v25 = vmul.f32 1.442695, %v3597_v9 }
 0xb5e   : > { %v4596_v46 = vpop.eup %4595  ;;  %v3644_v54 = vadd.f32 1.0, %v4594_v56 }
 0xb5f   : > { %4597 = vpow2.f32 %v3615_v25  ;;  %v3660_v29 = vmul.f32 %v4596_v46, %v3643_v23  ;;  %vm3665_vm0 = vweird.f32 %v4596_v46 }
 0xb60   : > { %4599 = vrcp.f32 %v3644_v54  ;;  %v3541_v41 = vpop.xlane.xlu1 %3540  ;;  %vm3666_vm2 = vmor %vm3664_vm1, %vm3665_vm0  ;;  %v3685_v1 = vand.u32 2147483648, %v3644_v54  ;;  %v3683_v3 = vand.u32 2147483647, %v3644_v54  ;;  %vm3679_vm9 = vweird.f32 %v3644_v54 }
 0xb61   : > { %v3582_v63 = vadd.f32 %v6324_v55, %v3541_v41  ;;  %v3661_v38 = vsub.f32 1.0, %v3660_v29 }
 0xb62   : > { %v3686_v4 = vor.u32 1.1754944e-38, %v3685_v1  ;;  %vm3684_vm11 = vcmp.eq.f32.partialorder %v3683_v3, 8.507059e+37 }
 0xb63   : > { %v3598_v40 = vsub.f32 0.0, %v3582_v63  ;;  %v3662_v11 = vmul.f32 %v4596_v46, %v3661_v38 }
 0xb65   : > { %v4598_v6 = vpop.eup %4597  ;;  %v3617_v28 = vmul.f32 1.442695, %v3598_v40  ;;  %v3663_v47 = vadd.f32 %v4596_v46, %v3662_v11 }
 0xb66   : > { %v4600_v20 = vpop.eup %4599  ;;  %v3645_v53 = vadd.f32 1.0, %v4598_v6 }
 0xb67   : > { %4601 = vpow2.f32 %v3617_v28  ;;  %v3667_v51 = vsel %vm3666_vm2, %v4596_v46, %v3663_v47  ;;  %v3675_v5 = vmul.f32 %v4600_v20, %v3644_v54  ;;  %vm3680_vm8 = vweird.f32 %v4600_v20 }
 0xb68   : > { %4603 = vrcp.f32 %v3645_v53  ;;  %v3544_v18 = vpop.xlane.xlu2 %3543  ;;  %v3672_v34 = vsel %vm3669_vm7, %v3671_v39, %v3667_v51  ;;  %vm3681_vm10 = vmor %vm3679_vm9, %vm3680_vm8  ;;  %v3700_v42 = vand.u32 2147483648, %v3645_v53  ;;  %v3698_v13 = vand.u32 2147483647, %v3645_v53 }
 0xb69   : > { %v3583_v33 = vadd.f32 %v6324_v55, %v3544_v18  ;;  %3915 = vrot.lane.b32.xlu0 %v3672_v34, %s4697_s10  ;;  %v3676_v10 = vsub.f32 1.0, %v3675_v5  ;;  %vm3694_vm13 = vweird.f32 %v3645_v53 }
 0xb6a   : > { %v3701_v31 = vor.u32 1.1754944e-38, %v3700_v42  ;;  %vm3699_vm15 = vcmp.eq.f32.partialorder %v3698_v13, 8.507059e+37 }
 0xb6b   : > { %v3599_v26 = vsub.f32 0.0, %v3583_v33  ;;  %v3677_v16 = vmul.f32 %v4600_v20, %v3676_v10 }
 0xb6d   : > { %v4602_v2 = vpop.eup %4601  ;;  %v3619_v17 = vmul.f32 1.442695, %v3599_v26  ;;  %v3678_v49 = vadd.f32 %v4600_v20, %v3677_v16 }
 0xb6e   : > { %v4604_v37 = vpop.eup %4603  ;;  %v3646_v48 = vadd.f32 1.0, %v4602_v2 }
 0xb6f   : > { %4605 = vpow2.f32 %v3619_v17  ;;  %v3682_v50 = vsel %vm3681_vm10, %v4600_v20, %v3678_v49  ;;  %v3690_v15 = vmul.f32 %v4604_v37, %v3645_v53  ;;  %vm3695_vm12 = vweird.f32 %v4604_v37 }
 0xb70   : > { %4607 = vrcp.f32 %v3646_v48  ;;  %v3547_v32 = vpop.xlane.xlu1 %3546  ;;  %v3687_v44 = vsel %vm3684_vm11, %v3686_v4, %v3682_v50  ;;  %vm3696_vm14 = vmor %vm3694_vm13, %vm3695_vm12  ;;  %v3715_v14 = vand.u32 2147483648, %v3646_v48  ;;  %v3713_v23 = vand.u32 2147483647, %v3646_v48 }
 0xb71   : > { %v3584_v52 = vadd.f32 %v6324_v55, %v3547_v32  ;;  %3917 = vrot.lane.b32.xlu1 %v3687_v44, %s4697_s10  ;;  %v3691_v21 = vsub.f32 1.0, %v3690_v15  ;;  %vm3709_vm4 = vweird.f32 %v3646_v48 }
 0xb72   : > { %v3716_v46 = vor.u32 1.1754944e-38, %v3715_v14  ;;  %vm3714_vm6 = vcmp.eq.f32.partialorder %v3713_v23, 8.507059e+37 }
 0xb73   : > { %v3600_v61 = vsub.f32 0.0, %v3584_v52  ;;  %v3692_v58 = vmul.f32 %v4604_v37, %v3691_v21 }
 0xb75   : > { %v4606_v27 = vpop.eup %4605  ;;  %v3621_v36 = vmul.f32 1.442695, %v3600_v61  ;;  %v3693_v35 = vadd.f32 %v4604_v37, %v3692_v58 }
 0xb76   : > { %v4608_v12 = vpop.eup %4607  ;;  %v3647_v57 = vadd.f32 1.0, %v4606_v27 }
 0xb77   : > { %4609 = vpow2.f32 %v3621_v36  ;;  %v3697_v62 = vsel %vm3696_vm14, %v4604_v37, %v3693_v35  ;;  %v3705_v7 = vmul.f32 %v4608_v12, %v3646_v48  ;;  %vm3710_vm3 = vweird.f32 %v4608_v12 }
 0xb78   : > { %4611 = vrcp.f32 %v3647_v57  ;;  %v3550_v43 = vpop.xlane.xlu2 %3549  ;;  %v3702_v45 = vsel %vm3699_vm15, %v3701_v31, %v3697_v62  ;;  %vm3711_vm5 = vmor %vm3709_vm4, %vm3710_vm3  ;;  %v3730_v40 = vand.u32 2147483648, %v3647_v57  ;;  %v3728_v6 = vand.u32 2147483647, %v3647_v57 }
 0xb79   : > { %v3585_v30 = vadd.f32 %v6324_v55, %v3550_v43  ;;  %3919 = vrot.lane.b32.xlu2 %v3702_v45, %s4697_s10  ;;  %v3706_v0 = vsub.f32 1.0, %v3705_v7  ;;  %vm3724_vm1 = vweird.f32 %v3647_v57 }
 0xb7a   : > { %v3731_v51 = vor.u32 1.1754944e-38, %v3730_v40  ;;  %vm3729_vm7 = vcmp.eq.f32.partialorder %v3728_v6, 8.507059e+37 }
 0xb7b   : > { %v3601_v8 = vsub.f32 0.0, %v3585_v30  ;;  %v3707_v60 = vmul.f32 %v4608_v12, %v3706_v0 }
 0xb7d   : > { %v4610_v24 = vpop.eup %4609  ;;  %v3623_v22 = vmul.f32 1.442695, %v3601_v8  ;;  %v3708_v9 = vadd.f32 %v4608_v12, %v3707_v60 }
 0xb7e   : > { %v4612_v56 = vpop.eup %4611  ;;  %v3648_v25 = vadd.f32 1.0, %v4610_v24 }
 0xb7f   : > { %4613 = vpow2.f32 %v3623_v22  ;;  %v3712_v54 = vsel %vm3711_vm5, %v4608_v12, %v3708_v9  ;;  %v3720_v29 = vmul.f32 %v4612_v56, %v3647_v57  ;;  %vm3725_vm0 = vweird.f32 %v4612_v56 }
 0xb80   : > { %4615 = vrcp.f32 %v3648_v25  ;;  %v3553_v41 = vpop.xlane.xlu0 %3552  ;;  %v3717_v63 = vsel %vm3714_vm6, %v3716_v46, %v3712_v54  ;;  %vm3726_vm2 = vmor %vm3724_vm1, %vm3725_vm0  ;;  %v3745_v26 = vand.u32 2147483648, %v3648_v25  ;;  %v3743_v2 = vand.u32 2147483647, %v3648_v25 }
 0xb81   : > { %v3586_v38 = vadd.f32 %v6324_v55, %v3553_v41  ;;  %3921 = vrot.lane.b32.xlu0 %v3717_v63, %s4697_s10  ;;  %v3721_v59 = vsub.f32 1.0, %v3720_v29  ;;  %vm3739_vm9 = vweird.f32 %v3648_v25 }
 0xb82   : > { %v3746_v50 = vor.u32 1.1754944e-38, %v3745_v26  ;;  %vm3744_vm11 = vcmp.eq.f32.partialorder %v3743_v2, 8.507059e+37 }
 0xb83   : > { %v3602_v11 = vsub.f32 0.0, %v3586_v38  ;;  %v3722_v19 = vmul.f32 %v4612_v56, %v3721_v59 }
 0xb85   : > { %v4614_v28 = vpop.eup %4613  ;;  %v3625_v47 = vmul.f32 1.442695, %v3602_v11  ;;  %v3723_v20 = vadd.f32 %v4612_v56, %v3722_v19 }
 0xb86   : > { %v4616_v53 = vpop.eup %4615  ;;  %v3649_v39 = vadd.f32 1.0, %v4614_v28 }
 0xb87   : > { %4617 = vpow2.f32 %v3625_v47  ;;  %v3727_v5 = vsel %vm3726_vm2, %v4612_v56, %v3723_v20  ;;  %v3735_v18 = vmul.f32 %v4616_v53, %v3648_v25  ;;  %vm3740_vm8 = vweird.f32 %v4616_v53 }
 0xb88   : > { %4619 = vrcp.f32 %v3649_v39  ;;  %v3556_v34 = vpop.xlane.xlu1 %3555  ;;  %v3732_v33 = vsel %vm3729_vm7, %v3731_v51, %v3727_v5  ;;  %vm3741_vm10 = vmor %vm3739_vm9, %vm3740_vm8  ;;  %v3760_v61 = vand.u32 2147483648, %v3649_v39  ;;  %v3758_v27 = vand.u32 2147483647, %v3649_v39 }
 0xb89   : > { %v3587_v10 = vadd.f32 %v6324_v55, %v3556_v34  ;;  %3923 = vrot.lane.b32.xlu0 %v3732_v33, %s4697_s10  ;;  %v3736_v1 = vsub.f32 1.0, %v3735_v18  ;;  %vm3754_vm13 = vweird.f32 %v3649_v39 }
 0xb8a   : > { %v3761_v62 = vor.u32 1.1754944e-38, %v3760_v61  ;;  %vm3759_vm15 = vcmp.eq.f32.partialorder %v3758_v27, 8.507059e+37 }
 0xb8b   : > { %v3603_v16 = vsub.f32 0.0, %v3587_v10  ;;  %v3737_v3 = vmul.f32 %v4616_v53, %v3736_v1 }
 0xb8d   : > { %v4618_v17 = vpop.eup %4617  ;;  %v3627_v49 = vmul.f32 1.442695, %v3603_v16  ;;  %v3738_v37 = vadd.f32 %v4616_v53, %v3737_v3 }
 0xb8e   : > { %v4620_v48 = vpop.eup %4619  ;;  %v3650_v4 = vadd.f32 1.0, %v4618_v17 }
 0xb8f   : > { %4621 = vpow2.f32 %v3627_v49  ;;  %v3742_v15 = vsel %vm3741_vm10, %v4616_v53, %v3738_v37  ;;  %v3750_v32 = vmul.f32 %v4620_v48, %v3649_v39  ;;  %vm3755_vm12 = vweird.f32 %v4620_v48 }
 0xb90   : > { %4623 = vrcp.f32 %v3650_v4  ;;  %v3559_v44 = vpop.xlane.xlu2 %3558  ;;  %v3747_v52 = vsel %vm3744_vm11, %v3746_v50, %v3742_v15  ;;  %vm3756_vm14 = vmor %vm3754_vm13, %vm3755_vm12  ;;  %v3775_v8 = vand.u32 2147483648, %v3650_v4  ;;  %v3773_v24 = vand.u32 2147483647, %v3650_v4 }
 0xb91   : > { %v3588_v21 = vadd.f32 %v6324_v55, %v3559_v44  ;;  %3925 = vrot.lane.b32.xlu2 %v3747_v52, %s4697_s10  ;;  %v3751_v42 = vsub.f32 1.0, %v3750_v32  ;;  %vm3769_vm4 = vweird.f32 %v3650_v4 }
 0xb92   : > { %v3776_v54 = vor.u32 1.1754944e-38, %v3775_v8  ;;  %vm3774_vm6 = vcmp.eq.f32.partialorder %v3773_v24, 8.507059e+37 }
 0xb93   : > { %v3604_v58 = vsub.f32 0.0, %v3588_v21  ;;  %v3752_v13 = vmul.f32 %v4620_v48, %v3751_v42 }
 0xb95   : > { %v4622_v36 = vpop.eup %4621  ;;  %v3629_v35 = vmul.f32 1.442695, %v3604_v58  ;;  %v3753_v12 = vadd.f32 %v4620_v48, %v3752_v13 }
 0xb96   : > { %v4624_v57 = vpop.eup %4623  ;;  %v3651_v31 = vadd.f32 1.0, %v4622_v36 }
 0xb97   : > { %4625 = vpow2.f32 %v3629_v35  ;;  %v3757_v7 = vsel %vm3756_vm14, %v4620_v48, %v3753_v12  ;;  %v3765_v43 = vmul.f32 %v4624_v57, %v3650_v4  ;;  %vm3770_vm3 = vweird.f32 %v4624_v57 }
 0xb98   : > { %4627 = vrcp.f32 %v3651_v31  ;;  %v3562_v45 = vpop.xlane.xlu0 %3561  ;;  %v3762_v30 = vsel %vm3759_vm15, %v3761_v62, %v3757_v7  ;;  %vm3771_vm5 = vmor %vm3769_vm4, %vm3770_vm3  ;;  %v3790_v11 = vand.u32 2147483648, %v3651_v31  ;;  %v3788_v28 = vand.u32 2147483647, %v3651_v31 }
 0xb99   : > { %v3589_v0 = vadd.f32 %v6324_v55, %v3562_v45  ;;  %3927 = vrot.lane.b32.xlu1 %v3762_v30, %s4697_s10  ;;  %v3766_v14 = vsub.f32 1.0, %v3765_v43  ;;  %vm3784_vm1 = vweird.f32 %v3651_v31 }
 0xb9a   : > { %v3791_v5 = vor.u32 1.1754944e-38, %v3790_v11  ;;  %vm3789_vm7 = vcmp.eq.f32.partialorder %v3788_v28, 8.507059e+37 }
 0xb9b   : > { %v3605_v60 = vsub.f32 0.0, %v3589_v0  ;;  %v3767_v23 = vmul.f32 %v4624_v57, %v3766_v14 }
 0xb9d   : > { %v4626_v22 = vpop.eup %4625  ;;  %v3631_v9 = vmul.f32 1.442695, %v3605_v60  ;;  %v3768_v56 = vadd.f32 %v4624_v57, %v3767_v23 }
 0xb9e   : > { %v4628_v25 = vpop.eup %4627  ;;  %v3652_v46 = vadd.f32 1.0, %v4626_v22 }
 0xb9f   : > { %4629 = vpow2.f32 %v3631_v9  ;;  %v3772_v29 = vsel %vm3771_vm5, %v4624_v57, %v3768_v56  ;;  %v3780_v41 = vmul.f32 %v4628_v25, %v3651_v31  ;;  %vm3785_vm0 = vweird.f32 %v4628_v25 }
 0xba0   : > { %4631 = vrcp.f32 %v3652_v46  ;;  %v3565_v63 = vpop.xlane.xlu1 %3564  ;;  %v3777_v38 = vsel %vm3774_vm6, %v3776_v54, %v3772_v29  ;;  %vm3786_vm2 = vmor %vm3784_vm1, %vm3785_vm0  ;;  %v3805_v16 = vand.u32 2147483648, %v3652_v46  ;;  %v3803_v17 = vand.u32 2147483647, %v3652_v46 }
 0xba1   : > { %v3590_v59 = vadd.f32 %v6324_v55, %v3565_v63  ;;  %3929 = vrot.lane.b32.xlu0 %v3777_v38, %s4697_s10  ;;  %v3781_v40 = vsub.f32 1.0, %v3780_v41  ;;  %vm3799_vm9 = vweird.f32 %v3652_v46 }
 0xba2   : > { %v3806_v15 = vor.u32 1.1754944e-38, %v3805_v16  ;;  %vm3804_vm11 = vcmp.eq.f32.partialorder %v3803_v17, 8.507059e+37 }
 0xba3   : > { %v3606_v19 = vsub.f32 0.0, %v3590_v59  ;;  %v3782_v6 = vmul.f32 %v4628_v25, %v3781_v40 }
 0xba5   : > { %v4630_v47 = vpop.eup %4629  ;;  %v3633_v20 = vmul.f32 1.442695, %v3606_v19  ;;  %v3783_v53 = vadd.f32 %v4628_v25, %v3782_v6 }
 0xba6   : > { %v4632_v39 = vpop.eup %4631  ;;  %v3653_v51 = vadd.f32 1.0, %v4630_v47 }
 0xba7   : > { %4633 = vpow2.f32 %v3633_v20  ;;  %v3787_v18 = vsel %vm3786_vm2, %v4628_v25, %v3783_v53  ;;  %v3795_v34 = vmul.f32 %v4632_v39, %v3652_v46  ;;  %vm3800_vm8 = vweird.f32 %v4632_v39 }
 0xba8   : > { %4635 = vrcp.f32 %v3653_v51  ;;  %v3568_v33 = vpop.xlane.xlu2 %3567  ;;  %v3792_v10 = vsel %vm3789_vm7, %v3791_v5, %v3787_v18  ;;  %vm3801_vm10 = vmor %vm3799_vm9, %vm3800_vm8  ;;  %v3820_v58 = vand.u32 2147483648, %v3653_v51  ;;  %v3818_v36 = vand.u32 2147483647, %v3653_v51 }
 0xba9   : > { %v3591_v1 = vadd.f32 %v6324_v55, %v3568_v33  ;;  %3931 = vrot.lane.b32.xlu2 %v3792_v10, %s4697_s10  ;;  %v3796_v26 = vsub.f32 1.0, %v3795_v34  ;;  %vm3814_vm13 = vweird.f32 %v3653_v51 }
 0xbaa   : > { %v3821_v7 = vor.u32 1.1754944e-38, %v3820_v58  ;;  %vm3819_vm15 = vcmp.eq.f32.partialorder %v3818_v36, 8.507059e+37 }
 0xbab   : > { %v3607_v3 = vsub.f32 0.0, %v3591_v1  ;;  %v3797_v2 = vmul.f32 %v4632_v39, %v3796_v26 }
 0xbad   : > { %v4634_v49 = vpop.eup %4633  ;;  %v3635_v37 = vmul.f32 1.442695, %v3607_v3  ;;  %v3798_v48 = vadd.f32 %v4632_v39, %v3797_v2 }
 0xbae   : > { %v4636_v4 = vpop.eup %4635  ;;  %v3654_v50 = vadd.f32 1.0, %v4634_v49 }
 0xbaf   : > { %4637 = vpow2.f32 %v3635_v37  ;;  %v3802_v32 = vsel %vm3801_vm10, %v4632_v39, %v3798_v48  ;;  %v3810_v44 = vmul.f32 %v4636_v4, %v3653_v51  ;;  %vm3815_vm12 = vweird.f32 %v4636_v4 }
 0xbb0   : > { %4639 = vrcp.f32 %v3654_v50  ;;  %v3571_v52 = vpop.xlane.xlu0 %3570  ;;  %v3807_v21 = vsel %vm3804_vm11, %v3806_v15, %v3802_v32  ;;  %vm3816_vm14 = vmor %vm3814_vm13, %vm3815_vm12  ;;  %v3835_v60 = vand.u32 2147483648, %v3654_v50  ;;  %v3833_v22 = vand.u32 2147483647, %v3654_v50 }
 0xbb1   : > { %v3592_v42 = vadd.f32 %v6324_v55, %v3571_v52  ;;  %3933 = vrot.lane.b32.xlu1 %v3807_v21, %s4697_s10  ;;  %v3811_v61 = vsub.f32 1.0, %v3810_v44  ;;  %vm3829_vm4 = vweird.f32 %v3654_v50  ;;  %vm3963_vm12 = vcmask 7168  }
 0xbb2   : > { %v3836_v29 = vor.u32 1.1754944e-38, %v3835_v60  ;;  %vm3834_vm6 = vcmp.eq.f32.partialorder %v3833_v22, 8.507059e+37 }
 0xbb3   : > { %v3608_v13 = vsub.f32 0.0, %v3592_v42  ;;  %v3812_v27 = vmul.f32 %v4636_v4, %v3811_v61 }
 0xbb5   : > { %v4638_v35 = vpop.eup %4637  ;;  %v3637_v12 = vmul.f32 1.442695, %v3608_v13  ;;  %v3813_v57 = vadd.f32 %v4636_v4, %v3812_v27 }
 0xbb6   : > { %v4640_v31 = vpop.eup %4639  ;;  %v3655_v62 = vadd.f32 1.0, %v4638_v35 }
 0xbb7   : > { %4641 = vpow2.f32 %v3637_v12  ;;  %v3817_v43 = vsel %vm3816_vm14, %v4636_v4, %v3813_v57  ;;  %v3825_v45 = vmul.f32 %v4640_v31, %v3654_v50  ;;  %vm3830_vm3 = vweird.f32 %v4640_v31 }
 0xbb8   : > { %4643 = vrcp.f32 %v3655_v62  ;;  %v3574_v30 = vpop.xlane.xlu1 %3573  ;;  %v3822_v0 = vsel %vm3819_vm15, %v3821_v7, %v3817_v43  ;;  %vm3831_vm5 = vmor %vm3829_vm4, %vm3830_vm3  ;;  %v3850_v19 = vand.u32 2147483648, %v3655_v62  ;;  %v3848_v47 = vand.u32 2147483647, %v3655_v62 }
 0xbb9   : > { %v3593_v14 = vadd.f32 %v6324_v55, %v3574_v30  ;;  %3935 = vrot.lane.b32.xlu0 %v3822_v0, %s4697_s10  ;;  %v3826_v8 = vsub.f32 1.0, %v3825_v45  ;;  %vm3844_vm1 = vweird.f32 %v3655_v62 }
 0xbba   : > { %v3851_v18 = vor.u32 1.1754944e-38, %v3850_v19  ;;  %vm3849_vm7 = vcmp.eq.f32.partialorder %v3848_v47, 8.507059e+37 }
 0xbbb   : > { %v3609_v23 = vsub.f32 0.0, %v3593_v14  ;;  %v3827_v24 = vmul.f32 %v4640_v31, %v3826_v8 }
 0xbbd   : > { %v4642_v9 = vpop.eup %4641  ;;  %v3639_v56 = vmul.f32 1.442695, %v3609_v23  ;;  %v3828_v25 = vadd.f32 %v4640_v31, %v3827_v24 }
 0xbbe   : > { %v4644_v46 = vpop.eup %4643  ;;  %v3656_v54 = vadd.f32 1.0, %v4642_v9 }
 0xbbf   : > { %4645 = vpow2.f32 %v3639_v56  ;;  %v3832_v41 = vsel %vm3831_vm5, %v4640_v31, %v3828_v25  ;;  %v3840_v63 = vmul.f32 %v4644_v46, %v3655_v62  ;;  %vm3845_vm0 = vweird.f32 %v4644_v46 }
 0xbc0   : > { %4647 = vrcp.f32 %v3656_v54  ;;  %v3577_v38 = vpop.xlane.xlu2 %3576  ;;  %v3837_v59 = vsel %vm3834_vm6, %v3836_v29, %v3832_v41  ;;  %vm3846_vm2 = vmor %vm3844_vm1, %vm3845_vm0  ;;  %v3865_v1 = vand.u32 2147483648, %v3656_v54  ;;  %v3863_v16 = vand.u32 2147483647, %v3656_v54 }
 0xbc1   : > { %v3594_v40 = vadd.f32 %v6324_v55, %v3577_v38  ;;  %3937 = vrot.lane.b32.xlu2 %v3837_v59, %s4697_s10  ;;  %v3841_v11 = vsub.f32 1.0, %v3840_v63  ;;  %vm3859_vm9 = vweird.f32 %v3656_v54 }
 0xbc2   : > { %v3866_v37 = vor.u32 1.1754944e-38, %v3865_v1  ;;  %vm3864_vm11 = vcmp.eq.f32.partialorder %v3863_v16, 8.507059e+37 }
 0xbc3   : > { %v3610_v6 = vsub.f32 0.0, %v3594_v40  ;;  %v3842_v28 = vmul.f32 %v4644_v46, %v3841_v11 }
 0xbc5   : > { %v4646_v20 = vpop.eup %4645  ;;  %v3641_v53 = vmul.f32 1.442695, %v3610_v6  ;;  %v3843_v39 = vadd.f32 %v4644_v46, %v3842_v28 }
 0xbc6   : > { %v4648_v51 = vpop.eup %4647  ;;  %v3657_v5 = vadd.f32 1.0, %v4646_v20 }
 0xbc7   : > { %4649 = vpow2.f32 %v3641_v53  ;;  %v3847_v34 = vsel %vm3846_vm2, %v4644_v46, %v3843_v39  ;;  %v3855_v55 = vmul.f32 %v4648_v51, %v3656_v54  ;;  %vm3860_vm8 = vweird.f32 %v4648_v51 }
 0xbc8   : > { %4651 = vrcp.f32 %v3657_v5  ;;  %v3852_v33 = vsel %vm3849_vm7, %v3851_v18, %v3847_v34  ;;  %vm3861_vm10 = vmor %vm3859_vm9, %vm3860_vm8  ;;  %v3880_v32 = vand.u32 2147483648, %v3657_v5  ;;  %v3878_v21 = vand.u32 2147483647, %v3657_v5 }
 0xbc9   : > { %3939 = vrot.lane.b32.xlu1 %v3852_v33, %s4697_s10  ;;  %v3856_v10 = vsub.f32 1.0, %v3855_v55  ;;  %vm3874_vm14 = vweird.f32 %v3657_v5 }
 0xbca   : > { %v3881_v58 = vor.u32 1.1754944e-38, %v3880_v32  ;;  %vm3879_vm3 = vcmp.eq.f32.partialorder %v3878_v21, 8.507059e+37 }
 0xbcb   : > { %v3857_v26 = vmul.f32 %v4648_v51, %v3856_v10 }
 0xbcd   : > { %v4650_v3 = vpop.eup %4649  ;;  %v3858_v2 = vadd.f32 %v4648_v51, %v3857_v26 }
 0xbce   : > { %v4652_v17 = vpop.eup %4651  ;;  %v3658_v49 = vadd.f32 1.0, %v4650_v3 }
 0xbcf   : > { %v3862_v48 = vsel %vm3861_vm10, %v4648_v51, %v3858_v2  ;;  %v3870_v4 = vmul.f32 %v4652_v17, %v3657_v5  ;;  %vm3875_vm13 = vweird.f32 %v4652_v17 }
 0xbd0   : > { %4653 = vrcp.f32 %v3658_v49  ;;  %v3867_v50 = vsel %vm3864_vm11, %v3866_v37, %v3862_v48  ;;  %vm3876_vm15 = vmor %vm3874_vm14, %vm3875_vm13  ;;  %v3895_v12 = vand.u32 2147483648, %v3658_v49  ;;  %v3893_v62 = vand.u32 2147483647, %v3658_v49 }
 0xbd1   : > { %3941 = vrot.lane.b32.xlu0 %v3867_v50, %s4697_s10  ;;  %v3871_v15 = vsub.f32 1.0, %v3870_v4  ;;  %vm3889_vm5 = vweird.f32 %v3658_v49 }
 0xbd2   : > { %v3896_v43 = vor.u32 1.1754944e-38, %v3895_v12  ;;  %vm3894_vm0 = vcmp.eq.f32.partialorder %v3893_v62, 8.507059e+37 }
 0xbd3   : > { %v3920_v44 = vpop.permute.xlu2 %3919  ;;  %v3872_v52 = vmul.f32 %v4652_v17, %v3871_v15 }
 0xbd4   : > { %3966 = vst.msk [vmem:[%s6362_s14 + $0x10] sm:$0xff] %vm3963_vm12, %v3920_v44 }
 0xbd5   : > { %v3873_v42 = vadd.f32 %v4652_v17, %v3872_v52 }
 0xbd6   : > { %v4654_v61 = vpop.eup %4653 }
 0xbd7   : > { %v3877_v13 = vsel %vm3876_vm15, %v4652_v17, %v3873_v42  ;;  %v3885_v27 = vmul.f32 %v4654_v61, %v3658_v49  ;;  %vm3890_vm4 = vweird.f32 %v4654_v61 }
 0xbd8   : > { %v3882_v36 = vsel %vm3879_vm3, %v3881_v58, %v3877_v13  ;;  %vm3891_vm6 = vmor %vm3889_vm5, %vm3890_vm4 }
 0xbd9   : > { %3943 = vrot.lane.b32.xlu2 %v3882_v36, %s4697_s10  ;;  %v3886_v35 = vsub.f32 1.0, %v3885_v27 }
 0xbdb   : > { %v3916_v57 = vpop.permute.xlu0 %3915  ;;  %v3887_v31 = vmul.f32 %v4654_v61, %v3886_v35 }
 0xbdc   : > { %3964 = vst.msk [vmem:[%s6362_s14] sm:$0xff] %vm3963_vm12, %v3916_v57 }
 0xbdd   : > { %v3888_v7 = vadd.f32 %v4654_v61, %v3887_v31 }
 0xbdf   : > { %v3892_v45 = vsel %vm3891_vm6, %v4654_v61, %v3888_v7 }
 0xbe0   : > { %v3897_v30 = vsel %vm3894_vm0, %v3896_v43, %v3892_v45 }
 0xbe1   : > { %3945 = vrot.lane.b32.xlu1 %v3897_v30, %s4697_s10 }
 0xbe3   : > { %v3918_v0 = vpop.permute.xlu1 %3917 }
 0xbe4   : > { %3965 = vst.msk [vmem:[%s6362_s14 + $0x8] sm:$0xff] %vm3963_vm12, %v3918_v0 }
 0xbeb   : > { %v3926_v14 = vpop.permute.xlu2 %3925 }
 0xbec   : > { %3969 = vst.msk [vmem:[%s6362_s14 + $0x28] sm:$0xff] %vm3963_vm12, %v3926_v14 }
 0xbf3   : > { %v3922_v8 = vpop.permute.xlu0 %3921 }
 0xbf4   : > { %3967 = vst.msk [vmem:[%s6362_s14 + $0x18] sm:$0xff] %vm3963_vm12, %v3922_v8 }
 0xbfb   : > { %v3924_v60 = vpop.permute.xlu0 %3923 }
 0xbfc   : > { %3968 = vst.msk [vmem:[%s6362_s14 + $0x20] sm:$0xff] %vm3963_vm12, %v3924_v60 }
 0xc03   : > { %v3932_v23 = vpop.permute.xlu2 %3931 }
 0xc04   : > { %3972 = vst.msk [vmem:[%s6362_s14 + $0x40] sm:$0xff] %vm3963_vm12, %v3932_v23 }
 0xc0b   : > { %v3928_v24 = vpop.permute.xlu1 %3927 }
 0xc0c   : > { %3970 = vst.msk [vmem:[%s6362_s14 + $0x30] sm:$0xff] %vm3963_vm12, %v3928_v24 }
 0xc13   : > { %v3930_v22 = vpop.permute.xlu0 %3929 }
 0xc14   : > { %3971 = vst.msk [vmem:[%s6362_s14 + $0x38] sm:$0xff] %vm3963_vm12, %v3930_v22 }
 0xc1b   : > { %v3938_v9 = vpop.permute.xlu2 %3937 }
 0xc1c   : > { %3975 = vst.msk [vmem:[%s6362_s14 + $0x58] sm:$0xff] %vm3963_vm12, %v3938_v9 }
 0xc23   : > { %v3934_v56 = vpop.permute.xlu1 %3933 }
 0xc24   : > { %3973 = vst.msk [vmem:[%s6362_s14 + $0x48] sm:$0xff] %vm3963_vm12, %v3934_v56 }
 0xc2b   : > { %v3936_v25 = vpop.permute.xlu0 %3935 }
 0xc2c   : > { %3974 = vst.msk [vmem:[%s6362_s14 + $0x50] sm:$0xff] %vm3963_vm12, %v3936_v25 }
 0xc33   : > { %v3944_v46 = vpop.permute.xlu2 %3943 }
 0xc34   : > { %3978 = vst.msk [vmem:[%s6362_s14 + $0x70] sm:$0xff] %vm3963_vm12, %v3944_v46 }
 0xc3b   : > { %v3940_v54 = vpop.permute.xlu1 %3939 }
 0xc3c   : > { %3976 = vst.msk [vmem:[%s6362_s14 + $0x60] sm:$0xff] %vm3963_vm12, %v3940_v54 }
 0xc43   : > { %v3942_v29 = vpop.permute.xlu0 %3941 }
 0xc44   : > { %3977 = vst.msk [vmem:[%s6362_s14 + $0x68] sm:$0xff] %vm3963_vm12, %v3942_v29 }
 0xc53   : > { %v3946_v41 = vpop.permute.xlu1 %3945 }
 0xc54   : > { %3979 = vst.msk [vmem:[%s6362_s14 + $0x78] sm:$0xff] %vm3963_vm12, %v3946_v41 }
 0xc55 PF: > { %s18_s27 = sadd.s32 1, %s4693_s27  }
 0xc56   : > { %p15_p4 = scmp.ge.s32.totalorder %s18_s27, 4  }
 0xc58   :  { %17 = sbr.rel (!%p15_p4) target bundleno = 1 (0x1), region = 91 }

</bundles_post_ra>
